<compile_context>
chip_gen: v7x
topology: tpu7x:2x2x1
jax: 0.10.0
libtpu: 0.0.40
codegen_flags: <defaults>
</compile_context>

<pallas_src>
import functools
import math

import numpy as np
import jax
import jax.numpy as jnp
from jax import lax
from jax.experimental import pallas as pl
from jax.experimental.pallas import tpu as pltpu

EPS = 1e-5
POOL_SIZES = (1, 2, 3, 6)
# per-branch pooled-grid row padding (multiples of 8 => aligned sublane slices)
BR_PAD = (8, 8, 16, 40)        # >= p*p for p in POOL_SIZES
BR_OFF = (0, 8, 16, 32)
P_TOT = 72                     # sum(BR_PAD)


# ----------------------------- fused Pallas kernel -----------------------------

def _ppm_fused_kernel(alphas_ref, xflat_ref, w9_ref, b0_ref, pmat_ref, umat_ref,
                      wb_ref, bb_ref, wfc_ref, bfp_ref, o_ref, *, wp):
    """One image per grid step: 3x3 conv + BN + PReLU, 4 pyramid branches, fuse."""
    hwp = o_ref.shape[1]                        # H * (W+2) output rows (padded grid)

    # ---- stage 1: 3x3 conv as a single (HWp, 9*Cin) @ (9*Cin, C) MXU matmul ----
    # tap (dy,dx) of the conv over the zero-padded image is a flat shift by
    # dy*Wp + dx of the flattened padded activation (in-VMEM im2col).
    taps = [xflat_ref[0, pl.ds(dy * wp + dx, hwp), :]       # (HWp, Cin) bf16
            for dy in range(3) for dx in range(3)]
    patches = jnp.concatenate(taps, axis=1)                 # (HWp, 9*Cin) bf16
    y = jnp.dot(patches, w9_ref[...],
                preferred_element_type=jnp.float32)         # (HWp, C) f32
    y = y + b0_ref[...]                                     # folded BN bias
    a0 = alphas_ref[0]
    y = jnp.where(y > 0, y, a0 * y)                         # PReLU (f32 epilogue)

    # ---- stage 2: all 4 adaptive-avg-pools as ONE stacked matmul ----
    pooled = jnp.dot(pmat_ref[...], y,
                     preferred_element_type=jnp.float32)    # (72, C)

    # ---- stage 3: per-branch 1x1 conv + BN + PReLU, fuse weight re-associated ----
    g_parts = []
    for s in range(4):
        ps = pooled[BR_OFF[s]:BR_OFF[s] + BR_PAD[s]]        # (pad_s, C), 8-aligned
        z = jnp.dot(ps, wb_ref[s],
                    preferred_element_type=jnp.float32) + bb_ref[s]
        a = alphas_ref[1 + s]
        act = jnp.where(z > 0, z, a * z)
        # fold the branch's chunk of the fuse weight before upsampling
        g_parts.append(jnp.dot(act, wfc_ref[s],
                               preferred_element_type=jnp.float32))  # (pad_s, 128)
    g = jnp.concatenate(g_parts, axis=0)                    # (72, 128)

    # ---- stage 4: all 4 bilinear upsamples + fuse conv as ONE stacked matmul ----
    zf = jnp.dot(umat_ref[...], g,
                 preferred_element_type=jnp.float32) + bfp_ref[...]  # (HWp, 128)
    af = alphas_ref[5]
    out = jnp.where(zf > 0, zf, af * zf)
    o_ref[...] = out.reshape(1, hwp, out.shape[-1])         # lane-dense (128) store


# ----------------------------- pallas_call wrapper -----------------------------

def ppm_pallas(xflat_bf16, P, h, w):
    n, rows_pad, cin = xflat_bf16.shape
    wp = w + 2
    hwp = h * wp
    C = P['b0'].shape[-1]
    co_pad = P['bfp'].shape[-1]
    w9_bf = P['w9'].astype(jnp.bfloat16)

    kernel = functools.partial(_ppm_fused_kernel, wp=wp)
    return pl.pallas_call(
        kernel,
        out_shape=jax.ShapeDtypeStruct((n, hwp, co_pad), jnp.float32),
        grid=(n,),
        in_specs=[
            pl.BlockSpec(memory_space=pltpu.MemorySpace.SMEM),        # alphas (6,)
            pl.BlockSpec((1, rows_pad, cin), lambda b: (b, 0, 0)),    # padded act (bf16)
            pl.BlockSpec((9 * cin, C), lambda b: (0, 0)),             # conv weight (bf16)
            pl.BlockSpec((1, C), lambda b: (0, 0)),                   # conv/BN bias
            pl.BlockSpec((P_TOT, hwp), lambda b: (0, 0)),             # stacked pool mat
            pl.BlockSpec((hwp, P_TOT), lambda b: (0, 0)),             # stacked upsample mat
            pl.BlockSpec((4, C, C), lambda b: (0, 0, 0)),             # branch 1x1 weights
            pl.BlockSpec((4, 1, C), lambda b: (0, 0, 0)),             # branch biases
            pl.BlockSpec((4, C, co_pad), lambda b: (0, 0, 0)),        # fuse weight chunks
            pl.BlockSpec((1, co_pad), lambda b: (0, 0)),              # fuse bias (padded)
        ],
        out_specs=pl.BlockSpec((1, hwp, co_pad), lambda b: (b, 0, 0)),
        compiler_params=pltpu.CompilerParams(dimension_semantics=("parallel",)),
    )(P['alphas'], xflat_bf16, w9_bf, P['b0'], P['pmat_k'], P['umat_k'],
      P['wb'], P['bb'], P['wfc'], P['bfp'])


# ----------------------------- glue: pooling / upsample matrices -----------------------------

def _adaptive_pool_1d(in_size, out_size):
    m = np.zeros((out_size, in_size), np.float32)
    for i in range(out_size):
        s = (i * in_size) // out_size
        e = -((-(i + 1) * in_size) // out_size)
        m[i, s:e] = 1.0 / (e - s)
    return m


def _bilinear_up_1d(out_size, in_size):
    # align_corners=True
    m = np.zeros((out_size, in_size), np.float32)
    if in_size == 1:
        m[:, 0] = 1.0
        return m
    scale = (in_size - 1) / (out_size - 1)
    for i in range(out_size):
        src = i * scale
        i0 = int(math.floor(src))
        i1 = min(i0 + 1, in_size - 1)
        frac = src - i0
        m[i, i0] += 1.0 - frac
        m[i, i1] += frac
    return m


def make_pool_up_mats(h, w):
    """Kernel-format stacked mats over the W-padded grid + exact reference mats."""
    wp = w + 2
    pmat_k = np.zeros((P_TOT, h * wp), np.float32)
    umat_k = np.zeros((h * wp, P_TOT), np.float32)
    pmats_r, umats_r = [], []
    for s, p in enumerate(POOL_SIZES):
        ph = _adaptive_pool_1d(h, p)            # (p, h)
        pw = _adaptive_pool_1d(w, p)            # (p, w)
        uh = _bilinear_up_1d(h, p)              # (h, p)
        uw = _bilinear_up_1d(w, p)              # (w, p)
        pmats_r.append(np.kron(ph, pw))         # (p*p, h*w)
        umats_r.append(np.kron(uh, uw))         # (h*w, p*p)
        # kernel versions act on the H x (W+2) grid; padded columns get zero weight
        pw_pad = np.zeros((p, wp), np.float32); pw_pad[:, :w] = pw
        uw_pad = np.zeros((wp, p), np.float32); uw_pad[:w, :] = uw
        pm_k = np.kron(ph, pw_pad)              # (p*p, h*wp)
        um_k = np.kron(uh, uw_pad)              # (h*wp, p*p)
        off = BR_OFF[s]
        pmat_k[off:off + p * p] = pm_k
        umat_k[:, off:off + p * p] = um_k
    return pmat_k, umat_k, pmats_r, umats_r


# ----------------------------- parameters (BN folded, inference mode) -----------------------------

def init_params(key, down_dim, cin, h, w):
    C = down_dim
    ks = jax.random.split(key, 18)

    def bn_fold(kg, kb, km, kv, shape):
        gamma = jax.random.uniform(kg, shape, jnp.float32, 0.5, 1.5)
        beta = jax.random.normal(kb, shape, jnp.float32) * 0.1
        mean = jax.random.normal(km, shape, jnp.float32) * 0.1
        var = jax.random.uniform(kv, shape, jnp.float32, 0.5, 1.5)
        scale = gamma / jnp.sqrt(var + EPS)
        shift = beta - mean * scale
        return scale, shift

    # down_conv: Conv2d(512, C, 3, padding=1) + BN + PReLU (BN folded)
    w0 = jax.random.normal(ks[0], (3, 3, cin, C), jnp.float32) / math.sqrt(9 * cin)
    b0 = jax.random.normal(ks[1], (C,), jnp.float32) * 0.01
    s0, t0 = bn_fold(ks[2], ks[3], ks[4], ks[5], (C,))
    w9 = (w0 * s0).reshape(9 * cin, C)          # rows ordered (dy*3+dx)*Cin + ci
    b0f = (b0 * s0 + t0).reshape(1, C)

    # pyramid branches: 1x1 conv + BN + PReLU (pool sizes 1,2,3,6)
    wb = jax.random.normal(ks[6], (4, C, C), jnp.float32) / math.sqrt(C)
    bb = jax.random.normal(ks[7], (4, C), jnp.float32) * 0.01
    sb, tb = bn_fold(ks[8], ks[9], ks[10], ks[11], (4, C))
    wbf = wb * sb[:, None, :]
    bbf = (bb * sb + tb).reshape(4, 1, C)

    # fuse: 1x1 conv (4C -> C) + BN + PReLU
    wf = jax.random.normal(ks[12], (4 * C, C), jnp.float32) / math.sqrt(4 * C)
    bf = jax.random.normal(ks[13], (C,), jnp.float32) * 0.01
    sf, tf = bn_fold(ks[14], ks[15], ks[16], ks[17], (C,))
    wff = wf * sf
    bff = (bf * sf + tf).reshape(1, C)

    # PReLU slopes: down-conv, 4 branches, fuse
    alphas = jnp.asarray([0.25, 0.25, 0.2, 0.15, 0.1, 0.3], jnp.float32)

    # kernel format: fuse weight re-associated per branch, output channels padded
    # to 128 lanes (zero columns) for a lane-dense final store.
    co_pad = ((C + 127) // 128) * 128
    wfc = np.zeros((4, C, co_pad), np.float32)
    wfc[:, :, :C] = np.asarray(wff).reshape(4, C, C)
    bfp = np.zeros((1, co_pad), np.float32)
    bfp[:, :C] = np.asarray(bff)

    pmat_k, umat_k, pmats_r, umats_r = make_pool_up_mats(h, w)

    return dict(w9=w9, b0=b0f, wb=wbf, bb=bbf, wf=wff, bf=bff, alphas=alphas,
                wfc=jnp.asarray(wfc), bfp=jnp.asarray(bfp),
                pmat_k=jnp.asarray(pmat_k), umat_k=jnp.asarray(umat_k),
                pmats_r=[jnp.asarray(m) for m in pmats_r],
                umats_r=[jnp.asarray(m) for m in umats_r])


# ----------------------------- forward (wrapper) -----------------------------

def ppm_forward(x_nchw, P):
    n, cin, h, w = x_nchw.shape
    wp = w + 2
    C = P['b0'].shape[-1]

    x = jnp.transpose(x_nchw, (0, 2, 3, 1))                      # NCHW -> NHWC
    xpad = jnp.pad(x, ((0, 0), (1, 1), (1, 1), (0, 0)))          # (n, h+2, w+2, cin)
    xflat = xpad.reshape(n, (h + 2) * wp, cin)
    rows = (h + 2) * wp
    rows_pad = ((rows + 2 + 7) // 8) * 8                         # room for max tap shift
    xflat = jnp.pad(xflat, ((0, 0), (0, rows_pad - rows), (0, 0)))
    xflat = xflat.astype(jnp.bfloat16)                           # halve activation DMA

    out = ppm_pallas(xflat, P, h, w)                             # (n, h*wp, 128)
    out = out.reshape(n, h, wp, -1)[:, :, :w, :C]                # drop pad cols / chans
    return jnp.transpose(out, (0, 3, 1, 2))                      # back to NCHW


# ----------------------------- pure-JAX reference (PyTorch dataflow) -----------------------------

def ref_forward(x_nchw, P):
    n, cin, h, w = x_nchw.shape
    C = P['b0'].shape[-1]
    x = jnp.transpose(x_nchw, (0, 2, 3, 1))
    w0 = P['w9'].reshape(3, 3, cin, C)
    y = lax.conv_general_dilated(x, w0, (1, 1), ((1, 1), (1, 1)),
                                 dimension_numbers=('NHWC', 'HWIO', 'NHWC'),
                                 precision=lax.Precision.HIGHEST)
    y = y + P['b0']
    a0 = P['alphas'][0]
    y = jnp.where(y > 0, y, a0 * y)
    yf = y.reshape(n, h * w, C)
    ups = []
    for s in range(4):
        pooled = jnp.einsum('pk,nkc->npc', P['pmats_r'][s], yf, precision='highest')
        z = jnp.einsum('npc,cd->npd', pooled, P['wb'][s], precision='highest') + P['bb'][s]
        a = P['alphas'][1 + s]
        act = jnp.where(z > 0, z, a * z)
        ups.append(jnp.einsum('kp,npc->nkc', P['umats_r'][s], act, precision='highest'))
    cat = jnp.concatenate(ups, axis=-1)
    zf = jnp.einsum('nkc,cd->nkd', cat, P['wf'], precision='highest') + P['bf']
    af = P['alphas'][5]
    out = jnp.where(zf > 0, zf, af * zf)
    return out.reshape(n, h, w, C).transpose(0, 3, 1, 2)


# ----------------------------- main -----------------------------

if __name__ == "__main__":
    N, CIN, H, W = 2, 512, 8, 8   # module fixes Cin=512 (Conv2d(512, down_dim, 3))
    DOWN_DIM = 32

    key = jax.random.PRNGKey(0)
    kx, kp = jax.random.split(key)
    x = jax.random.normal(kx, (N, CIN, H, W), jnp.float32)
    params = init_params(kp, DOWN_DIM, CIN, H, W)

    out = jax.block_until_ready(ppm_forward(x, params))
    assert out.shape == (N, DOWN_DIM, H, W), out.shape

    ref = jax.block_until_ready(ref_forward(x, params))
    # bf16 MXU operands on the K=4608 conv (f32 accumulation) vs an f32/highest
    # reference => use a bf16-appropriate tolerance.
    np.testing.assert_allclose(np.asarray(out), np.asarray(ref),
                               rtol=2e-2, atol=2e-2)
    print("KERNEL_OK")
</pallas_src>

<mosaic_0001>
module attributes {stable_mosaic.version = 11 : i64} {
  func.func @_ppm_fused_kernel(%arg0: i32, %arg1: memref<6xf32, #tpu.memory_space<smem>>, %arg2: memref<1x104x512xbf16, #tpu.memory_space<vmem>>, %arg3: memref<4608x32xbf16, #tpu.memory_space<vmem>>, %arg4: memref<1x32xf32, #tpu.memory_space<vmem>>, %arg5: memref<72x80xf32, #tpu.memory_space<vmem>>, %arg6: memref<80x72xf32, #tpu.memory_space<vmem>>, %arg7: memref<4x32x32xf32, #tpu.memory_space<vmem>>, %arg8: memref<4x1x32xf32, #tpu.memory_space<vmem>>, %arg9: memref<4x32x128xf32, #tpu.memory_space<vmem>>, %arg10: memref<1x128xf32, #tpu.memory_space<vmem>>, %arg11: memref<1x80x128xf32, #tpu.memory_space<vmem>>) attributes {dimension_semantics = [#tpu.dimension_semantics<parallel>], iteration_bounds = array<i64: 2>, scalar_prefetch = 0 : i64, scratch_operands = 0 : i64, tpu.core_type = #tpu.core_type<tc>, window_params = [{transform_indices = @transform_0, window_bounds = array<i64: 6>}, {transform_indices = @transform_1, window_bounds = array<i64: 1, 104, 512>}, {pipeline_mode = #tpu.pipeline_mode<synchronous>, transform_indices = @transform_2, window_bounds = array<i64: 4608, 32>}, {pipeline_mode = #tpu.pipeline_mode<synchronous>, transform_indices = @transform_3, window_bounds = array<i64: 1, 32>}, {pipeline_mode = #tpu.pipeline_mode<synchronous>, transform_indices = @transform_4, window_bounds = array<i64: 72, 80>}, {pipeline_mode = #tpu.pipeline_mode<synchronous>, transform_indices = @transform_5, window_bounds = array<i64: 80, 72>}, {pipeline_mode = #tpu.pipeline_mode<synchronous>, transform_indices = @transform_6, window_bounds = array<i64: 4, 32, 32>}, {pipeline_mode = #tpu.pipeline_mode<synchronous>, transform_indices = @transform_7, window_bounds = array<i64: 4, 1, 32>}, {pipeline_mode = #tpu.pipeline_mode<synchronous>, transform_indices = @transform_8, window_bounds = array<i64: 4, 32, 128>}, {pipeline_mode = #tpu.pipeline_mode<synchronous>, transform_indices = @transform_9, window_bounds = array<i64: 1, 128>}, {transform_indices = @transform_10, window_bounds = array<i64: 1, 80, 128>}]} {
    %c0 = arith.constant 0 : index
    %c0_0 = arith.constant 0 : index
    %c0_1 = arith.constant 0 : index
    %0 = vector.load %arg2[%c0, %c0_0, %c0_1] : memref<1x104x512xbf16, #tpu.memory_space<vmem>>, vector<1x80x512xbf16>
    %1 = vector.shape_cast %0 : vector<1x80x512xbf16> to vector<80x512xbf16>
    %c0_2 = arith.constant 0 : index
    %c1 = arith.constant 1 : index
    %c0_3 = arith.constant 0 : index
    %2 = vector.load %arg2[%c0_2, %c1, %c0_3] : memref<1x104x512xbf16, #tpu.memory_space<vmem>>, vector<1x80x512xbf16>
    %3 = vector.shape_cast %2 : vector<1x80x512xbf16> to vector<80x512xbf16>
    %c0_4 = arith.constant 0 : index
    %c2 = arith.constant 2 : index
    %c0_5 = arith.constant 0 : index
    %4 = vector.load %arg2[%c0_4, %c2, %c0_5] : memref<1x104x512xbf16, #tpu.memory_space<vmem>>, vector<1x80x512xbf16>
    %5 = vector.shape_cast %4 : vector<1x80x512xbf16> to vector<80x512xbf16>
    %c0_6 = arith.constant 0 : index
    %c10 = arith.constant 10 : index
    %c0_7 = arith.constant 0 : index
    %6 = vector.load %arg2[%c0_6, %c10, %c0_7] : memref<1x104x512xbf16, #tpu.memory_space<vmem>>, vector<1x80x512xbf16>
    %7 = vector.shape_cast %6 : vector<1x80x512xbf16> to vector<80x512xbf16>
    %c0_8 = arith.constant 0 : index
    %c11 = arith.constant 11 : index
    %c0_9 = arith.constant 0 : index
    %8 = vector.load %arg2[%c0_8, %c11, %c0_9] : memref<1x104x512xbf16, #tpu.memory_space<vmem>>, vector<1x80x512xbf16>
    %9 = vector.shape_cast %8 : vector<1x80x512xbf16> to vector<80x512xbf16>
    %c0_10 = arith.constant 0 : index
    %c12 = arith.constant 12 : index
    %c0_11 = arith.constant 0 : index
    %10 = vector.load %arg2[%c0_10, %c12, %c0_11] : memref<1x104x512xbf16, #tpu.memory_space<vmem>>, vector<1x80x512xbf16>
    %11 = vector.shape_cast %10 : vector<1x80x512xbf16> to vector<80x512xbf16>
    %c0_12 = arith.constant 0 : index
    %c20 = arith.constant 20 : index
    %c0_13 = arith.constant 0 : index
    %12 = vector.load %arg2[%c0_12, %c20, %c0_13] : memref<1x104x512xbf16, #tpu.memory_space<vmem>>, vector<1x80x512xbf16>
    %13 = vector.shape_cast %12 : vector<1x80x512xbf16> to vector<80x512xbf16>
    %c0_14 = arith.constant 0 : index
    %c21 = arith.constant 21 : index
    %c0_15 = arith.constant 0 : index
    %14 = vector.load %arg2[%c0_14, %c21, %c0_15] : memref<1x104x512xbf16, #tpu.memory_space<vmem>>, vector<1x80x512xbf16>
    %15 = vector.shape_cast %14 : vector<1x80x512xbf16> to vector<80x512xbf16>
    %c0_16 = arith.constant 0 : index
    %c22 = arith.constant 22 : index
    %c0_17 = arith.constant 0 : index
    %16 = vector.load %arg2[%c0_16, %c22, %c0_17] : memref<1x104x512xbf16, #tpu.memory_space<vmem>>, vector<1x80x512xbf16>
    %17 = vector.shape_cast %16 : vector<1x80x512xbf16> to vector<80x512xbf16>
    %18 = tpu.concatenate %1, %3, %5, %7, %9, %11, %13, %15, %17 in 1 : vector<80x512xbf16>, vector<80x512xbf16>, vector<80x512xbf16>, vector<80x512xbf16>, vector<80x512xbf16>, vector<80x512xbf16>, vector<80x512xbf16>, vector<80x512xbf16>, vector<80x512xbf16> -> vector<80x4608xbf16>
    %c0_18 = arith.constant 0 : index
    %c0_19 = arith.constant 0 : index
    %19 = vector.load %arg3[%c0_18, %c0_19] : memref<4608x32xbf16, #tpu.memory_space<vmem>>, vector<4608x32xbf16>
    %cst = arith.constant dense<0.000000e+00> : vector<80x32xf32>
    %20 = tpu.matmul %18, %19, %cst {dimension_numbers = #tpu.dot_dimension_numbers<[1], [0], [0], [1], [0, 0, 1, 1], [], []>} : vector<80x4608xbf16>, vector<4608x32xbf16>, vector<80x32xf32> -> vector<80x32xf32>
    %c0_20 = arith.constant 0 : index
    %c0_21 = arith.constant 0 : index
    %21 = vector.load %arg4[%c0_20, %c0_21] : memref<1x32xf32, #tpu.memory_space<vmem>>, vector<1x32xf32>
    %22 = vector.broadcast %21 : vector<1x32xf32> to vector<80x32xf32>
    %23 = arith.addf %20, %22 : vector<80x32xf32>
    %c0_22 = arith.constant 0 : index
    %24 = memref.load %arg1[%c0_22] : memref<6xf32, #tpu.memory_space<smem>>
    %cst_23 = arith.constant 0.000000e+00 : f32
    %25 = vector.broadcast %cst_23 : f32 to vector<80x32xf32>
    %26 = arith.cmpf ogt, %23, %25 : vector<80x32xf32>
    %27 = vector.broadcast %24 : f32 to vector<80x32xf32>
    %28 = arith.mulf %27, %23 : vector<80x32xf32>
    %29 = arith.select %26, %23, %28 : vector<80x32xi1>, vector<80x32xf32>
    %c0_24 = arith.constant 0 : index
    %c0_25 = arith.constant 0 : index
    %30 = vector.load %arg5[%c0_24, %c0_25] : memref<72x80xf32, #tpu.memory_space<vmem>>, vector<72x80xf32>
    %cst_26 = arith.constant dense<0.000000e+00> : vector<72x32xf32>
    %31 = tpu.matmul %30, %29, %cst_26 {dimension_numbers = #tpu.dot_dimension_numbers<[1], [0], [0], [1], [0, 0, 1, 1], [], []>} : vector<72x80xf32>, vector<80x32xf32>, vector<72x32xf32> -> vector<72x32xf32>
    %32 = vector.extract_strided_slice %31 {offsets = [0, 0], sizes = [8, 32], strides = [1, 1]} : vector<72x32xf32> to vector<8x32xf32>
    %c0_27 = arith.constant 0 : index
    %c0_28 = arith.constant 0 : index
    %c0_29 = arith.constant 0 : index
    %33 = vector.load %arg7[%c0_27, %c0_28, %c0_29] : memref<4x32x32xf32, #tpu.memory_space<vmem>>, vector<1x32x32xf32>
    %34 = vector.shape_cast %33 : vector<1x32x32xf32> to vector<32x32xf32>
    %cst_30 = arith.constant dense<0.000000e+00> : vector<8x32xf32>
    %35 = tpu.matmul %32, %34, %cst_30 {dimension_numbers = #tpu.dot_dimension_numbers<[1], [0], [0], [1], [0, 0, 1, 1], [], []>} : vector<8x32xf32>, vector<32x32xf32>, vector<8x32xf32> -> vector<8x32xf32>
    %c0_31 = arith.constant 0 : index
    %c0_32 = arith.constant 0 : index
    %c0_33 = arith.constant 0 : index
    %36 = vector.load %arg8[%c0_31, %c0_32, %c0_33] : memref<4x1x32xf32, #tpu.memory_space<vmem>>, vector<1x1x32xf32>
    %37 = vector.shape_cast %36 : vector<1x1x32xf32> to vector<1x32xf32>
    %38 = vector.broadcast %37 : vector<1x32xf32> to vector<8x32xf32>
    %39 = arith.addf %35, %38 : vector<8x32xf32>
    %c1_34 = arith.constant 1 : index
    %40 = memref.load %arg1[%c1_34] : memref<6xf32, #tpu.memory_space<smem>>
    %cst_35 = arith.constant 0.000000e+00 : f32
    %41 = vector.broadcast %cst_35 : f32 to vector<8x32xf32>
    %42 = arith.cmpf ogt, %39, %41 : vector<8x32xf32>
    %43 = vector.broadcast %40 : f32 to vector<8x32xf32>
    %44 = arith.mulf %43, %39 : vector<8x32xf32>
    %45 = arith.select %42, %39, %44 : vector<8x32xi1>, vector<8x32xf32>
    %c0_36 = arith.constant 0 : index
    %c0_37 = arith.constant 0 : index
    %c0_38 = arith.constant 0 : index
    %46 = vector.load %arg9[%c0_36, %c0_37, %c0_38] : memref<4x32x128xf32, #tpu.memory_space<vmem>>, vector<1x32x128xf32>
    %47 = vector.shape_cast %46 : vector<1x32x128xf32> to vector<32x128xf32>
    %cst_39 = arith.constant dense<0.000000e+00> : vector<8x128xf32>
    %48 = tpu.matmul %45, %47, %cst_39 {dimension_numbers = #tpu.dot_dimension_numbers<[1], [0], [0], [1], [0, 0, 1, 1], [], []>} : vector<8x32xf32>, vector<32x128xf32>, vector<8x128xf32> -> vector<8x128xf32>
    %49 = vector.extract_strided_slice %31 {offsets = [8, 0], sizes = [8, 32], strides = [1, 1]} : vector<72x32xf32> to vector<8x32xf32>
    %c1_40 = arith.constant 1 : index
    %c0_41 = arith.constant 0 : index
    %c0_42 = arith.constant 0 : index
    %50 = vector.load %arg7[%c1_40, %c0_41, %c0_42] : memref<4x32x32xf32, #tpu.memory_space<vmem>>, vector<1x32x32xf32>
    %51 = vector.shape_cast %50 : vector<1x32x32xf32> to vector<32x32xf32>
    %cst_43 = arith.constant dense<0.000000e+00> : vector<8x32xf32>
    %52 = tpu.matmul %49, %51, %cst_43 {dimension_numbers = #tpu.dot_dimension_numbers<[1], [0], [0], [1], [0, 0, 1, 1], [], []>} : vector<8x32xf32>, vector<32x32xf32>, vector<8x32xf32> -> vector<8x32xf32>
    %c1_44 = arith.constant 1 : index
    %c0_45 = arith.constant 0 : index
    %c0_46 = arith.constant 0 : index
    %53 = vector.load %arg8[%c1_44, %c0_45, %c0_46] : memref<4x1x32xf32, #tpu.memory_space<vmem>>, vector<1x1x32xf32>
    %54 = vector.shape_cast %53 : vector<1x1x32xf32> to vector<1x32xf32>
    %55 = vector.broadcast %54 : vector<1x32xf32> to vector<8x32xf32>
    %56 = arith.addf %52, %55 : vector<8x32xf32>
    %c2_47 = arith.constant 2 : index
    %57 = memref.load %arg1[%c2_47] : memref<6xf32, #tpu.memory_space<smem>>
    %cst_48 = arith.constant 0.000000e+00 : f32
    %58 = vector.broadcast %cst_48 : f32 to vector<8x32xf32>
    %59 = arith.cmpf ogt, %56, %58 : vector<8x32xf32>
    %60 = vector.broadcast %57 : f32 to vector<8x32xf32>
    %61 = arith.mulf %60, %56 : vector<8x32xf32>
    %62 = arith.select %59, %56, %61 : vector<8x32xi1>, vector<8x32xf32>
    %c1_49 = arith.constant 1 : index
    %c0_50 = arith.constant 0 : index
    %c0_51 = arith.constant 0 : index
    %63 = vector.load %arg9[%c1_49, %c0_50, %c0_51] : memref<4x32x128xf32, #tpu.memory_space<vmem>>, vector<1x32x128xf32>
    %64 = vector.shape_cast %63 : vector<1x32x128xf32> to vector<32x128xf32>
    %cst_52 = arith.constant dense<0.000000e+00> : vector<8x128xf32>
    %65 = tpu.matmul %62, %64, %cst_52 {dimension_numbers = #tpu.dot_dimension_numbers<[1], [0], [0], [1], [0, 0, 1, 1], [], []>} : vector<8x32xf32>, vector<32x128xf32>, vector<8x128xf32> -> vector<8x128xf32>
    %66 = vector.extract_strided_slice %31 {offsets = [16, 0], sizes = [16, 32], strides = [1, 1]} : vector<72x32xf32> to vector<16x32xf32>
    %c2_53 = arith.constant 2 : index
    %c0_54 = arith.constant 0 : index
    %c0_55 = arith.constant 0 : index
    %67 = vector.load %arg7[%c2_53, %c0_54, %c0_55] : memref<4x32x32xf32, #tpu.memory_space<vmem>>, vector<1x32x32xf32>
    %68 = vector.shape_cast %67 : vector<1x32x32xf32> to vector<32x32xf32>
    %cst_56 = arith.constant dense<0.000000e+00> : vector<16x32xf32>
    %69 = tpu.matmul %66, %68, %cst_56 {dimension_numbers = #tpu.dot_dimension_numbers<[1], [0], [0], [1], [0, 0, 1, 1], [], []>} : vector<16x32xf32>, vector<32x32xf32>, vector<16x32xf32> -> vector<16x32xf32>
    %c2_57 = arith.constant 2 : index
    %c0_58 = arith.constant 0 : index
    %c0_59 = arith.constant 0 : index
    %70 = vector.load %arg8[%c2_57, %c0_58, %c0_59] : memref<4x1x32xf32, #tpu.memory_space<vmem>>, vector<1x1x32xf32>
    %71 = vector.shape_cast %70 : vector<1x1x32xf32> to vector<1x32xf32>
    %72 = vector.broadcast %71 : vector<1x32xf32> to vector<16x32xf32>
    %73 = arith.addf %69, %72 : vector<16x32xf32>
    %c3 = arith.constant 3 : index
    %74 = memref.load %arg1[%c3] : memref<6xf32, #tpu.memory_space<smem>>
    %cst_60 = arith.constant 0.000000e+00 : f32
    %75 = vector.broadcast %cst_60 : f32 to vector<16x32xf32>
    %76 = arith.cmpf ogt, %73, %75 : vector<16x32xf32>
    %77 = vector.broadcast %74 : f32 to vector<16x32xf32>
    %78 = arith.mulf %77, %73 : vector<16x32xf32>
    %79 = arith.select %76, %73, %78 : vector<16x32xi1>, vector<16x32xf32>
    %c2_61 = arith.constant 2 : index
    %c0_62 = arith.constant 0 : index
    %c0_63 = arith.constant 0 : index
    %80 = vector.load %arg9[%c2_61, %c0_62, %c0_63] : memref<4x32x128xf32, #tpu.memory_space<vmem>>, vector<1x32x128xf32>
    %81 = vector.shape_cast %80 : vector<1x32x128xf32> to vector<32x128xf32>
    %cst_64 = arith.constant dense<0.000000e+00> : vector<16x128xf32>
    %82 = tpu.matmul %79, %81, %cst_64 {dimension_numbers = #tpu.dot_dimension_numbers<[1], [0], [0], [1], [0, 0, 1, 1], [], []>} : vector<16x32xf32>, vector<32x128xf32>, vector<16x128xf32> -> vector<16x128xf32>
    %83 = vector.extract_strided_slice %31 {offsets = [32, 0], sizes = [40, 32], strides = [1, 1]} : vector<72x32xf32> to vector<40x32xf32>
    %c3_65 = arith.constant 3 : index
    %c0_66 = arith.constant 0 : index
    %c0_67 = arith.constant 0 : index
    %84 = vector.load %arg7[%c3_65, %c0_66, %c0_67] : memref<4x32x32xf32, #tpu.memory_space<vmem>>, vector<1x32x32xf32>
    %85 = vector.shape_cast %84 : vector<1x32x32xf32> to vector<32x32xf32>
    %cst_68 = arith.constant dense<0.000000e+00> : vector<40x32xf32>
    %86 = tpu.matmul %83, %85, %cst_68 {dimension_numbers = #tpu.dot_dimension_numbers<[1], [0], [0], [1], [0, 0, 1, 1], [], []>} : vector<40x32xf32>, vector<32x32xf32>, vector<40x32xf32> -> vector<40x32xf32>
    %c3_69 = arith.constant 3 : index
    %c0_70 = arith.constant 0 : index
    %c0_71 = arith.constant 0 : index
    %87 = vector.load %arg8[%c3_69, %c0_70, %c0_71] : memref<4x1x32xf32, #tpu.memory_space<vmem>>, vector<1x1x32xf32>
    %88 = vector.shape_cast %87 : vector<1x1x32xf32> to vector<1x32xf32>
    %89 = vector.broadcast %88 : vector<1x32xf32> to vector<40x32xf32>
    %90 = arith.addf %86, %89 : vector<40x32xf32>
    %c4 = arith.constant 4 : index
    %91 = memref.load %arg1[%c4] : memref<6xf32, #tpu.memory_space<smem>>
    %cst_72 = arith.constant 0.000000e+00 : f32
    %92 = vector.broadcast %cst_72 : f32 to vector<40x32xf32>
    %93 = arith.cmpf ogt, %90, %92 : vector<40x32xf32>
    %94 = vector.broadcast %91 : f32 to vector<40x32xf32>
    %95 = arith.mulf %94, %90 : vector<40x32xf32>
    %96 = arith.select %93, %90, %95 : vector<40x32xi1>, vector<40x32xf32>
    %c3_73 = arith.constant 3 : index
    %c0_74 = arith.constant 0 : index
    %c0_75 = arith.constant 0 : index
    %97 = vector.load %arg9[%c3_73, %c0_74, %c0_75] : memref<4x32x128xf32, #tpu.memory_space<vmem>>, vector<1x32x128xf32>
    %98 = vector.shape_cast %97 : vector<1x32x128xf32> to vector<32x128xf32>
    %cst_76 = arith.constant dense<0.000000e+00> : vector<40x128xf32>
    %99 = tpu.matmul %96, %98, %cst_76 {dimension_numbers = #tpu.dot_dimension_numbers<[1], [0], [0], [1], [0, 0, 1, 1], [], []>} : vector<40x32xf32>, vector<32x128xf32>, vector<40x128xf32> -> vector<40x128xf32>
    %100 = tpu.concatenate %48, %65, %82, %99 in 0 : vector<8x128xf32>, vector<8x128xf32>, vector<16x128xf32>, vector<40x128xf32> -> vector<72x128xf32>
    %c0_77 = arith.constant 0 : index
    %c0_78 = arith.constant 0 : index
    %101 = vector.load %arg6[%c0_77, %c0_78] : memref<80x72xf32, #tpu.memory_space<vmem>>, vector<80x72xf32>
    %cst_79 = arith.constant dense<0.000000e+00> : vector<80x128xf32>
    %102 = tpu.matmul %101, %100, %cst_79 {dimension_numbers = #tpu.dot_dimension_numbers<[1], [0], [0], [1], [0, 0, 1, 1], [], []>} : vector<80x72xf32>, vector<72x128xf32>, vector<80x128xf32> -> vector<80x128xf32>
    %c0_80 = arith.constant 0 : index
    %c0_81 = arith.constant 0 : index
    %103 = vector.load %arg10[%c0_80, %c0_81] : memref<1x128xf32, #tpu.memory_space<vmem>>, vector<1x128xf32>
    %104 = vector.broadcast %103 : vector<1x128xf32> to vector<80x128xf32>
    %105 = arith.addf %102, %104 : vector<80x128xf32>
    %c5 = arith.constant 5 : index
    %106 = memref.load %arg1[%c5] : memref<6xf32, #tpu.memory_space<smem>>
    %cst_82 = arith.constant 0.000000e+00 : f32
    %107 = vector.broadcast %cst_82 : f32 to vector<80x128xf32>
    %108 = arith.cmpf ogt, %105, %107 : vector<80x128xf32>
    %109 = vector.broadcast %106 : f32 to vector<80x128xf32>
    %110 = arith.mulf %109, %105 : vector<80x128xf32>
    %111 = arith.select %108, %105, %110 : vector<80x128xi1>, vector<80x128xf32>
    %112 = vector.shape_cast %111 : vector<80x128xf32> to vector<1x80x128xf32>
    %c0_83 = arith.constant 0 : index
    %c0_84 = arith.constant 0 : index
    %c0_85 = arith.constant 0 : index
    %113 = vector.load %arg11[%c0_83, %c0_84, %c0_85] : memref<1x80x128xf32, #tpu.memory_space<vmem>>, vector<1x80x128xf32>
    tpu.vector_store %arg11[%c0_83, %c0_84, %c0_85], %112 {strides = array<i32>} : memref<1x80x128xf32, #tpu.memory_space<vmem>>, vector<1x80x128xf32>,
    return
  }
  func.func @transform_0(%arg0: i32) -> i32 {
    %c0_i32 = arith.constant 0 : i32
    %c0_i32_0 = arith.constant 0 : i32
    return %c0_i32 : i32
  }
  func.func @transform_1(%arg0: i32) -> (i32, i32, i32) {
    %c0_i32 = arith.constant 0 : i32
    %c0_i32_0 = arith.constant 0 : i32
    %c0_i32_1 = arith.constant 0 : i32
    return %arg0, %c0_i32, %c0_i32_0 : i32, i32, i32
  }
  func.func @transform_2(%arg0: i32) -> (i32, i32) {
    %c0_i32 = arith.constant 0 : i32
    %c0_i32_0 = arith.constant 0 : i32
    %c0_i32_1 = arith.constant 0 : i32
    return %c0_i32, %c0_i32_0 : i32, i32
  }
  func.func @transform_3(%arg0: i32) -> (i32, i32) {
    %c0_i32 = arith.constant 0 : i32
    %c0_i32_0 = arith.constant 0 : i32
    %c0_i32_1 = arith.constant 0 : i32
    return %c0_i32, %c0_i32_0 : i32, i32
  }
  func.func @transform_4(%arg0: i32) -> (i32, i32) {
    %c0_i32 = arith.constant 0 : i32
    %c0_i32_0 = arith.constant 0 : i32
    %c0_i32_1 = arith.constant 0 : i32
    return %c0_i32, %c0_i32_0 : i32, i32
  }
  func.func @transform_5(%arg0: i32) -> (i32, i32) {
    %c0_i32 = arith.constant 0 : i32
    %c0_i32_0 = arith.constant 0 : i32
    %c0_i32_1 = arith.constant 0 : i32
    return %c0_i32, %c0_i32_0 : i32, i32
  }
  func.func @transform_6(%arg0: i32) -> (i32, i32, i32) {
    %c0_i32 = arith.constant 0 : i32
    %c0_i32_0 = arith.constant 0 : i32
    %c0_i32_1 = arith.constant 0 : i32
    %c0_i32_2 = arith.constant 0 : i32
    return %c0_i32, %c0_i32_0, %c0_i32_1 : i32, i32, i32
  }
  func.func @transform_7(%arg0: i32) -> (i32, i32, i32) {
    %c0_i32 = arith.constant 0 : i32
    %c0_i32_0 = arith.constant 0 : i32
    %c0_i32_1 = arith.constant 0 : i32
    %c0_i32_2 = arith.constant 0 : i32
    return %c0_i32, %c0_i32_0, %c0_i32_1 : i32, i32, i32
  }
  func.func @transform_8(%arg0: i32) -> (i32, i32, i32) {
    %c0_i32 = arith.constant 0 : i32
    %c0_i32_0 = arith.constant 0 : i32
    %c0_i32_1 = arith.constant 0 : i32
    %c0_i32_2 = arith.constant 0 : i32
    return %c0_i32, %c0_i32_0, %c0_i32_1 : i32, i32, i32
  }
  func.func @transform_9(%arg0: i32) -> (i32, i32) {
    %c0_i32 = arith.constant 0 : i32
    %c0_i32_0 = arith.constant 0 : i32
    %c0_i32_1 = arith.constant 0 : i32
    return %c0_i32, %c0_i32_0 : i32, i32
  }
  func.func @transform_10(%arg0: i32) -> (i32, i32, i32) {
    %c0_i32 = arith.constant 0 : i32
    %c0_i32_0 = arith.constant 0 : i32
    %c0_i32_1 = arith.constant 0 : i32
    return %arg0, %c0_i32, %c0_i32_0 : i32, i32, i32
  }
}

</mosaic_0001>

<bundles_post_ra>
// kernel: tpu_custom_call.1
= control target key start
LH: loop header
LB: loop body
LE: loop exit
PB: predicated region body
PF: predicated region fallthrough
CT: control target
= control target key end

     0   :  { %15 = vsyncpa [#allocation4], 0  ;;  %s11587_s0 = inlined_call_operand.vmem [shape: f32[6], index: 0, kind: input, shape index: {}]   ;;  %s11588_s1 = inlined_call_operand.vmem [shape: bf16[2,104,512], index: 1, kind: input, shape index: {}]   ;;  %s11589_s2 = inlined_call_operand.vmem [shape: bf16[4608,32], index: 2, kind: input, shape index: {}]   ;;  %s11590_s3 = inlined_call_operand.vmem [shape: f32[1,32], index: 3, kind: input, shape index: {}]   ;;  %s11591_s4 = inlined_call_operand.vmem [shape: f32[72,80], index: 4, kind: input, shape index: {}]   ;;  %s11592_s5 = inlined_call_operand.vmem [shape: f32[80,72], index: 5, kind: input, shape index: {}]   ;;  %s11593_s6 = inlined_call_operand.vmem [shape: f32[4,32,32], index: 6, kind: input, shape index: {}]   ;;  %s11594_s7 = inlined_call_operand.vmem [shape: f32[4,1,32], index: 7, kind: input, shape index: {}]   ;;  %s11595_s8 = inlined_call_operand.vmem [shape: f32[4,32,128], index: 8, kind: input, shape index: {}]   ;;  %s11596_s9 = inlined_call_operand.vmem [shape: f32[1,128], index: 9, kind: input, shape index: {}]   ;;  %s11597_s10 = inlined_call_operand.hbm [shape: f32[2,80,128], index: 10, kind: output, shape index: {}]  }
   0x1   :  { %16 = vsyncpa [#allocation3], 0 }
   0x2   :  { %18 = vsyncpa [#allocation3 + $0x1], 0  ;;  %s8848_s13 = smov 0   ;;  %s8850_s14 = smov 0  }
   0x3   :  { %s8852_s15 = smov 0   ;;  %s8854_s16 = smov 0  }
   0x4 LB: > { %s8869_s17 = sadd.s32 4294967295, %s8784_s16   ;;  %s6577_s18 = sadd.s32 4294967294, %s8784_s16   ;;  %s8784_s16 = sphi %s8854_s16, %s11621_s16   ;;  %s8780_s15 = sphi %s8852_s15, %s11620_s15   ;;  %s8776_s14 = sphi %s8850_s14, %s11619_s14   ;;  %s8772_s13 = sphi %s8848_s13, %s11618_s13  }
   0x5   : > { %s8873_s19 = sadd.s32 1, %s8784_s16   ;;  %s246_s20 = sadd.s32 1, %s8780_s15 }
   0x6   : > { %s243_s21 = ssub.s32 %s8784_s16, %s8873_s19  ;;  %p256_p0 = scmp.ne.s32.totalorder %s8780_s15, %s8776_s14 }
   0x7   : > { %p244_p1 = scmp.eq.s32.totalorder %s243_s21, 0  ;;  %p257_p2 = scmp.eq.s32.totalorder %s8869_s17, 1 }
   0x8   : > { %p262_p3 = scmp.ne.s32.totalorder %s8776_s14, %s8772_s13  ;;  %p263_p4 = scmp.eq.s32.totalorder %s6577_s18, 1 }
   0x9   : > { %s8884_s22 = scalar_select %p244_p1, %s8780_s15, %s246_s20  }
   0xa   : > { %p8886_p5 = por %p257_p2, %p256_p0  ;;  %p8890_p6 = por %p263_p4, %p262_p3 }
   0xb   : > { %p6578_p7 = scmp.ge.s32.totalorder %s8784_s16, 1  ;;  %p270_p8 = scmp.lt.s32.totalorder %s8784_s16, 3 }
   0xc   : > { %p8250_p9 = scmp.eq.s32.totalorder %s8869_s17, 0  ;;  %s283_s28 = sshll.u32 %s11587_s0, 4  ;;  %s284_s28 = int_to_ptr.vmem [resolvable:$true] %s283_s28 }
   0xd   : > { %p8897_p10 = pnand %p6578_p7, %p270_p8  ;;  %s8703_s29 = scalar_lea.vmem %s284_s28, 16 }
   0xe   : > { %p8704_p13 = scmp.ne.s32.totalorder %s284_s28, %s8703_s29  ;;  %p8711_p3 = scmp.lt.s32.totalorder %s284_s28, %s284_s28 }
   0xf   : > { %p8242_p11 = pneg %p8897_p10  ;;  %p8712_p4 = scmp.lt.s32.totalorder %s8703_s29, %s8703_s29 }
  0x11   : > { %p8243_p12 = pnand %p8250_p9, %p8242_p11  ;;  %p8713_p7 = por %p8712_p4, %p8711_p3 }
  0x13   : > { %p8705_p0 = pneg %p8243_p12 }
  0x15   : > { %p8706_p1 = pnand %p8705_p0, %p8704_p13 }
  0x17   : > { %p8707_p2 = pneg %p8706_p1 }
  0x19   : > { %p8714_p8 = pnand %p8713_p7, %p8707_p2 }
  0x1b   : > { %8717 = shalt.err (!%p8714_p8)
}
  0x1c   : > { %s8786_s30 = smov [#allocation2]   ;;  %328 = sbr.rel (%p8897_p10) target bundleno = 2023 (0x7e7), region = 60 }
  0x1d   : > { %8245 = dma.vmem_to_smem (!%p8243_p12), %s284_s28, 16, %s8786_s30, [#allocation4]  }
  0x23   : > { %8763 = dma.done.wait (%p8250_p9), [#allocation4], 16  }
  0x24   : > { %8765 = vsyncadd (%p8250_p9), [#allocation4], 4294967280 }
  0x25   : > { %334 = sfence }
  0x26   : > { %v8291_v0 = vld [vmem:[%s11589_s2 + $0x40] sm:$0xff]   ;;  %v8295_v4 = vld [vmem:[%s11589_s2 + $0x48] sm:$0xff]   ;;  %v8299_v8 = vld [vmem:[%s11589_s2 + $0x50] sm:$0xff]   ;;  %p367_p9 = scmp.lt.s32.totalorder %s8869_s17, 1  ;;  %vm543_vm0 = vsmask.f32 7424 }
  0x27   : > { %v8292_v1 = vld [vmem:[%s11589_s2 + $0xc0] sm:$0xff]   ;;  %7042 = vmatprep.subr.bf16.mxu0 %v8291_v0  ;;  %v8296_v5 = vld [vmem:[%s11589_s2 + $0xc8] sm:$0xff]   ;;  %v8300_v9 = vld [vmem:[%s11589_s2 + $0xd0] sm:$0xff]   ;;  %vm750_vm1 = vcmask 1046528   ;;  %vm931_vm2 = vsmask.f32 6400 }
  0x28   : > { %v8293_v2 = vld [vmem:[%s11589_s2] sm:$0xff]   ;;  %7088 = vmatprep.subr.bf16.mxu1 %v8292_v1  ;;  %v8297_v6 = vld [vmem:[%s11589_s2 + $0x8] sm:$0xff]   ;;  %v8301_v10 = vld [vmem:[%s11589_s2 + $0x10] sm:$0xff]   ;;  %s368_s11 = scalar_select %p367_p9, %s8869_s17, 1  ;;  %vm1174_vm3 = vcmask 1045504   ;;  %vm1646_vm5 = vcmask 1044480  }
  0x29   : > { %v8294_v3 = vld [vmem:[%s11589_s2 + $0x80] sm:$0xff]   ;;  %7043 = vmatpush3.bf16.msra.mxu0 %v8293_v2  ;;  %v8298_v7 = vld [vmem:[%s11589_s2 + $0x88] sm:$0xff]   ;;  %v8302_v11 = vld [vmem:[%s11589_s2 + $0x90] sm:$0xff]   ;;  %vm1403_vm4 = vsmask.f32 5376  ;;  %vm8788_vm6 = vmmov 0  }
  0x2a   : > { %7089 = vmatpush3.bf16.msra.mxu1 %v8294_v3  ;;  %7044 = vmatprep.subr.bf16.mxu0 %v8295_v4  ;;  %v8303_v12 = vld [vmem:[%s11589_s2 + $0x58] sm:$0xff]   ;;  %v8307_v16 = vld [vmem:[%s11589_s2 + $0x60] sm:$0xff]   ;;  %v8311_v20 = vld [vmem:[%s11589_s2 + $0x68] sm:$0xff]   ;;  %s8234_s29 = smul.u32 208, %s368_s11  ;;  %s6976_s28 = sld [smem:[#allocation2 + $0x1]] }
  0x2b   : > { %7090 = vmatprep.subr.bf16.mxu1 %v8296_v5  ;;  %v8304_v13 = vld [vmem:[%s11589_s2 + $0xd8] sm:$0xff]   ;;  %v8308_v17 = vld [vmem:[%s11589_s2 + $0xe0] sm:$0xff]   ;;  %v8312_v21 = vld [vmem:[%s11589_s2 + $0xe8] sm:$0xff]   ;;  %s6985_s12 = sld [smem:[#allocation2 + $0x2]]  ;;  %s6999_s18 = sld [smem:[#allocation2 + $0x3]] }
  0x2c   : > { %v8305_v14 = vld [vmem:[%s11589_s2 + $0x18] sm:$0xff]   ;;  %v8309_v18 = vld [vmem:[%s11589_s2 + $0x20] sm:$0xff]   ;;  %v8313_v22 = vld [vmem:[%s11589_s2 + $0x28] sm:$0xff]   ;;  %s9009_s30 = scalar_lea.vmem %s11588_s1, %s8234_s29  ;;  %s7017_s29 = sld [smem:[#allocation2 + $0x4]] }
  0x2d   : > { %7045 = vmatpush3.bf16.msra.mxu0 %v8297_v6  ;;  %v8306_v15 = vld [vmem:[%s11589_s2 + $0x98] sm:$0xff]   ;;  %v8310_v19 = vld [vmem:[%s11589_s2 + $0xa0] sm:$0xff]   ;;  %v8314_v23 = vld [vmem:[%s11589_s2 + $0xa8] sm:$0xff]   ;;  %s7038_s20 = sld [smem:[#allocation2 + $0x5]]  ;;  %s364_s21 = sand.u32 1, %s8776_s14  }
  0x2e   : > { %7091 = vmatpush3.bf16.msra.mxu1 %v8298_v7  ;;  %7046 = vmatprep.subr.bf16.mxu0 %v8299_v8  ;;  %v8315_v24 = vld [vmem:[%s11589_s2 + $0x70] sm:$0xff]   ;;  %v8319_v28 = vld [vmem:[%s11589_s2 + $0x78] sm:$0xff]   ;;  %v373_v32 = vld [vmem:[%s9009_s30] sm:$0xff]  ;;  %s8233_s25 = smul.u32 80, %s364_s21 }
  0x2f   : > { %7092 = vmatprep.subr.bf16.mxu1 %v8300_v9  ;;  %v8316_v25 = vld [vmem:[%s11589_s2 + $0xf0] sm:$0xff]   ;;  %v8320_v29 = vld [vmem:[%s11589_s2 + $0xf8] sm:$0xff]   ;;  %v374_v34 = vld [vmem:[%s9009_s30 + $0x8] sm:$0xff] }
  0x30   : > { %v8317_v26 = vld [vmem:[%s11589_s2 + $0x30] sm:$0xff]   ;;  %v8321_v30 = vld [vmem:[%s11589_s2 + $0x38] sm:$0xff]   ;;  %v8327_v40 = vld [vmem:[%s11589_s2 + $0x140] sm:$0xff]   ;;  %s11523_s27 = scalar_lea.vmem [#allocation5], %s8233_s25 }
  0x31   : > { %7047 = vmatpush3.bf16.msra.mxu0 %v8301_v10  ;;  %v8318_v27 = vld [vmem:[%s11589_s2 + $0xb0] sm:$0xff]   ;;  %v8322_v31 = vld [vmem:[%s11589_s2 + $0xb8] sm:$0xff]   ;;  %v8328_v43 = vld [vmem:[%s11589_s2 + $0x100] sm:$0xff]   ;;  %s6503_s11 = sshll.u32 %s11523_s27, 4  ;;  %s11540_s11 = int_to_ptr.vmem [resolvable:$true] %s6503_s11 }
  0x32   : > { %7093 = vmatpush3.bf16.msra.mxu1 %v8302_v11  ;;  %7048 = vmatprep.subr.bf16.mxu0 %v8303_v12  ;;  %v9019_v33 = vld [vmem:[%s9009_s30 + $0x10] sm:$0xff]  ;;  %v9026_v36 = vld [vmem:[%s9009_s30 + $0x18] sm:$0xff]  ;;  %v8329_v46 = vld [vmem:[%s11589_s2 + $0x1c0] sm:$0xff]  }
  0x33   : > { %7094 = vmatprep.subr.bf16.mxu1 %v8304_v13  ;;  %v9023_v35 = vcombine.high %v373_v32, %v9019_v33  ;;  %v9029_v37 = vcombine.low %v373_v32, %v9019_v33  ;;  %v9032_v38 = vcombine.high %v374_v34, %v9026_v36  ;;  %v9035_v39 = vcombine.low %v374_v34, %v9026_v36  ;;  %v377_v50 = vld [vmem:[%s9009_s30 + $0x20] sm:$0xff]  ;;  %v379_v51 = vld [vmem:[%s9009_s30 + $0x30] sm:$0xff]  ;;  %v378_v52 = vld [vmem:[%s9009_s30 + $0x28] sm:$0xff] }
  0x34   : > { %v9061_v53 = vcombine.high %v377_v50, %v379_v51  ;;  %v380_v54 = vld [vmem:[%s9009_s30 + $0x38] sm:$0xff]  ;;  %v8332_v57 = vld [vmem:[%s11589_s2 + $0x180] sm:$0xff]   ;;  %v9073_v59 = vcombine.low %v377_v50, %v379_v51  ;;  %v8335_v60 = vld [vmem:[%s11589_s2 + $0x148] sm:$0xff]  }
  0x35   : > { %7049 = vmatpush3.bf16.msra.mxu0 %v8305_v14  ;;  %v559_v41 = vshll.u32 %v9023_v35, 16  ;;  %4054 = vmatprep.mubr.bf16.mxu0 %v9023_v35  ;;  %v547_v42 = vshll.u32 %v9029_v37, 16  ;;  %v583_v44 = vshll.u32 %v9032_v38, 16  ;;  %v545_v45 = vshrl.u32 %v9029_v37, 16  ;;  %v8336_v0 = vld [vmem:[%s11589_s2 + $0x108] sm:$0xff]   ;;  %v8339_v5 = vld [vmem:[%s11589_s2 + $0x150] sm:$0xff]  }
  0x36   : > { %7095 = vmatpush3.bf16.msra.mxu1 %v8306_v15  ;;  %7050 = vmatprep.subr.bf16.mxu0 %v8307_v16  ;;  %v569_v48 = vshrl.u32 %v9035_v39, 16  ;;  %v571_v49 = vshll.u32 %v9035_v39, 16  ;;  %v557_v55 = vshrl.u32 %v9023_v35, 16  ;;  %v9065_v56 = vcombine.high %v378_v52, %v380_v54  ;;  %v8337_v1 = vld [vmem:[%s11589_s2 + $0x1c8] sm:$0xff]   ;;  %v381_v6 = vld [vmem:[%s9009_s30 + $0x40] sm:$0xff]  ;;  %v9101_v7 = vld [vmem:[%s9009_s30 + $0x50] sm:$0xff] }
  0x37   : > { %7096 = vmatprep.subr.bf16.mxu1 %v8308_v17  ;;  %4127 = vmatprep.mubr.bf16.mxu1 %v9032_v38  ;;  %v9053_v47 = vrot.slane %v547_v42, 1  ;;  %v9070_v58 = vrot.slane %v559_v41, 1  ;;  %v564_v61 = vshll.u32 %v9061_v53, 16  ;;  %v9082_v63 = vcombine.low %v378_v52, %v380_v54  ;;  %v8338_v3 = vld [vmem:[%s11589_s2 + $0x188] sm:$0xff]   ;;  %v384_v14 = vld [vmem:[%s9009_s30 + $0x58] sm:$0xff]  ;;  %v385_v42 = vld [vmem:[%s9009_s30 + $0x60] sm:$0xff] }
  0x38   : > { %v9079_v62 = vrot.slane %v571_v49, 1  ;;  %v581_v2 = vshrl.u32 %v9032_v38, 16  ;;  %v588_v4 = vshll.u32 %v9065_v56, 16  ;;  %v9105_v9 = vrot.slane %v583_v44, 1  ;;  %v382_v13 = vld [vmem:[%s9009_s30 + $0x48] sm:$0xff]  ;;  %v8351_v34 = vld [vmem:[%s11589_s2 + $0x1d8] sm:$0xff]  }
  0x39   : > { %7051 = vmatpush3.bf16.msra.mxu0 %v8309_v18  ;;  %v9103_v8 = vrot.slane %v564_v61, 1  ;;  %v552_v10 = vshll.u32 %v9073_v59, 16  ;;  %v9110_v11 = vcombine.high %v381_v6, %v9101_v7  ;;  %v9112_v12 = vcombine.low %v379_v51, %v381_v6  ;;  %v8352_v41 = vld [vmem:[%s11589_s2 + $0x198] sm:$0xff]   ;;  %v386_v49 = vld [vmem:[%s9009_s30 + $0x68] sm:$0xff] }
  0x3a   : > { %7097 = vmatpush3.bf16.msra.mxu1 %v8310_v19  ;;  %7052 = vmatprep.subr.bf16.mxu0 %v8311_v20  ;;  %v576_v15 = vshll.u32 %v9082_v63, 16  ;;  %v600_v16 = vshrl.u32 %v9061_v53, 16  ;;  %v9118_v17 = vcombine.high %v382_v13, %v384_v14  ;;  %v9120_v18 = vcombine.low %v380_v54, %v382_v13  ;;  %v8344_v19 = vld [vmem:[%s11589_s2 + $0x110] sm:$0xff]   ;;  %v9174_v50 = vld [vmem:[%s9009_s30 + $0x78] sm:$0xff] }
  0x3b   : > { %7098 = vmatprep.subr.bf16.mxu1 %v8312_v21  ;;  %v9125_v20 = vrot.slane %v588_v4, 1  ;;  %v8347_v21 = vld [vmem:[%s11589_s2 + $0x1d0] sm:$0xff]   ;;  %v616_v32 = vshrl.u32 %v9065_v56, 16  ;;  %v592_v52 = vshrl.u32 %v9073_v59, 16  ;;  %v9187_v61 = vcombine.high %v386_v49, %v9174_v50  ;;  %v8358_v4 = vld [vmem:[%s11589_s2 + $0x1e0] sm:$0xff]  }
  0x3d   : > { %7053 = vmatpush3.bf16.msra.mxu0 %v8313_v22  ;;  %v9131_v22 = vrot.slane %v552_v10, 1 }
  0x3e   : > { %7099 = vmatpush3.bf16.msra.mxu1 %v8314_v23  ;;  %7054 = vmatprep.subr.bf16.mxu0 %v8315_v24  ;;  %v9133_v23 = vcombine.high %v379_v51, %v381_v6  ;;  %v9137_v24 = vcombine.low %v381_v6, %v9101_v7  ;;  %v8359_v6 = vld [vmem:[%s11589_s2 + $0x120] sm:$0xff]  }
  0x3f   : > { %7100 = vmatprep.subr.bf16.mxu1 %v8316_v25  ;;  %v8348_v25 = vld [vmem:[%s11589_s2 + $0x190] sm:$0xff]  }
  0x40   : > { %v596_v44 = vshll.u32 %v9137_v24, 16 }
  0x41   : > { %7055 = vmatpush3.bf16.msra.mxu0 %v8317_v26  ;;  %v604_v26 = vshll.u32 %v9110_v11, 16 }
  0x42   : > { %7101 = vmatpush3.bf16.msra.mxu1 %v8318_v27  ;;  %7056 = vmatprep.subr.bf16.mxu0 %v8319_v28  ;;  %v9143_v27 = vcombine.high %v380_v54, %v382_v13  ;;  %v9145_v28 = vcombine.low %v382_v13, %v384_v14  ;;  %v9208_v13 = vcombine.high %v384_v14, %v386_v49 }
  0x43   : > { %7102 = vmatprep.subr.bf16.mxu1 %v8320_v29  ;;  %v8349_v29 = vld [vmem:[%s11589_s2 + $0x158] sm:$0xff]  }
  0x44   : > { %v612_v54 = vshll.u32 %v9145_v28, 16 }
  0x45   : > { %7057 = vmatpush3.bf16.msra.mxu0 %v8321_v30  ;;  %v9150_v30 = vrot.slane %v576_v15, 1  ;;  %v9211_v15 = vcombine.low %v9101_v7, %v385_v42 }
  0x46   : > { %7103 = vmatpush3.bf16.msra.mxu1 %v8322_v31  ;;  %7134 = vmatprep.subr.bf16.mxu0 %v8327_v40  ;;  %v8350_v31 = vld [vmem:[%s11589_s2 + $0x118] sm:$0xff]   ;;  %v620_v40 = vshll.u32 %v9118_v17, 16  ;;  %v9206_v10 = vrot.slane %v612_v54, 1  ;;  %v390_v54 = vld [vmem:[%s9009_s30 + $0x88] sm:$0xff] }
  0x47   : > { %7180 = vmatprep.subr.bf16.mxu1 %v8329_v46  ;;  %v9170_v46 = vld [vmem:[%s9009_s30 + $0x70] sm:$0xff]  ;;  %v9278_v35 = vcombine.high %v9174_v50, %v390_v54  ;;  %v9289_v38 = vcombine.low %v9174_v50, %v390_v54 }
  0x48   : > { %4055 = vmatmul.mubr.bf16.vlgmr.msra.gmra.mrb[0].mxu0 %v9029_v37  ;;  %v9176_v51 = vrot.slane %v620_v40, 1  ;;  %v8376_v37 = vld [vmem:[%s11589_s2 + $0x1b8] sm:$0xff]  }
  0x49   : > { %4128 = vmatmul.mubr.bf16.vlgmr.msra.gmra.mrb[0].mxu1 %v9035_v39  ;;  %7135 = vmatpush3.bf16.msra.mxu0 %v8328_v43  ;;  %v9165_v43 = vrot.slane %v604_v26, 1  ;;  %v8370_v26 = vld [vmem:[%s11589_s2 + $0x1f0] sm:$0xff]  }
  0x4a   : > { %4062 = vmatprep.mubr.bf16.mxu0 %v9061_v53  ;;  %4135 = vmatprep.mubr.bf16.mxu1 %v9065_v56 }
  0x4b   : > { %7181 = vmatpush3.bf16.msra.mxu1 %v8332_v57  ;;  %7136 = vmatprep.subr.bf16.mxu0 %v8335_v60  ;;  %v9181_v57 = vcombine.high %v9101_v7, %v385_v42  ;;  %v9184_v60 = vcombine.high %v385_v42, %v9170_v46  ;;  %v8361_v7 = vld [vmem:[%s11589_s2 + $0x168] sm:$0xff]  }
  0x4c   : > { %7182 = vmatprep.subr.bf16.mxu1 %v8337_v1 }
  0x4d   : > { %7137 = vmatpush3.bf16.msra.mxu0 %v8336_v0  ;;  %v8357_v0 = vld [vmem:[%s11589_s2 + $0x160] sm:$0xff]  }
  0x4e   : > { %7138 = vmatprep.subr.bf16.mxu0 %v8339_v5  ;;  %v9199_v5 = vrot.slane %v596_v44, 1  ;;  %v389_v44 = vld [vmem:[%s9009_s30 + $0x80] sm:$0xff] }
  0x4f   : > { %7183 = vmatpush3.bf16.msra.mxu1 %v8338_v3  ;;  %v9194_v3 = vcombine.low %v385_v42, %v9170_v46  ;;  %v652_v42 = vshll.u32 %v9187_v61, 16 }
  0x50   : > { %4063 = vmatmul.mubr.bf16.gmra.mrb[4].mxu0 %v9073_v59  ;;  %7184 = vmatprep.subr.bf16.mxu1 %v8347_v21  ;;  %v9216_v21 = vcombine.low %v386_v49, %v9174_v50  ;;  %v8374_v50 = vld [vmem:[%s11589_s2 + $0x1f8] sm:$0xff]  }
  0x51   : > { %4136 = vmatmul.mubr.bf16.gmra.mrb[4].mxu1 %v9082_v63  ;;  %4070 = vmatprep.mubr.bf16.mxu0 %v9110_v11 }
  0x52   : > { %4143 = vmatprep.mubr.bf16.mxu1 %v9118_v17  ;;  %7139 = vmatpush3.bf16.msra.mxu0 %v8344_v19  ;;  %v9213_v19 = vcombine.low %v384_v14, %v386_v49  ;;  %v636_v14 = vshll.u32 %v9184_v60, 16  ;;  %v391_v49 = vld [vmem:[%s9009_s30 + $0x90] sm:$0xff]  ;;  %v644_v1 = vshll.u32 %v9216_v21, 16 }
  0x53   : > { %7185 = vmatpush3.bf16.msra.mxu1 %v8348_v25  ;;  %7140 = vmatprep.subr.bf16.mxu0 %v8349_v29  ;;  %v8360_v25 = vld [vmem:[%s11589_s2 + $0x1a0] sm:$0xff]   ;;  %v8362_v29 = vld [vmem:[%s11589_s2 + $0x1e8] sm:$0xff]  }
  0x54   : > { %7186 = vmatprep.subr.bf16.mxu1 %v8351_v34  ;;  %v8363_v34 = vld [vmem:[%s11589_s2 + $0x128] sm:$0xff]   ;;  %v9234_v40 = vrot.slane %v636_v14, 1  ;;  %v9250_v14 = vrot.slane %v652_v42, 1 }
  0x56   : > { %7141 = vmatpush3.bf16.msra.mxu0 %v8350_v31 }
  0x57   : > { %7187 = vmatpush3.bf16.msra.mxu1 %v8352_v41  ;;  %7142 = vmatprep.subr.bf16.mxu0 %v8357_v0  ;;  %v8364_v41 = vld [vmem:[%s11589_s2 + $0x1a8] sm:$0xff]   ;;  %v8369_v0 = vld [vmem:[%s11589_s2 + $0x170] sm:$0xff]  }
  0x58   : > { %4071 = vmatmul.mubr.bf16.gmra.mrb[8].mxu0 %v9137_v24  ;;  %7188 = vmatprep.subr.bf16.mxu1 %v8358_v4  ;;  %v628_v4 = vshll.u32 %v9194_v3, 16 }
  0x59   : > { %4144 = vmatmul.mubr.bf16.gmra.mrb[8].mxu1 %v9145_v28  ;;  %4078 = vmatprep.mubr.bf16.mxu0 %v9184_v60 }
  0x5a   : > { %4151 = vmatprep.mubr.bf16.mxu1 %v9187_v61  ;;  %7143 = vmatpush3.bf16.msra.mxu0 %v8359_v6  ;;  %v9265_v6 = vrot.slane %v628_v4, 1  ;;  %v9286_v4 = vcombine.low %v9170_v46, %v389_v44 }
  0x5b   : > { %7189 = vmatpush3.bf16.msra.mxu1 %v8360_v25  ;;  %7144 = vmatprep.subr.bf16.mxu0 %v8361_v7  ;;  %v9247_v25 = vcombine.high %v389_v44, %v391_v49  ;;  %v392_v7 = vld [vmem:[%s9009_s30 + $0x98] sm:$0xff] }
  0x5c   : > { %7190 = vmatprep.subr.bf16.mxu1 %v8362_v29  ;;  %v9253_v29 = vcombine.high %v9170_v46, %v389_v44  ;;  %v9255_v31 = vcombine.high %v390_v54, %v392_v7  ;;  %v9268_v42 = vcombine.low %v390_v54, %v392_v7  ;;  %v680_v54 = vshrl.u32 %v9187_v61, 16  ;;  %v8375_v7 = vld [vmem:[%s11589_s2 + $0x138] sm:$0xff]  }
  0x5e   : > { %7145 = vmatpush3.bf16.msra.mxu0 %v8363_v34  ;;  %v9257_v34 = vcombine.low %v389_v44, %v391_v49  ;;  %v586_v49 = vor.u32 %v9105_v9, %v581_v2  ;;  %v8372_v2 = vld [vmem:[%s11589_s2 + $0x1b0] sm:$0xff]   ;;  %v9294_v9 = vrot.slane %v644_v1, 1  ;;  %v668_v44 = vshll.u32 %v9247_v25, 16 }
  0x5f   : > { %7191 = vmatpush3.bf16.msra.mxu1 %v8364_v41  ;;  %v562_v41 = vor.u32 %v9070_v58, %v557_v55  ;;  %7146 = vmatprep.subr.bf16.mxu0 %v8369_v0  ;;  %v8371_v55 = vld [vmem:[%s11589_s2 + $0x130] sm:$0xff]   ;;  %v664_v58 = vshrl.u32 %v9184_v60, 16  ;;  %v8373_v0 = vld [vmem:[%s11589_s2 + $0x178] sm:$0xff]   ;;  %v684_v39 = vshll.u32 %v9255_v31, 16 }
  0x60   : > { %4079 = vmatmul.mubr.bf16.gmra.mrb[12].mxu0 %v9194_v3  ;;  %7192 = vmatprep.subr.bf16.mxu1 %v8370_v26  ;;  %v591_v1 = vsel %vm543_vm0, %v586_v49, %v9125_v20  ;;  %v550_v26 = vor.u32 %v9053_v47, %v545_v45  ;;  %v602_v45 = vor.u32 %v600_v16, %v9103_v8 }
  0x61   : > { %4152 = vmatmul.mubr.bf16.gmra.mrb[12].mxu1 %v9216_v21  ;;  %4086 = vmatprep.mubr.bf16.mxu0 %v9247_v25  ;;  %v567_v46 = vsel %vm543_vm0, %v562_v41, %v9103_v8  ;;  %v574_v41 = vor.u32 %v9079_v62, %v569_v48  ;;  %v618_v47 = vor.u32 %v616_v32, %v9125_v20  ;;  %v8377_v48 = vld [vmem:[%s11589_s2 + $0x240] sm:$0xff]   ;;  %v656_v62 = vshrl.u32 %v9194_v3, 16 }
  0x62   : > { %4159 = vmatprep.mubr.bf16.mxu1 %v9255_v31  ;;  %7147 = vmatpush3.bf16.msra.mxu0 %v8371_v55  ;;  %v9319_v55 = vrot.slane %v668_v44, 1  ;;  %v555_v49 = vsel %vm543_vm0, %v550_v26, %v9131_v22  ;;  %v8378_v8 = vld [vmem:[%s11589_s2 + $0x200] sm:$0xff]   ;;  %v9340_v16 = vrot.slane %v684_v39, 1  ;;  %v8383_v39 = vld [vmem:[%s11589_s2 + $0x2c8] sm:$0xff]  }
  0x63   : > { %7193 = vmatpush3.bf16.msra.mxu1 %v8372_v2  ;;  %7148 = vmatprep.subr.bf16.mxu0 %v8373_v0  ;;  %v579_v20 = vsel %vm543_vm0, %v574_v41, %v9150_v30  ;;  %v8379_v32 = vld [vmem:[%s11589_s2 + $0x2c0] sm:$0xff]   ;;  %v660_v2 = vshll.u32 %v9257_v34, 16  ;;  %v607_v0 = vsel %vm543_vm0, %v602_v45, %v9165_v43  ;;  %v8382_v41 = vld [vmem:[%s11589_s2 + $0x208] sm:$0xff]   ;;  %v11606_v45 = vshrl.u32 %v9082_v63, 16 }
  0x64   : > { %7194 = vmatprep.subr.bf16.mxu1 %v8374_v50  ;;  %v8380_v44 = vld [vmem:[%s11589_s2 + $0x280] sm:$0xff]   ;;  %v672_v50 = vshrl.u32 %v9216_v21, 16 }
  0x65   : > { %v9359_v26 = vrot.slane %v660_v2, 1 }
  0x66   : > { %7149 = vmatpush3.bf16.msra.mxu0 %v8375_v7  ;;  %v594_v7 = vor.u32 %v592_v52, %v9131_v22  ;;  %v696_v52 = vshrl.u32 %v9247_v25, 16 }
  0x67   : > { %7195 = vmatpush3.bf16.msra.mxu1 %v8376_v37  ;;  %7226 = vmatprep.subr.bf16.mxu0 %v8377_v48  ;;  %v676_v37 = vshll.u32 %v9268_v42, 16  ;;  %v11607_v48 = vshrl.u32 %v9110_v11, 16 }
  0x68   : > { %4087 = vmatmul.mubr.bf16.gmra.mrb[16].mxu0 %v9257_v34  ;;  %7272 = vmatprep.subr.bf16.mxu1 %v8379_v32  ;;  %v8385_v32 = vld [vmem:[%s11589_s2 + $0x250] sm:$0xff]   ;;  %v599_v2 = vsel %vm543_vm0, %v594_v7, %v9199_v5  ;;  %v704_v7 = vshrl.u32 %v9268_v42, 16 }
  0x69   : > { %4160 = vmatmul.mubr.bf16.gmra.mrb[16].mxu1 %v9268_v42  ;;  %4200 = vmatprep.mubr.bf16.mxu0 %v567_v46  ;;  %v623_v46 = vsel %vm543_vm0, %v618_v47, %v9176_v51  ;;  %v610_v47 = vor.u32 %v11606_v45, %v9150_v30  ;;  %v634_v22 = vor.u32 %v11607_v48, %v9165_v43  ;;  %v712_v43 = vshrl.u32 %v9255_v31, 16 }
  0x6a   : > { %4273 = vmatprep.mubr.bf16.mxu1 %v591_v1  ;;  %v8381_v1 = vld [vmem:[%s11589_s2 + $0x248] sm:$0xff]   ;;  %v755_v45 = vrot.slane %v9061_v53, 1  ;;  %v11609_v48 = vshrl.u32 %v9137_v24, 16  ;;  %v11611_v53 = vrot.slane %v9082_v63, 1 }
  0x70   : > { %4201 = vmatmul.mubr.bf16.vlgmr.msra.gmra.mrb[20].mxu0 %v555_v49  ;;  %v8384_v49 = vld [vmem:[%s11589_s2 + $0x288] sm:$0xff]  }
  0x71   : > { %4274 = vmatmul.mubr.bf16.vlgmr.msra.gmra.mrb[20].mxu1 %v579_v20  ;;  %7227 = vmatpush3.bf16.msra.mxu0 %v8378_v8  ;;  %v11608_v8 = vshrl.u32 %v9118_v17, 16  ;;  %v9384_v20 = vrot.slane %v676_v37, 1  ;;  %v8388_v37 = vld [vmem:[%s11589_s2 + $0x290] sm:$0xff]  }
  0x72   : > { %4208 = vmatprep.mubr.bf16.mxu0 %v607_v0  ;;  %4281 = vmatprep.mubr.bf16.mxu1 %v623_v46  ;;  %v8386_v0 = vld [vmem:[%s11589_s2 + $0x210] sm:$0xff]   ;;  %v615_v46 = vsel %vm543_vm0, %v610_v47, %v9206_v10  ;;  %v8389_v47 = vld [vmem:[%s11589_s2 + $0x258] sm:$0xff]  }
  0x73   : > { %7273 = vmatpush3.bf16.msra.mxu1 %v8380_v44  ;;  %7228 = vmatprep.subr.bf16.mxu0 %v8381_v1  ;;  %v650_v30 = vor.u32 %v11608_v8, %v9176_v51  ;;  %v688_v51 = vshrl.u32 %v9257_v34, 16  ;;  %v639_v44 = vsel %vm543_vm0, %v634_v22, %v9234_v40  ;;  %v8387_v1 = vld [vmem:[%s11589_s2 + $0x2d0] sm:$0xff]   ;;  %v626_v22 = vor.u32 %v11609_v48, %v9199_v5 }
  0x74   : > { %7274 = vmatprep.subr.bf16.mxu1 %v8383_v39  ;;  %v761_v39 = vrot.slane %v9065_v56, 1  ;;  %v666_v5 = vor.u32 %v664_v58, %v9234_v40  ;;  %v769_v40 = vrot.slane %v9118_v17, 1  ;;  %v8420_v56 = vld [vmem:[%s11589_s2 + $0x380] sm:$0xff]  }
  0x75   : > { %7229 = vmatpush3.bf16.msra.mxu0 %v8382_v41  ;;  %v655_v41 = vsel %vm543_vm0, %v650_v30, %v9250_v14  ;;  %v8390_v30 = vld [vmem:[%s11589_s2 + $0x218] sm:$0xff]   ;;  %v631_v58 = vsel %vm543_vm0, %v626_v22, %v9265_v6  ;;  %v767_v22 = vrot.slane %v9145_v28, 1 }
  0x76   : > { %7230 = vmatprep.subr.bf16.mxu0 %v8385_v32  ;;  %v752_v32 = vrot.slane %v9073_v59, 1  ;;  %v671_v17 = vsel %vm543_vm0, %v666_v5, %v9319_v55  ;;  %v9466_v48 = vsel %vm750_vm1, %v761_v39, %v769_v40  ;;  %v8423_v59 = vld [vmem:[%s11589_s2 + $0x3c8] sm:$0xff]  }
  0x77   : > { %7275 = vmatpush3.bf16.msra.mxu1 %v8384_v49  ;;  %v11610_v49 = vshrl.u32 %v9145_v28, 16  ;;  %v773_v28 = vrot.slane %v9184_v60, 1  ;;  %v8398_v60 = vld [vmem:[%s11589_s2 + $0x2e8] sm:$0xff]  }
  0x78   : > { %4209 = vmatmul.mubr.bf16.gmra.mrb[24].mxu0 %v599_v2  ;;  %7276 = vmatprep.subr.bf16.mxu1 %v8387_v1  ;;  %v8391_v2 = vld [vmem:[%s11589_s2 + $0x2d8] sm:$0xff]   ;;  %v8393_v1 = vld [vmem:[%s11589_s2 + $0x260] sm:$0xff]  }
  0x79   : > { %4282 = vmatmul.mubr.bf16.gmra.mrb[24].mxu1 %v615_v46  ;;  %4216 = vmatprep.mubr.bf16.mxu0 %v639_v44  ;;  %v642_v8 = vor.u32 %v11610_v49, %v9206_v10  ;;  %v11599_v46 = vrot.slane %v9082_v63, 1  ;;  %v8392_v10 = vld [vmem:[%s11589_s2 + $0x298] sm:$0xff]   ;;  %v765_v44 = vrot.slane %v9110_v11, 1  ;;  %v674_v49 = vor.u32 %v672_v50, %v9294_v9  ;;  %v8422_v63 = vld [vmem:[%s11589_s2 + $0x308] sm:$0xff]  }
  0x7a   : > { %4289 = vmatprep.mubr.bf16.mxu1 %v655_v41  ;;  %7231 = vmatpush3.bf16.msra.mxu0 %v8386_v0  ;;  %v682_v0 = vor.u32 %v680_v54, %v9250_v14  ;;  %v763_v14 = vrot.slane %v9137_v24, 1  ;;  %v658_v54 = vor.u32 %v656_v62, %v9265_v6  ;;  %v8396_v6 = vld [vmem:[%s11589_s2 + $0x2a0] sm:$0xff]   ;;  %v777_v50 = vrot.slane %v9187_v61, 1  ;;  %v8399_v61 = vld [vmem:[%s11589_s2 + $0x228] sm:$0xff]  }
  0x7b   : > { %7277 = vmatpush3.bf16.msra.mxu1 %v8388_v37  ;;  %7232 = vmatprep.subr.bf16.mxu0 %v8389_v47  ;;  %v647_v41 = vsel %vm543_vm0, %v642_v8, %v9294_v9  ;;  %v8394_v37 = vld [vmem:[%s11589_s2 + $0x2e0] sm:$0xff]   ;;  %v9452_v11 = vsel %vm750_vm1, %v755_v45, %v765_v44  ;;  %v8397_v8 = vld [vmem:[%s11589_s2 + $0x268] sm:$0xff]   ;;  %v9489_v9 = vsel %vm750_vm1, %v11599_v46, %v767_v22 }
  0x7c   : > { %7278 = vmatprep.subr.bf16.mxu1 %v8391_v2  ;;  %v8395_v47 = vld [vmem:[%s11589_s2 + $0x220] sm:$0xff]   ;;  %v687_v24 = vsel %vm543_vm0, %v682_v0, %v9340_v16  ;;  %v9480_v62 = vsel %vm750_vm1, %v752_v32, %v763_v14  ;;  %v771_v2 = vrot.slane %v9194_v3, 1  ;;  %v663_v5 = vsel %vm543_vm0, %v658_v54, %v9359_v26  ;;  %v8400_v3 = vld [vmem:[%s11589_s2 + $0x2a8] sm:$0xff]  }
  0x7d   : > { %v775_v0 = vrot.slane %v9216_v21, 1  ;;  %v11598_v21 = vrot.slane %v9247_v25, 1 }
  0x7e   : > { %7233 = vmatpush3.bf16.msra.mxu0 %v8390_v30  ;;  %v9496_v30 = vsel %vm750_vm1, %v765_v44, %v773_v28  ;;  %v679_v44 = vsel %vm543_vm0, %v674_v49, %v9384_v20 }
  0x7f   : > { %7279 = vmatpush3.bf16.msra.mxu1 %v8392_v10  ;;  %7234 = vmatprep.subr.bf16.mxu0 %v8393_v1  ;;  %v9505_v10 = vsel %vm750_vm1, %v769_v40, %v777_v50  ;;  %v393_v1 = vld [vmem:[%s9009_s30 + $0xa0] sm:$0x11]  ;;  %v9519_v40 = vsel %vm750_vm1, %v763_v14, %v771_v2  ;;  %v9540_v14 = vsel %vm750_vm1, %v767_v22, %v775_v0  ;;  %v8407_v22 = vld [vmem:[%s11589_s2 + $0x230] sm:$0xff]  }
  0x80   : > { %4217 = vmatmul.mubr.bf16.gmra.mrb[28].mxu0 %v631_v58  ;;  %7280 = vmatprep.subr.bf16.mxu1 %v8394_v37  ;;  %v698_v58 = vor.u32 %v696_v52, %v9319_v55  ;;  %v9522_v37 = vcombine.high %v393_v1, %v393_v1  ;;  %v9526_v54 = vcombine.low %v393_v1, %v393_v1  ;;  %v8406_v52 = vld [vmem:[%s11589_s2 + $0x2f0] sm:$0xff]  }
  0x81   : > { %4290 = vmatmul.mubr.bf16.gmra.mrb[28].mxu1 %v647_v41  ;;  %4224 = vmatprep.mubr.bf16.mxu0 %v671_v17  ;;  %v394_v41 = vld [vmem:[%s9009_s30 + $0xa8] sm:$0x11]  ;;  %v714_v55 = vor.u32 %v712_v43, %v9340_v16  ;;  %v9545_v49 = vsel %vm750_vm1, %v773_v28, %v11598_v21 }
  0x82   : > { %4297 = vmatprep.mubr.bf16.mxu1 %v687_v24  ;;  %7235 = vmatpush3.bf16.msra.mxu0 %v8395_v47  ;;  %v9524_v17 = vcombine.high %v394_v41, %v394_v41  ;;  %v9528_v47 = vcombine.low %v394_v41, %v394_v41  ;;  %v8405_v24 = vld [vmem:[%s11589_s2 + $0x270] sm:$0xff]   ;;  %v692_v16 = vshll.u32 %v9526_v54, 16 }
  0x83   : > { %7281 = vmatpush3.bf16.msra.mxu1 %v8396_v6  ;;  %7236 = vmatprep.subr.bf16.mxu0 %v8397_v8  ;;  %v785_v6 = vrot.slane %v9255_v31, 1  ;;  %v700_v8 = vshll.u32 %v9522_v37, 16 }
  0x84   : > { %7282 = vmatprep.subr.bf16.mxu1 %v8398_v60  ;;  %v716_v60 = vshll.u32 %v9524_v17, 16  ;;  %v708_v43 = vshll.u32 %v9528_v47, 16  ;;  %v694_v21 = vrot.slane %v692_v16, 1  ;;  %v396_v16 = vld [vmem:[%s9009_s30 + $0x8] sm:$0xee] }
  0x85   : > { %v9558_v28 = vsel %vm750_vm1, %v777_v50, %v785_v6  ;;  %v702_v1 = vrot.slane %v700_v8, 1  ;;  %v8408_v50 = vld [vmem:[%s11589_s2 + $0x2b0] sm:$0xff]   ;;  %v8412_v8 = vld [vmem:[%s11589_s2 + $0x2b8] sm:$0xff]  }
  0x86   : > { %7237 = vmatpush3.bf16.msra.mxu0 %v8399_v61  ;;  %v779_v61 = vrot.slane %v9257_v34, 1  ;;  %v718_v41 = vrot.slane %v716_v60, 1  ;;  %v710_v46 = vrot.slane %v708_v43, 1  ;;  %v395_v60 = vld [vmem:[%s9009_s30] sm:$0xee]  ;;  %v875_v34 = vrot.slane %v9208_v13, 1 }
  0x87   : > { %7283 = vmatpush3.bf16.msra.mxu1 %v8400_v3  ;;  %7238 = vmatprep.subr.bf16.mxu0 %v8405_v24  ;;  %v690_v3 = vor.u32 %v688_v51, %v9359_v26  ;;  %v706_v24 = vor.u32 %v704_v7, %v9384_v20  ;;  %v8409_v20 = vld [vmem:[%s11589_s2 + $0x278] sm:$0xff]   ;;  %v6609_v43 = vcombine.high %v395_v60, %v9019_v33 }
  0x88   : > { %4225 = vmatmul.mubr.bf16.gmra.mrb[32].mxu0 %v663_v5  ;;  %7284 = vmatprep.subr.bf16.mxu1 %v8406_v52  ;;  %v9573_v5 = vsel %vm750_vm1, %v771_v2, %v779_v61  ;;  %v783_v52 = vrot.slane %v9268_v42, 1  ;;  %v719_v26 = vsel %vm543_vm0, %v714_v55, %v718_v41  ;;  %v8410_v51 = vld [vmem:[%s11589_s2 + $0x2f8] sm:$0xff]  }
  0x89   : > { %4298 = vmatmul.mubr.bf16.gmra.mrb[32].mxu1 %v679_v44  ;;  %v703_v44 = vsel %vm543_vm0, %v698_v58, %v702_v1  ;;  %v8411_v2 = vld [vmem:[%s11589_s2 + $0x238] sm:$0xff]   ;;  %v695_v58 = vsel %vm543_vm0, %v690_v3, %v694_v21  ;;  %v711_v55 = vsel %vm543_vm0, %v706_v24, %v710_v46  ;;  %v6611_v1 = vcombine.high %v396_v16, %v9026_v36  ;;  %v8417_v46 = vld [vmem:[%s11589_s2 + $0x340] sm:$0xff]  }
  0x8a   : > { %7239 = vmatpush3.bf16.msra.mxu0 %v8407_v22  ;;  %4232 = vmatprep.mubr.bf16.mxu0 %v703_v44  ;;  %v9587_v7 = vsel %vm750_vm1, %v775_v0, %v783_v52  ;;  %v6608_v0 = vcombine.low %v395_v60, %v9019_v33  ;;  %v6610_v22 = vcombine.low %v396_v16, %v9026_v36  ;;  %v754_v21 = vrot.slane %v6609_v43, 1  ;;  %v8419_v24 = vld [vmem:[%s11589_s2 + $0x3c0] sm:$0xff]   ;;  %v8438_v16 = vld [vmem:[%s11589_s2 + $0x3e8] sm:$0xff]  }
  0x8b   : > { %4305 = vmatprep.mubr.bf16.mxu1 %v719_v26  ;;  %7285 = vmatpush3.bf16.msra.mxu1 %v8408_v50  ;;  %v760_v41 = vrot.slane %v6611_v1, 1  ;;  %v8418_v26 = vld [vmem:[%s11589_s2 + $0x300] sm:$0xff]   ;;  %v8440_v43 = vld [vmem:[%s11589_s2 + $0x3a8] sm:$0xff]   ;;  %v11612_v1 = vrot.slane %v9247_v25, 1  ;;  %v398_v25 = vld [vmem:[%s9009_s30 + $0x18] sm:$0xee] }
  0x8c   : > { %7240 = vmatprep.subr.bf16.mxu0 %v8409_v20  ;;  %7286 = vmatprep.subr.bf16.mxu1 %v8410_v51  ;;  %v751_v3 = vrot.slane %v6608_v0, 1  ;;  %v756_v33 = vsel %vm750_vm1, %v754_v21, %v755_v45  ;;  %v757_v36 = vrot.slane %v6610_v22, 1  ;;  %v8424_v20 = vld [vmem:[%s11589_s2 + $0x388] sm:$0xff]   ;;  %v8427_v51 = vld [vmem:[%s11589_s2 + $0x3d0] sm:$0xff]   ;;  %v8434_v60 = vld [vmem:[%s11589_s2 + $0x3e0] sm:$0xff]   ;;  %v789_v22 = vrot.slane %v9522_v37, 1 }
  0x8d   : > { %v762_v50 = vsel %vm750_vm1, %v760_v41, %v761_v39  ;;  %v8421_v39 = vld [vmem:[%s11589_s2 + $0x348] sm:$0xff]   ;;  %v8444_v37 = vld [vmem:[%s11589_s2 + $0x3b0] sm:$0xff]   ;;  %v8445_v21 = vld [vmem:[%s11589_s2 + $0x378] sm:$0xff]  }
  0x8e   : > { %7241 = vmatpush3.bf16.msra.mxu0 %v8411_v2  ;;  %v753_v44 = vsel %vm750_vm1, %v751_v3, %v752_v32  ;;  %v759_v45 = vsel %vm750_vm1, %v757_v36, %v11611_v53  ;;  %v8425_v32 = vld [vmem:[%s11589_s2 + $0x350] sm:$0xff]   ;;  %v8429_v2 = vld [vmem:[%s11589_s2 + $0x358] sm:$0xff]   ;;  %v8439_v0 = vld [vmem:[%s11589_s2 + $0x328] sm:$0xff]  }
  0x8f   : > { %7287 = vmatpush3.bf16.msra.mxu1 %v8412_v8  ;;  %7318 = vmatprep.subr.bf16.mxu0 %v8417_v46  ;;  %v8432_v8 = vld [vmem:[%s11589_s2 + $0x398] sm:$0xff]   ;;  %v790_v46 = vsel %vm750_vm1, %v11612_v1, %v789_v22  ;;  %v397_v41 = vld [vmem:[%s9009_s30 + $0x10] sm:$0xee]  ;;  %v8456_v22 = vld [vmem:[%s11589_s2 + $0x400] sm:$0xff]  }
  0x90   : > { %4233 = vmatmul.mubr.bf16.gmra.mrb[36].mxu0 %v695_v58  ;;  %7364 = vmatprep.subr.bf16.mxu1 %v8419_v24  ;;  %v8430_v58 = vld [vmem:[%s11589_s2 + $0x318] sm:$0xff]   ;;  %v9723_v24 = vld [vmem:[%s9009_s30 + $0x20] sm:$0xff] }
  0x91   : > { %4306 = vmatmul.mubr.bf16.gmra.mrb[36].mxu1 %v711_v55  ;;  %4346 = vmatprep.mubr.bf16.mxu0 %v756_v33  ;;  %v8431_v55 = vld [vmem:[%s11589_s2 + $0x3d8] sm:$0xff]   ;;  %v9726_v33 = vcombine.high %v397_v41, %v9723_v24 }
  0x92   : > { %4419 = vmatprep.mubr.bf16.mxu1 %v762_v50  ;;  %v8446_v36 = vld [vmem:[%s11589_s2 + $0x3f8] sm:$0xff]   ;;  %v9735_v50 = vld [vmem:[%s9009_s30 + $0x28] sm:$0xff] }
  0x93   : > { %v9738_v31 = vcombine.high %v398_v25, %v9735_v50  ;;  %v860_v53 = vrot.slane %v9726_v33, 1 }
  0x98   : > { %4347 = vmatmul.mubr.bf16.vlgmr.msra.gmra.mrb[40].mxu0 %v753_v44  ;;  %v858_v44 = vrot.slane %v9112_v12, 1 }
  0x99   : > { %4420 = vmatmul.mubr.bf16.vlgmr.msra.gmra.mrb[40].mxu1 %v759_v45  ;;  %7319 = vmatpush3.bf16.msra.mxu0 %v8418_v26  ;;  %v8448_v26 = vld [vmem:[%s11589_s2 + $0x3b8] sm:$0xff]   ;;  %v8455_v45 = vld [vmem:[%s11589_s2 + $0x440] sm:$0xff]  }
  0x9a   : > { %4354 = vmatprep.mubr.bf16.mxu0 %v9452_v11  ;;  %4427 = vmatprep.mubr.bf16.mxu1 %v9466_v48  ;;  %v8426_v11 = vld [vmem:[%s11589_s2 + $0x310] sm:$0xff]  }
  0x9b   : > { %7365 = vmatpush3.bf16.msra.mxu1 %v8420_v56  ;;  %7320 = vmatprep.subr.bf16.mxu0 %v8421_v39  ;;  %v8428_v48 = vld [vmem:[%s11589_s2 + $0x390] sm:$0xff]   ;;  %v864_v39 = vrot.slane %v9120_v18, 1 }
  0x9c   : > { %7366 = vmatprep.subr.bf16.mxu1 %v8423_v59  ;;  %v8457_v59 = vld [vmem:[%s11589_s2 + $0x4c0] sm:$0xff]  }
  0x9d   : > { %7321 = vmatpush3.bf16.msra.mxu0 %v8422_v63 }
  0x9e   : > { %7322 = vmatprep.subr.bf16.mxu0 %v8425_v32  ;;  %v9766_v32 = vcombine.low %v397_v41, %v9723_v24 }
  0x9f   : > { %7367 = vmatpush3.bf16.msra.mxu1 %v8424_v20  ;;  %v871_v20 = vrot.slane %v9181_v57, 1 }
  0xa0   : > { %4355 = vmatmul.mubr.bf16.gmra.mrb[44].mxu0 %v9480_v62  ;;  %7368 = vmatprep.subr.bf16.mxu1 %v8427_v51  ;;  %v8433_v62 = vld [vmem:[%s11589_s2 + $0x360] sm:$0xff]   ;;  %v9772_v51 = vcombine.low %v398_v25, %v9735_v50 }
  0xa1   : > { %4428 = vmatmul.mubr.bf16.gmra.mrb[44].mxu1 %v9489_v9  ;;  %4362 = vmatprep.mubr.bf16.mxu0 %v9496_v30  ;;  %v8435_v9 = vld [vmem:[%s11589_s2 + $0x320] sm:$0xff]  }
  0xa2   : > { %4435 = vmatprep.mubr.bf16.mxu1 %v9505_v10  ;;  %7323 = vmatpush3.bf16.msra.mxu0 %v8426_v11  ;;  %v8436_v30 = vld [vmem:[%s11589_s2 + $0x3a0] sm:$0xff]   ;;  %v8437_v10 = vld [vmem:[%s11589_s2 + $0x368] sm:$0xff]   ;;  %v869_v11 = vrot.slane %v9211_v15, 1 }
  0xa3   : > { %7369 = vmatpush3.bf16.msra.mxu1 %v8428_v48  ;;  %7324 = vmatprep.subr.bf16.mxu0 %v8429_v2  ;;  %v873_v48 = vrot.slane %v9213_v19, 1  ;;  %v883_v2 = vrot.slane %v9278_v35, 1 }
  0xa4   : > { %7370 = vmatprep.subr.bf16.mxu1 %v8431_v55  ;;  %v958_v55 = vshrl.u32 %v9133_v23, 16 }
  0xa6   : > { %7325 = vmatpush3.bf16.msra.mxu0 %v8430_v58  ;;  %v877_v58 = vrot.slane %v9286_v4, 1 }
  0xa7   : > { %7371 = vmatpush3.bf16.msra.mxu1 %v8432_v8  ;;  %7326 = vmatprep.subr.bf16.mxu0 %v8433_v62  ;;  %v857_v8 = vrot.slane %v9766_v32, 1  ;;  %v961_v62 = vshll.u32 %v9133_v23, 16 }
  0xa8   : > { %4363 = vmatmul.mubr.bf16.gmra.mrb[48].mxu0 %v9519_v40  ;;  %7372 = vmatprep.subr.bf16.mxu1 %v8434_v60  ;;  %v8441_v40 = vld [vmem:[%s11589_s2 + $0x370] sm:$0xff]   ;;  %v863_v60 = vrot.slane %v9772_v51, 1 }
  0xa9   : > { %4436 = vmatmul.mubr.bf16.gmra.mrb[48].mxu1 %v9540_v14  ;;  %4370 = vmatprep.mubr.bf16.mxu0 %v9545_v49  ;;  %v793_v14 = vrot.slane %v9524_v17, 1  ;;  %v8442_v49 = vld [vmem:[%s11589_s2 + $0x3f0] sm:$0xff]   ;;  %v787_v17 = vrot.slane %v9526_v54, 1  ;;  %v791_v54 = vrot.slane %v9528_v47, 1  ;;  %v867_v47 = vrot.slane %v9143_v27, 1 }
  0xaa   : > { %4443 = vmatprep.mubr.bf16.mxu1 %v9558_v28  ;;  %7327 = vmatpush3.bf16.msra.mxu0 %v8435_v9  ;;  %v8443_v28 = vld [vmem:[%s11589_s2 + $0x330] sm:$0xff]   ;;  %v881_v9 = vrot.slane %v9289_v38, 1 }
  0xab   : > { %7373 = vmatpush3.bf16.msra.mxu1 %v8436_v30  ;;  %7328 = vmatprep.subr.bf16.mxu0 %v8437_v10  ;;  %v794_v3 = vsel %vm750_vm1, %v785_v6, %v793_v14  ;;  %v8447_v6 = vld [vmem:[%s11589_s2 + $0x338] sm:$0xff]   ;;  %v788_v56 = vsel %vm750_vm1, %v779_v61, %v787_v17  ;;  %v792_v63 = vsel %vm750_vm1, %v783_v52, %v791_v54  ;;  %v879_v52 = vrot.slane %v9253_v29, 1  ;;  %v8464_v17 = vld [vmem:[%s11589_s2 + $0x408] sm:$0xff]  }
  0xac   : > { %7374 = vmatprep.subr.bf16.mxu1 %v8438_v16  ;;  %v992_v30 = vshrl.u32 %v9143_v27, 16  ;;  %v995_v10 = vshll.u32 %v9143_v27, 16  ;;  %v9787_v16 = vrot.slane %v958_v55, 1  ;;  %v865_v14 = vsel %vm750_vm1, %v863_v60, %v864_v39  ;;  %v8466_v54 = vld [vmem:[%s11589_s2 + $0x488] sm:$0xff]   ;;  %v8681_v55 = vld [vmem:[%s9009_s30 + $0x90] sm:$0xff]  ;;  %v8682_v60 = vld [vmem:[%s9009_s30 + $0x98] sm:$0xff] }
  0xad   : > { %v876_v1 = vsel %vm750_vm1, %v867_v47, %v875_v34 }
  0xae   : > { %7329 = vmatpush3.bf16.msra.mxu0 %v8439_v0  ;;  %v941_v0 = vshrl.u32 %v9112_v12, 16  ;;  %v9819_v41 = vrot.slane %v995_v10, 2 }
  0xaf   : > { %7375 = vmatpush3.bf16.msra.mxu1 %v8440_v43  ;;  %7330 = vmatprep.subr.bf16.mxu0 %v8441_v40  ;;  %v859_v43 = vsel %vm750_vm1, %v857_v8, %v858_v44  ;;  %v9796_v40 = vrot.slane %v961_v62, 2  ;;  %v1010_v62 = vshrl.u32 %v9181_v57, 16 }
  0xb0   : > { %4371 = vmatmul.mubr.bf16.gmra.mrb[52].mxu0 %v9573_v5  ;;  %7376 = vmatprep.subr.bf16.mxu1 %v8442_v49  ;;  %v861_v5 = vrot.slane %v9133_v23, 1  ;;  %v8460_v49 = vld [vmem:[%s11589_s2 + $0x480] sm:$0xff]   ;;  %v9824_v25 = vrot.slane %v941_v0, 1  ;;  %v8476_v0 = vld [vmem:[%s11589_s2 + $0x418] sm:$0xff]  }
  0xb1   : > { %4444 = vmatmul.mubr.bf16.gmra.mrb[52].mxu1 %v9587_v7  ;;  %4378 = vmatprep.mubr.bf16.mxu0 %v790_v46  ;;  %v866_v7 = vrot.slane %v9738_v31, 1  ;;  %v8463_v46 = vld [vmem:[%s11589_s2 + $0x448] sm:$0xff]  }
  0xb2   : > { %4451 = vmatprep.mubr.bf16.mxu1 %v794_v3  ;;  %7331 = vmatpush3.bf16.msra.mxu0 %v8443_v28  ;;  %v862_v61 = vsel %vm750_vm1, %v860_v53, %v861_v5  ;;  %v944_v28 = vshll.u32 %v9112_v12, 16  ;;  %v8465_v3 = vld [vmem:[%s11589_s2 + $0x4c8] sm:$0xff]   ;;  %v399_v53 = vld [vmem:[%s9009_s30 + $0xa0] sm:$0xff] }
  0xb3   : > { %7377 = vmatpush3.bf16.msra.mxu1 %v8444_v37  ;;  %7332 = vmatprep.subr.bf16.mxu0 %v8445_v21  ;;  %v868_v42 = vsel %vm750_vm1, %v866_v7, %v867_v47  ;;  %v872_v37 = vsel %vm750_vm1, %v861_v5, %v871_v20  ;;  %v9817_v21 = vrot.slane %v992_v30, 1  ;;  %v8473_v5 = vld [vmem:[%s11589_s2 + $0x4d0] sm:$0xff]   ;;  %v950_v7 = vshrl.u32 %v9726_v33, 16 }
  0xb4   : > { %7378 = vmatprep.subr.bf16.mxu1 %v8446_v36  ;;  %v975_v36 = vshrl.u32 %v9120_v18, 16  ;;  %v9836_v47 = vrot.slane %v944_v28, 2  ;;  %v9867_v8 = vcombine.high %v8681_v55, %v399_v53 }
  0xb5   : > { %v9881_v10 = vrot.slane %v950_v7, 1 }
  0xb6   : > { %7333 = vmatpush3.bf16.msra.mxu0 %v8447_v6  ;;  %v8467_v6 = vld [vmem:[%s11589_s2 + $0x450] sm:$0xff]   ;;  %v887_v28 = vrot.slane %v9867_v8, 1 }
  0xb7   : > { %7379 = vmatpush3.bf16.msra.mxu1 %v8448_v26  ;;  %7410 = vmatprep.subr.bf16.mxu0 %v8455_v45  ;;  %v978_v26 = vshll.u32 %v9120_v18, 16  ;;  %v400_v45 = vld [vmem:[%s9009_s30 + $0xa8] sm:$0xff] }
  0xb8   : > { %4379 = vmatmul.mubr.bf16.gmra.mrb[56].mxu0 %v788_v56  ;;  %7456 = vmatprep.subr.bf16.mxu1 %v8457_v59  ;;  %v953_v56 = vshll.u32 %v9726_v33, 16  ;;  %v870_v59 = vsel %vm750_vm1, %v858_v44, %v869_v11  ;;  %v880_v33 = vsel %vm750_vm1, %v871_v20, %v879_v52  ;;  %v8474_v44 = vld [vmem:[%s11589_s2 + $0x490] sm:$0xff]   ;;  %v8475_v20 = vld [vmem:[%s11589_s2 + $0x458] sm:$0xff]   ;;  %v9879_v30 = vcombine.high %v8682_v60, %v400_v45 }
  0xb9   : > { %4452 = vmatmul.mubr.bf16.gmra.mrb[56].mxu1 %v792_v63  ;;  %4492 = vmatprep.mubr.bf16.mxu0 %v862_v61  ;;  %v8470_v63 = vld [vmem:[%s11589_s2 + $0x410] sm:$0xff]   ;;  %v9851_v61 = vrot.slane %v975_v36, 1  ;;  %v9913_v36 = vcombine.low %v8682_v60, %v400_v45  ;;  %v888_v7 = vsel %vm750_vm1, %v879_v52, %v887_v28  ;;  %v933_v52 = vshrl.u32 %v9766_v32, 16 }
  0xba   : > { %4565 = vmatprep.mubr.bf16.mxu1 %v868_v42  ;;  %v874_v42 = vsel %vm750_vm1, %v864_v39, %v873_v48  ;;  %v884_v39 = vsel %vm750_vm1, %v875_v34, %v883_v2  ;;  %v8477_v34 = vld [vmem:[%s11589_s2 + $0x4d8] sm:$0xff]   ;;  %v8495_v60 = vld [vmem:[%s11589_s2 + $0x470] sm:$0xff]  }
  0xc0   : > { %4493 = vmatmul.mubr.bf16.vlgmr.msra.gmra.mrb[60].mxu0 %v859_v43  ;;  %v9889_v43 = vrot.slane %v953_v56, 2 }
  0xc1   : > { %4566 = vmatmul.mubr.bf16.vlgmr.msra.gmra.mrb[60].mxu1 %v865_v14  ;;  %7411 = vmatpush3.bf16.msra.mxu0 %v8456_v22  ;;  %v984_v22 = vshrl.u32 %v9738_v31, 16  ;;  %v8478_v14 = vld [vmem:[%s11589_s2 + $0x498] sm:$0xff]  }
  0xc2   : > { %4500 = vmatprep.mubr.bf16.mxu0 %v872_v37  ;;  %4573 = vmatprep.mubr.bf16.mxu1 %v876_v1  ;;  %v8483_v37 = vld [vmem:[%s11589_s2 + $0x460] sm:$0xff]   ;;  %v891_v1 = vrot.slane %v9879_v30, 1 }
  0xc3   : > { %7457 = vmatpush3.bf16.msra.mxu1 %v8460_v49  ;;  %7412 = vmatprep.subr.bf16.mxu0 %v8463_v46  ;;  %v987_v49 = vshll.u32 %v9738_v31, 16  ;;  %v8484_v46 = vld [vmem:[%s11589_s2 + $0x4e0] sm:$0xff]   ;;  %v402_v31 = vld [vmem:[%s9009_s30 + $0xb8] sm:$0x11] }
  0xc4   : > { %7458 = vmatprep.subr.bf16.mxu1 %v8465_v3  ;;  %v9905_v3 = vcombine.low %v8681_v55, %v399_v53  ;;  %v882_v53 = vsel %vm750_vm1, %v873_v48, %v881_v9  ;;  %v8487_v48 = vld [vmem:[%s11589_s2 + $0x468] sm:$0xff]  }
  0xc5   : > { %7413 = vmatpush3.bf16.msra.mxu0 %v8464_v17  ;;  %v401_v17 = vld [vmem:[%s9009_s30 + $0xb0] sm:$0x11]  ;;  %v9931_v56 = vrot.slane %v987_v49, 2  ;;  %v8490_v55 = vld [vmem:[%s11589_s2 + $0x4a8] sm:$0xff]  }
  0xc6   : > { %7414 = vmatprep.subr.bf16.mxu0 %v8467_v6  ;;  %v8485_v6 = vld [vmem:[%s11589_s2 + $0x420] sm:$0xff]   ;;  %v6633_v45 = vcombine.high %v401_v17, %v401_v17  ;;  %v8497_v49 = vld [vmem:[%s11589_s2 + $0x430] sm:$0xff]  }
  0xc7   : > { %7459 = vmatpush3.bf16.msra.mxu1 %v8466_v54  ;;  %v878_v54 = vsel %vm750_vm1, %v869_v11, %v877_v58  ;;  %v8486_v11 = vld [vmem:[%s11589_s2 + $0x4a0] sm:$0xff]  }
  0xc8   : > { %4501 = vmatmul.mubr.bf16.gmra.mrb[64].mxu0 %v870_v59  ;;  %7460 = vmatprep.subr.bf16.mxu1 %v8473_v5  ;;  %v9918_v5 = vrot.slane %v984_v22, 1  ;;  %v892_v59 = vsel %vm750_vm1, %v883_v2, %v891_v1  ;;  %v889_v2 = vrot.slane %v9913_v36, 1 }
  0xc9   : > { %4574 = vmatmul.mubr.bf16.gmra.mrb[64].mxu1 %v874_v42  ;;  %4508 = vmatprep.mubr.bf16.mxu0 %v880_v33  ;;  %v885_v42 = vrot.slane %v9905_v3, 1  ;;  %v8488_v33 = vld [vmem:[%s11589_s2 + $0x4e8] sm:$0xff]  }
  0xca   : > { %4581 = vmatprep.mubr.bf16.mxu1 %v884_v39  ;;  %7415 = vmatpush3.bf16.msra.mxu0 %v8470_v63  ;;  %v6635_v63 = vcombine.high %v402_v31, %v402_v31  ;;  %v895_v39 = vrot.slane %v6633_v45, 1  ;;  %v956_v45 = vor.u32 %v9889_v43, %v9881_v10  ;;  %v935_v10 = vrot.slane %v933_v52, 1 }
  0xcb   : > { %7461 = vmatpush3.bf16.msra.mxu1 %v8474_v44  ;;  %7416 = vmatprep.subr.bf16.mxu0 %v8475_v20  ;;  %v8489_v44 = vld [vmem:[%s11589_s2 + $0x428] sm:$0xff]   ;;  %v886_v22 = vsel %vm750_vm1, %v877_v58, %v885_v42 }
  0xcc   : > { %7462 = vmatprep.subr.bf16.mxu1 %v8477_v34  ;;  %v899_v20 = vrot.slane %v6635_v63, 1  ;;  %v936_v34 = vshll.u32 %v9766_v32, 16  ;;  %v896_v32 = vsel %vm750_vm1, %v887_v28, %v895_v39  ;;  %v998_v63 = vor.u32 %v9819_v41, %v9817_v21 }
  0xcd   : > { %v1012_v41 = vrot.slane %v1010_v62, 1  ;;  %v1004_v62 = vshll.u32 %v9211_v15, 16 }
  0xce   : > { %7417 = vmatpush3.bf16.msra.mxu0 %v8476_v0  ;;  %v8496_v0 = vld [vmem:[%s11589_s2 + $0x4f0] sm:$0xff]   ;;  %v900_v58 = vsel %vm750_vm1, %v891_v1, %v899_v20  ;;  %v1013_v1 = vshll.u32 %v9181_v57, 16  ;;  %v938_v43 = vrot.slane %v936_v34, 2  ;;  %v10014_v34 = vor.u32 %v9836_v47, %v9824_v25 }
  0xcf   : > { %7463 = vmatpush3.bf16.msra.mxu1 %v8478_v14  ;;  %7418 = vmatprep.subr.bf16.mxu0 %v8483_v37  ;;  %v6632_v14 = vcombine.low %v401_v17, %v401_v17  ;;  %v8498_v37 = vld [vmem:[%s11589_s2 + $0x4b0] sm:$0xff]   ;;  %v8499_v17 = vld [vmem:[%s11589_s2 + $0x478] sm:$0xff]   ;;  %v1064_v47 = vshrl.u32 %v9278_v35, 16 }
  0xd0   : > { %4509 = vmatmul.mubr.bf16.gmra.mrb[68].mxu0 %v878_v54  ;;  %7464 = vmatprep.subr.bf16.mxu1 %v8484_v46  ;;  %v890_v46 = vsel %vm750_vm1, %v881_v9, %v889_v2  ;;  %v6634_v54 = vcombine.low %v402_v31, %v402_v31  ;;  %v8500_v9 = vld [vmem:[%s11589_s2 + $0x4f8] sm:$0xff]   ;;  %v1015_v39 = vrot.slane %v1013_v1, 2 }
  0xd1   : > { %4582 = vmatmul.mubr.bf16.gmra.mrb[68].mxu1 %v882_v53  ;;  %4516 = vmatprep.mubr.bf16.mxu0 %v888_v7  ;;  %v970_v53 = vshll.u32 %v9772_v51, 16  ;;  %v893_v28 = vrot.slane %v6632_v14, 1  ;;  %v8501_v7 = vld [vmem:[%s11589_s2 + $0x438] sm:$0xff]  }
  0xd2   : > { %4589 = vmatprep.mubr.bf16.mxu1 %v892_v59  ;;  %7419 = vmatpush3.bf16.msra.mxu0 %v8485_v6  ;;  %v967_v6 = vshrl.u32 %v9772_v51, 16  ;;  %v897_v31 = vrot.slane %v6634_v54, 1  ;;  %v964_v51 = vor.u32 %v9796_v40, %v9787_v16  ;;  %v1028_v59 = vshrl.u32 %v9208_v13, 16  ;;  %v8505_v40 = vld [vmem:[%s11589_s2 + $0x5c0] sm:$0xff]  }
  0xd3   : > { %7465 = vmatpush3.bf16.msra.mxu1 %v8486_v11  ;;  %7420 = vmatprep.subr.bf16.mxu0 %v8487_v48  ;;  %v8502_v11 = vld [vmem:[%s11589_s2 + $0x4b8] sm:$0xff]   ;;  %v990_v48 = vor.u32 %v9931_v56, %v9918_v5  ;;  %v980_v16 = vrot.slane %v978_v26, 2  ;;  %v894_v5 = vsel %vm750_vm1, %v885_v42, %v893_v28  ;;  %v972_v21 = vrot.slane %v970_v53, 2  ;;  %v8506_v28 = vld [vmem:[%s11589_s2 + $0x580] sm:$0xff]  }
  0xd4   : > { %7466 = vmatprep.subr.bf16.mxu1 %v8488_v33  ;;  %v8503_v33 = vld [vmem:[%s11589_s2 + $0x540] sm:$0xff]   ;;  %v969_v56 = vrot.slane %v967_v6, 1  ;;  %v965_v52 = vsel %vm931_vm2, %v956_v45, %v964_v51  ;;  %v1030_v20 = vrot.slane %v1028_v59, 1  ;;  %v939_v42 = vor.u32 %v938_v43, %v935_v10  ;;  %v8509_v45 = vld [vmem:[%s11589_s2 + $0x5c8] sm:$0xff]  }
  0xd5   : > { %v999_v26 = vsel %vm931_vm2, %v990_v48, %v998_v63  ;;  %v981_v14 = vor.u32 %v980_v16, %v9851_v61  ;;  %v1067_v54 = vshll.u32 %v9278_v35, 16  ;;  %v8504_v61 = vld [vmem:[%s11589_s2 + $0x500] sm:$0xff]   ;;  %v1006_v6 = vrot.slane %v1004_v62, 2  ;;  %v8508_v16 = vld [vmem:[%s11589_s2 + $0x508] sm:$0xff]  }
  0xd6   : > { %7421 = vmatpush3.bf16.msra.mxu0 %v8489_v44  ;;  %v1031_v44 = vshll.u32 %v9208_v13, 16  ;;  %v1100_v62 = vshrl.u32 %v9879_v30, 16 }
  0xd7   : > { %7467 = vmatpush3.bf16.msra.mxu1 %v8490_v55  ;;  %7422 = vmatprep.subr.bf16.mxu0 %v8495_v60  ;;  %v898_v55 = vsel %vm750_vm1, %v889_v2, %v897_v31  ;;  %v1019_v2 = vshrl.u32 %v9213_v19, 16  ;;  %v8507_v31 = vld [vmem:[%s11589_s2 + $0x548] sm:$0xff]   ;;  %vm5377_vm1 = vcmask 654336  }
  0xd8   : > { %4517 = vmatmul.mubr.bf16.gmra.mrb[72].mxu0 %v886_v22  ;;  %7468 = vmatprep.subr.bf16.mxu1 %v8496_v0  ;;  %v1033_v60 = vrot.slane %v1031_v44, 2  ;;  %v1001_v0 = vshrl.u32 %v9211_v15, 16  ;;  %v973_v22 = vor.u32 %v972_v21, %v969_v56  ;;  %v1058_v44 = vshll.u32 %v9289_v38, 16  ;;  %v8511_v56 = vld [vmem:[%s11589_s2 + $0x550] sm:$0xff]  }
  0xd9   : > { %4590 = vmatmul.mubr.bf16.gmra.mrb[72].mxu1 %v890_v46  ;;  %4524 = vmatprep.mubr.bf16.mxu0 %v896_v32  ;;  %v1049_v46 = vshll.u32 %v9253_v29, 16  ;;  %v1016_v32 = vor.u32 %v1015_v39, %v1012_v41  ;;  %v1082_v21 = vshrl.u32 %v9867_v8, 16  ;;  %v1085_v41 = vshll.u32 %v9867_v8, 16 }
  0xda   : > { %4597 = vmatprep.mubr.bf16.mxu1 %v900_v58  ;;  %7423 = vmatpush3.bf16.msra.mxu0 %v8497_v49  ;;  %v1022_v49 = vshll.u32 %v9213_v19, 16  ;;  %v10022_v25 = vor.u32 %v1033_v60, %v1030_v20  ;;  %v948_v58 = vsel %vm931_vm2, %v939_v42, %v10014_v34  ;;  %v982_v53 = vsel %vm931_vm2, %v973_v22, %v981_v14  ;;  %v8512_v22 = vld [vmem:[%s11589_s2 + $0x510] sm:$0xff]  }
  0xdb   : > { %7469 = vmatpush3.bf16.msra.mxu1 %v8498_v37  ;;  %7424 = vmatprep.subr.bf16.mxu0 %v8499_v17  ;;  %v1046_v37 = vshrl.u32 %v9253_v29, 16  ;;  %v1003_v17 = vrot.slane %v1001_v0, 1  ;;  %v1051_v48 = vrot.slane %v1049_v46, 2  ;;  %v1017_v10 = vsel %vm931_vm2, %v964_v51, %v1016_v32  ;;  %v8513_v0 = vld [vmem:[%s11589_s2 + $0x5d0] sm:$0xff]  }
  0xdc   : > { %7470 = vmatprep.subr.bf16.mxu1 %v8500_v9  ;;  %v1021_v9 = vrot.slane %v1019_v2, 1  ;;  %v1024_v1 = vrot.slane %v1022_v49, 2  ;;  %v1035_v43 = vsel %vm931_vm2, %v998_v63, %v10022_v25  ;;  %v1060_v60 = vrot.slane %v1058_v44, 2 }
  0xdd   : > { %v1048_v59 = vrot.slane %v1046_v37, 1  ;;  %v10056_v51 = vor.u32 %v1006_v6, %v1003_v17  ;;  %v1103_v2 = vshll.u32 %v9879_v30, 16  ;;  %v1084_v49 = vrot.slane %v1082_v21, 1  ;;  %v404_v17 = vld [vmem:[%s9009_s30 + $0xb8] sm:$0x33] }
  0xde   : > { %7425 = vmatpush3.bf16.msra.mxu0 %v8501_v7  ;;  %v1037_v7 = vshrl.u32 %v9286_v4, 16  ;;  %v10058_v63 = vor.u32 %v1024_v1, %v1021_v9  ;;  %v1087_v37 = vrot.slane %v1085_v41, 2  ;;  %v1076_v9 = vshll.u32 %v9905_v3, 16 }
  0xdf   : > { %7471 = vmatpush3.bf16.msra.mxu1 %v8502_v11  ;;  %7502 = vmatprep.subr.bf16.mxu0 %v8503_v33  ;;  %v1040_v11 = vshll.u32 %v9286_v4, 16  ;;  %v1055_v33 = vshrl.u32 %v9289_v38, 16  ;;  %v10063_v20 = vor.u32 %v1051_v48, %v1048_v59  ;;  %v1008_v46 = vsel %vm931_vm2, %v10014_v34, %v10056_v51  ;;  %v8518_v59 = vld [vmem:[%s11589_s2 + $0x598] sm:$0xff]  }
  0xe0   : > { %4525 = vmatmul.mubr.bf16.gmra.mrb[76].mxu0 %v894_v5  ;;  %7548 = vmatprep.subr.bf16.mxu1 %v8505_v40  ;;  %v1066_v40 = vrot.slane %v1064_v47, 1  ;;  %v1069_v5 = vrot.slane %v1067_v54, 2  ;;  %v1026_v47 = vsel %vm931_vm2, %v981_v14, %v10058_v63  ;;  %v8514_v54 = vld [vmem:[%s11589_s2 + $0x590] sm:$0xff]   ;;  %v1073_v34 = vshrl.u32 %v9905_v3, 16 }
  0xe1   : > { %4598 = vmatmul.mubr.bf16.gmra.mrb[76].mxu1 %v898_v55  ;;  %4638 = vmatprep.mubr.bf16.mxu0 %v965_v52  ;;  %v8510_v55 = vld [vmem:[%s11589_s2 + $0x588] sm:$0xff]   ;;  %v1039_v52 = vrot.slane %v1037_v7, 1  ;;  %v1042_v39 = vrot.slane %v1040_v11, 2  ;;  %v1053_v6 = vsel %vm931_vm2, %v1016_v32, %v10063_v20  ;;  %v1105_v1 = vrot.slane %v1103_v2, 2  ;;  %v8517_v32 = vld [vmem:[%s11589_s2 + $0x5d8] sm:$0xff]  }
  0xe2   : > { %4711 = vmatprep.mubr.bf16.mxu1 %v999_v26  ;;  %v1057_v26 = vrot.slane %v1055_v33, 1  ;;  %v10068_v42 = vor.u32 %v1069_v5, %v1066_v40  ;;  %v1091_v7 = vshrl.u32 %v9913_v36, 16  ;;  %v1094_v48 = vshll.u32 %v9913_v36, 16 }
  0xe3   : > { %v10103_v11 = vor.u32 %v1042_v39, %v1039_v52  ;;  %v10114_v33 = vor.u32 %v1087_v37, %v1084_v49  ;;  %v1075_v44 = vrot.slane %v1073_v34, 1  ;;  %v1078_v5 = vrot.slane %v1076_v9, 2  ;;  %v8521_v52 = vld [vmem:[%s11589_s2 + $0x520] sm:$0xff]   ;;  %v8531_v34 = vld [vmem:[%s11589_s2 + $0x570] sm:$0xff]  }
  0xe4   : > { %v10146_v37 = vcombine.low %v404_v17, %v404_v17 }
  0xe5   : > { %v1044_v39 = vsel %vm931_vm2, %v10056_v51, %v10103_v11  ;;  %v1089_v51 = vsel %vm931_vm2, %v10063_v20, %v10114_v33  ;;  %v8525_v20 = vld [vmem:[%s11589_s2 + $0x528] sm:$0xff]  }
  0xe8   : > { %4639 = vmatmul.mubr.bf16.vlgmr.msra.gmra.mrb[80].mxu0 %v948_v58  ;;  %v8515_v58 = vld [vmem:[%s11589_s2 + $0x558] sm:$0xff]  }
  0xe9   : > { %4712 = vmatmul.mubr.bf16.vlgmr.msra.gmra.mrb[80].mxu1 %v982_v53  ;;  %7503 = vmatpush3.bf16.msra.mxu0 %v8504_v61  ;;  %v403_v61 = vld [vmem:[%s9009_s30 + $0xb0] sm:$0x33]  ;;  %v1071_v53 = vsel %vm931_vm2, %v10022_v25, %v10068_v42  ;;  %v8516_v25 = vld [vmem:[%s11589_s2 + $0x518] sm:$0xff]  }
  0xea   : > { %4646 = vmatprep.mubr.bf16.mxu0 %v1017_v10  ;;  %4719 = vmatprep.mubr.bf16.mxu1 %v1035_v43  ;;  %v10092_v14 = vcombine.high %v403_v61, %v403_v61  ;;  %v8519_v10 = vld [vmem:[%s11589_s2 + $0x560] sm:$0xff]   ;;  %v10141_v2 = vcombine.low %v403_v61, %v403_v61 }
  0xeb   : > { %7549 = vmatpush3.bf16.msra.mxu1 %v8506_v28  ;;  %7504 = vmatprep.subr.bf16.mxu0 %v8507_v31  ;;  %v1102_v28 = vrot.slane %v1100_v62, 1  ;;  %v10097_v31 = vcombine.high %v404_v17, %v404_v17  ;;  %v8523_v62 = vld [vmem:[%s11589_s2 + $0x568] sm:$0xff]  }
  0xec   : > { %7550 = vmatprep.subr.bf16.mxu1 %v8509_v45  ;;  %v10105_v45 = vor.u32 %v1060_v60, %v1057_v26  ;;  %v1118_v43 = vshrl.u32 %v10092_v14, 16  ;;  %v1096_v60 = vrot.slane %v1094_v48, 2  ;;  %v1109_v17 = vshrl.u32 %v10141_v2, 16 }
  0xed   : > { %7505 = vmatpush3.bf16.msra.mxu0 %v8508_v16  ;;  %v1121_v16 = vshll.u32 %v10092_v14, 16  ;;  %v1106_v40 = vor.u32 %v1105_v1, %v1102_v28  ;;  %v1136_v21 = vshrl.u32 %v10097_v31, 16  ;;  %v1139_v41 = vshll.u32 %v10097_v31, 16 }
  0xee   : > { %7506 = vmatprep.subr.bf16.mxu0 %v8511_v56  ;;  %v8520_v56 = vld [vmem:[%s11589_s2 + $0x5e0] sm:$0xff]   ;;  %v1062_v26 = vsel %vm931_vm2, %v10058_v63, %v10105_v45  ;;  %v1130_v28 = vshll.u32 %v10146_v37, 16 }
  0xef   : > { %7551 = vmatpush3.bf16.msra.mxu1 %v8510_v55  ;;  %v1093_v55 = vrot.slane %v1091_v7, 1  ;;  %v1123_v49 = vrot.slane %v1121_v16, 2  ;;  %v1107_v63 = vsel %vm931_vm2, %v10068_v42, %v1106_v40  ;;  %v8526_v42 = vld [vmem:[%s11589_s2 + $0x5a8] sm:$0xff]   ;;  %v405_v7 = vld [vmem:[%s9009_s30 + $0x10] sm:$0xcc] }
  0xf0   : > { %4647 = vmatmul.mubr.bf16.gmra.mrb[84].mxu0 %v1008_v46  ;;  %7552 = vmatprep.subr.bf16.mxu1 %v8513_v0  ;;  %v8522_v0 = vld [vmem:[%s11589_s2 + $0x5a0] sm:$0xff]   ;;  %v1138_v46 = vrot.slane %v1136_v21, 1  ;;  %v8534_v16 = vld [vmem:[%s11589_s2 + $0x5b0] sm:$0xff]   ;;  %v1132_v21 = vrot.slane %v1130_v28, 2 }
  0xf1   : > { %4720 = vmatmul.mubr.bf16.gmra.mrb[84].mxu1 %v1026_v47  ;;  %4654 = vmatprep.mubr.bf16.mxu0 %v1053_v6  ;;  %v1141_v47 = vrot.slane %v1139_v41, 2  ;;  %v1097_v61 = vor.u32 %v1096_v60, %v1093_v55  ;;  %v1112_v6 = vshll.u32 %v10141_v2, 16  ;;  %v6641_v41 = vcombine.high %v405_v7, %v9723_v24 }
  0xf2   : > { %4727 = vmatprep.mubr.bf16.mxu1 %v1071_v53  ;;  %7507 = vmatpush3.bf16.msra.mxu0 %v8512_v22  ;;  %v1120_v22 = vrot.slane %v1118_v43, 1  ;;  %v1127_v53 = vshrl.u32 %v10146_v37, 16 }
  0xf3   : > { %7553 = vmatpush3.bf16.msra.mxu1 %v8514_v54  ;;  %7508 = vmatprep.subr.bf16.mxu0 %v8515_v58  ;;  %v8524_v54 = vld [vmem:[%s11589_s2 + $0x5e8] sm:$0xff]   ;;  %v1079_v58 = vor.u32 %v1078_v5, %v1075_v44  ;;  %v1142_v1 = vor.u32 %v1141_v47, %v1138_v46  ;;  %v1098_v44 = vsel %vm931_vm2, %v10105_v45, %v1097_v61  ;;  %v1114_v43 = vrot.slane %v1112_v6, 2  ;;  %v8535_v45 = vld [vmem:[%s11589_s2 + $0x578] sm:$0xff]  }
  0xf4   : > { %7554 = vmatprep.subr.bf16.mxu1 %v8517_v32  ;;  %v1124_v9 = vor.u32 %v1123_v49, %v1120_v22  ;;  %v8532_v32 = vld [vmem:[%s11589_s2 + $0x5f0] sm:$0xff]   ;;  %v1178_v60 = vrot.slane %v6641_v41, 2  ;;  %v8684_v46 = vld [vmem:[%s9009_s30 + $0x28] sm:$0xff]  ;;  %v1193_v6 = vrot.slane %v9208_v13, 2  ;;  %v1187_v13 = vrot.slane %v9211_v15, 2 }
  0xf5   : > { %v1080_v48 = vsel %vm931_vm2, %v10103_v11, %v1079_v58  ;;  %v1143_v11 = vsel %vm931_vm2, %v1106_v40, %v1142_v1  ;;  %v8537_v40 = vld [vmem:[%s11589_s2 + $0x538] sm:$0xff]   ;;  %v8549_v1 = vld [vmem:[%s11589_s2 + $0x6c8] sm:$0xff]   ;;  %v1197_v15 = vrot.slane %v9253_v29, 2  ;;  %v8552_v29 = vld [vmem:[%s11589_s2 + $0x610] sm:$0xff]   ;;  %v1199_v41 = vrot.slane %v9289_v38, 2 }
  0xf6   : > { %7509 = vmatpush3.bf16.msra.mxu0 %v8516_v25  ;;  %v8533_v25 = vld [vmem:[%s11589_s2 + $0x530] sm:$0xff]   ;;  %v1125_v5 = vsel %vm931_vm2, %v10114_v33, %v1124_v9  ;;  %v8536_v33 = vld [vmem:[%s11589_s2 + $0x5f8] sm:$0xff]   ;;  %v8544_v9 = vld [vmem:[%s11589_s2 + $0x600] sm:$0xff]   ;;  %v1215_v38 = vrot.slane %v10146_v37, 2 }
  0xf7   : > { %7555 = vmatpush3.bf16.msra.mxu1 %v8518_v59  ;;  %7510 = vmatprep.subr.bf16.mxu0 %v8519_v10  ;;  %v406_v59 = vld [vmem:[%s9009_s30 + $0x18] sm:$0xcc]  ;;  %v1111_v10 = vrot.slane %v1109_v17, 1  ;;  %v1189_v17 = vrot.slane %v9181_v57, 2  ;;  %v8547_v57 = vld [vmem:[%s11589_s2 + $0x648] sm:$0xff]  }
  0xf8   : > { %4655 = vmatmul.mubr.bf16.gmra.mrb[88].mxu0 %v1044_v39  ;;  %7556 = vmatprep.subr.bf16.mxu1 %v8520_v56  ;;  %v1129_v56 = vrot.slane %v1127_v53, 1  ;;  %v6643_v55 = vcombine.high %v406_v59, %v9735_v50  ;;  %v1185_v39 = vrot.slane %v9143_v27, 2  ;;  %v8545_v27 = vld [vmem:[%s11589_s2 + $0x6c0] sm:$0xff]   ;;  %v6642_v47 = vcombine.low %v406_v59, %v8684_v46  ;;  %v8550_v59 = vld [vmem:[%s11589_s2 + $0x688] sm:$0xff]   ;;  %v8572_v37 = vld [vmem:[%s11589_s2 + $0x6f8] sm:$0xff]  }
  0xf9   : > { %4728 = vmatmul.mubr.bf16.gmra.mrb[88].mxu1 %v1062_v26  ;;  %4662 = vmatprep.mubr.bf16.mxu0 %v1089_v51  ;;  %v1115_v24 = vor.u32 %v1114_v43, %v1111_v10  ;;  %v8538_v26 = vld [vmem:[%s11589_s2 + $0x5b8] sm:$0xff]   ;;  %v8683_v51 = vld [vmem:[%s9009_s30 + $0x20] sm:$0xff]  ;;  %v1198_v43 = vsel %vm1174_vm3, %v1189_v17, %v1197_v15 }
  0xfa   : > { %4735 = vmatprep.mubr.bf16.mxu1 %v1107_v63  ;;  %7511 = vmatpush3.bf16.msra.mxu0 %v8521_v52  ;;  %v1179_v52 = vrot.slane %v9133_v23, 2  ;;  %v1133_v50 = vor.u32 %v1132_v21, %v1129_v56  ;;  %v1184_v23 = vrot.slane %v6643_v55, 2  ;;  %v6640_v22 = vcombine.low %v405_v7, %v8683_v51  ;;  %v8548_v7 = vld [vmem:[%s11589_s2 + $0x608] sm:$0xff]   ;;  %v8557_v56 = vld [vmem:[%s11589_s2 + $0x6d8] sm:$0xff]   ;;  %v8561_v51 = vld [vmem:[%s11589_s2 + $0x620] sm:$0xff]  }
  0xfb   : > { %7557 = vmatpush3.bf16.msra.mxu1 %v8522_v0  ;;  %7512 = vmatprep.subr.bf16.mxu0 %v8523_v62  ;;  %v8543_v0 = vld [vmem:[%s11589_s2 + $0x640] sm:$0xff]   ;;  %v1116_v62 = vsel %vm931_vm2, %v1079_v58, %v1115_v24  ;;  %v1176_v58 = vrot.slane %v9112_v12, 2  ;;  %v1195_v21 = vrot.slane %v9286_v4, 2  ;;  %v1209_v24 = vrot.slane %v9879_v30, 2 }
  0xfc   : > { %7558 = vmatprep.subr.bf16.mxu1 %v8524_v54  ;;  %v1134_v49 = vsel %vm931_vm2, %v1097_v61, %v1133_v50  ;;  %v1180_v63 = vsel %vm1174_vm3, %v1178_v60, %v1179_v52  ;;  %v1186_v54 = vsel %vm1174_vm3, %v1184_v23, %v1185_v39  ;;  %v1182_v61 = vrot.slane %v9120_v18, 2  ;;  %v8546_v12 = vld [vmem:[%s11589_s2 + $0x680] sm:$0xff]  }
  0xfd   : > { %v1190_v28 = vsel %vm1174_vm3, %v1179_v52, %v1189_v17  ;;  %v1194_v18 = vsel %vm1174_vm3, %v1185_v39, %v1193_v6  ;;  %v8558_v52 = vld [vmem:[%s11589_s2 + $0x698] sm:$0xff]   ;;  %vm5526_vm2 = vcmask 261120  }
  0xfe   : > { %7513 = vmatpush3.bf16.msra.mxu0 %v8525_v20  ;;  %v1175_v20 = vrot.slane %v6640_v22, 2 }
  0xff   : > { %7559 = vmatpush3.bf16.msra.mxu1 %v8526_v42  ;;  %7514 = vmatprep.subr.bf16.mxu0 %v8531_v34  ;;  %v1181_v42 = vrot.slane %v6642_v47, 2 }
 0x100   : > { %4663 = vmatmul.mubr.bf16.gmra.mrb[92].mxu0 %v1080_v48  ;;  %7560 = vmatprep.subr.bf16.mxu1 %v8532_v32  ;;  %v1177_v34 = vsel %vm1174_vm3, %v1175_v20, %v1176_v58  ;;  %v1191_v32 = vrot.slane %v9213_v19, 2  ;;  %v1201_v19 = vrot.slane %v9278_v35, 2  ;;  %v8553_v48 = vld [vmem:[%s11589_s2 + $0x6d0] sm:$0xff]   ;;  %v8563_v20 = vld [vmem:[%s11589_s2 + $0x668] sm:$0xff]  }
 0x101   : > { %4736 = vmatmul.mubr.bf16.gmra.mrb[92].mxu1 %v1098_v44  ;;  %4670 = vmatprep.mubr.bf16.mxu0 %v1125_v5  ;;  %v1183_v53 = vsel %vm1174_vm3, %v1181_v42, %v1182_v61  ;;  %v1188_v44 = vsel %vm1174_vm3, %v1176_v58, %v1187_v13  ;;  %v8554_v35 = vld [vmem:[%s11589_s2 + $0x690] sm:$0xff]   ;;  %v8555_v5 = vld [vmem:[%s11589_s2 + $0x658] sm:$0xff]   ;;  %v407_v58 = vld [vmem:[%s9009_s30 + $0x20] sm:$0xcc] }
 0x102   : > { %4743 = vmatprep.mubr.bf16.mxu1 %v1143_v11  ;;  %7515 = vmatpush3.bf16.msra.mxu0 %v8533_v25  ;;  %v8551_v25 = vld [vmem:[%s11589_s2 + $0x650] sm:$0xff]   ;;  %v1192_v10 = vsel %vm1174_vm3, %v1182_v61, %v1191_v32  ;;  %v8556_v11 = vld [vmem:[%s11589_s2 + $0x618] sm:$0xff]   ;;  %v1200_v46 = vsel %vm1174_vm3, %v1191_v32, %v1199_v41  ;;  %v408_v32 = vld [vmem:[%s9009_s30 + $0x28] sm:$0xcc] }
 0x103   : > { %7561 = vmatpush3.bf16.msra.mxu1 %v8534_v16  ;;  %7516 = vmatprep.subr.bf16.mxu0 %v8535_v45  ;;  %v1202_v16 = vsel %vm1174_vm3, %v1193_v6, %v1201_v19  ;;  %v1205_v45 = vrot.slane %v9867_v8, 2  ;;  %v1210_v6 = vsel %vm1174_vm3, %v1201_v19, %v1209_v24  ;;  %v8571_v8 = vld [vmem:[%s11589_s2 + $0x678] sm:$0xff]  }
 0x104   : > { %7562 = vmatprep.subr.bf16.mxu1 %v8536_v33  ;;  %v10273_v33 = vld [vmem:[%s11590_s3] ss:$0 sm:$0xff] }
 0x105   : > { %v1206_v47 = vsel %vm1174_vm3, %v1197_v15, %v1205_v45  ;;  %v8568_v15 = vld [vmem:[%s11589_s2 + $0x6f0] sm:$0xff]  }
 0x106   : > { %7517 = vmatpush3.bf16.msra.mxu0 %v8537_v40  ;;  %v8559_v40 = vld [vmem:[%s11589_s2 + $0x660] sm:$0xff]  }
 0x107   : > { %7563 = vmatpush3.bf16.msra.mxu1 %v8538_v26  ;;  %7594 = vmatprep.subr.bf16.mxu0 %v8543_v0  ;;  %v8560_v26 = vld [vmem:[%s11589_s2 + $0x6e0] sm:$0xff]  }
 0x108   : > { %4671 = vmatmul.mubr.bf16.gmra.mrb[96].mxu0 %v1116_v62  ;;  %7640 = vmatprep.subr.bf16.mxu1 %v8545_v27  ;;  %v1196_v27 = vsel %vm1174_vm3, %v1187_v13, %v1195_v21  ;;  %v1203_v62 = vrot.slane %v9905_v3, 2  ;;  %v8566_v13 = vld [vmem:[%s11589_s2 + $0x6a8] sm:$0xff]  }
 0x109   : > { %4744 = vmatmul.mubr.bf16.gmra.mrb[96].mxu1 %v1134_v49  ;;  %4784 = vmatprep.mubr.bf16.mxu0 %v1180_v63 }
 0x10a   : > { %4857 = vmatprep.mubr.bf16.mxu1 %v1186_v54  ;;  %v8562_v54 = vld [vmem:[%s11589_s2 + $0x6a0] sm:$0xff]  }
 0x110   : > { %4785 = vmatmul.mubr.bf16.vlgmr.msra.gmra.mrb[100].mxu0 %v1177_v34  ;;  %v8564_v34 = vld [vmem:[%s11589_s2 + $0x6e8] sm:$0xff]  }
 0x111   : > { %4858 = vmatmul.mubr.bf16.vlgmr.msra.gmra.mrb[100].mxu1 %v1183_v53  ;;  %7595 = vmatpush3.bf16.msra.mxu0 %v8544_v9  ;;  %v1207_v53 = vrot.slane %v9913_v36, 2 }
 0x112   : > { %4792 = vmatprep.mubr.bf16.mxu0 %v1190_v28  ;;  %4865 = vmatprep.mubr.bf16.mxu1 %v1194_v18  ;;  %v409_v28 = vld [vmem:[%s9009_s30 + $0x30] sm:$0xff] }
 0x113   : > { %7641 = vmatpush3.bf16.msra.mxu1 %v8546_v12  ;;  %7596 = vmatprep.subr.bf16.mxu0 %v8547_v57  ;;  %v8565_v12 = vld [vmem:[%s11589_s2 + $0x628] sm:$0xff]  }
 0x114   : > { %7642 = vmatprep.subr.bf16.mxu1 %v8549_v1  ;;  %v8567_v1 = vld [vmem:[%s11589_s2 + $0x670] sm:$0xff]  }
 0x115   : > { %7597 = vmatpush3.bf16.msra.mxu0 %v8548_v7  ;;  %v1213_v7 = vrot.slane %v10092_v14, 2  ;;  %v10341_v14 = vld [vmem:[%s9009_s30 + $0x40] ss:$16 sps:$4 sm:$0xff]  }
 0x116   : > { %7598 = vmatprep.subr.bf16.mxu0 %v8551_v25  ;;  %v1217_v25 = vrot.slane %v10097_v31, 2 }
 0x117   : > { %7643 = vmatpush3.bf16.msra.mxu1 %v8550_v59  ;;  %v410_v59 = vld [vmem:[%s9009_s30 + $0x38] sm:$0xff]  ;;  %v1214_v4 = vsel %vm1174_vm3, %v1205_v45, %v1213_v7  ;;  %v1216_v7 = vsel %vm1174_vm3, %v1207_v53, %v1215_v38  ;;  %v10449_v38 = vld [vmem:[%s9009_s30 + $0x84] ss:$16 sps:$4 sm:$0xff]  }
 0x118   : > { %4793 = vmatmul.mubr.bf16.gmra.mrb[104].mxu0 %v1188_v44  ;;  %7644 = vmatprep.subr.bf16.mxu1 %v8553_v48  ;;  %v1211_v44 = vrot.slane %v10141_v2, 2 }
 0x119   : > { %4866 = vmatmul.mubr.bf16.gmra.mrb[104].mxu1 %v1192_v10  ;;  %4800 = vmatprep.mubr.bf16.mxu0 %v1198_v43  ;;  %v10338_v10 = vcombine.high %v407_v58, %v409_v28 }
 0x11a   : > { %4873 = vmatprep.mubr.bf16.mxu1 %v1202_v16  ;;  %7599 = vmatpush3.bf16.msra.mxu0 %v8552_v29  ;;  %v10336_v29 = vcombine.low %v407_v58, %v409_v28 }
 0x11b   : > { %v7058_v55 = vpop.f32.mrb[0].mxu0  ;;  %7645 = vmatpush3.bf16.msra.mxu1 %v8554_v35  ;;  %7600 = vmatprep.subr.bf16.mxu0 %v8555_v5  ;;  %v10344_v35 = vld [vmem:[%s9009_s30 + $0x44] ss:$16 sps:$4 sm:$0xff]   ;;  %v1422_v28 = vshrl.u32 %v10338_v10, 16 }
 0x11c   : > { %v7104_v39 = vpop.f32.mrb[0].mxu1  ;;  %v7059_v50 = vpop.f32.mrb[1].mxu0  ;;  %7646 = vmatprep.subr.bf16.mxu1 %v8557_v56 }
 0x11d   : > { %v7060_v60 = vadd.f32 %v7059_v50, %v7058_v55  ;;  %v7105_v23 = vpop.f32.mrb[1].mxu1  ;;  %v7061_v0 = vpop.f32.mrb[2].mxu0  ;;  %v1208_v55 = vsel %vm1174_vm3, %v1199_v41, %v1207_v53  ;;  %v8569_v41 = vld [vmem:[%s11589_s2 + $0x630] sm:$0xff]  }
 0x11e   : > { %v7106_v22 = vadd.f32 %v7105_v23, %v7104_v39  ;;  %v7107_v49 = vpop.f32.mrb[2].mxu1  ;;  %v7062_v63 = vpop.f32.mrb[3].mxu0  ;;  %7601 = vmatpush3.bf16.msra.mxu0 %v8556_v11  ;;  %v1204_v11 = vsel %vm1174_vm3, %v1195_v21, %v1203_v62  ;;  %v1218_v21 = vsel %vm1174_vm3, %v1209_v24, %v1217_v25  ;;  %v1332_v24 = vrot.slane %v10338_v10, 2  ;;  %v10419_v25 = vld [vmem:[%s9009_s30 + $0x64] ss:$16 sps:$4 sm:$0xff]  }
 0x11f   : > { %v4057_v42 = vadd.f32 %v7060_v60, %v10273_v33  ;;  %v7063_v61 = vadd.f32 %v7062_v63, %v7061_v0  ;;  %v7108_v17 = vpop.f32.mrb[3].mxu1  ;;  %7647 = vmatpush3.bf16.msra.mxu1 %v8558_v52  ;;  %7602 = vmatprep.subr.bf16.mxu0 %v8559_v40  ;;  %v10356_v52 = vcombine.high %v408_v32, %v410_v59  ;;  %v10359_v40 = vld [vmem:[%s9009_s30 + $0x4c] ss:$16 sps:$4 sm:$0xff]   ;;  %v8570_v60 = vld [vmem:[%s11589_s2 + $0x6b0] sm:$0xff]   ;;  %v1329_v0 = vrot.slane %v10336_v29, 2 }
 0x120   : > { %v7109_v9 = vadd.f32 %v7108_v17, %v7107_v49  ;;  %4801 = vmatmul.mubr.bf16.gmra.mrb[108].mxu0 %v1196_v27  ;;  %7648 = vmatprep.subr.bf16.mxu1 %v8560_v26  ;;  %v10388_v49 = vld [vmem:[%s9009_s30 + $0x48] ss:$16 sps:$4 sm:$0xff]   ;;  %v1330_v63 = vrot.slane %v10341_v14, 2  ;;  %v1339_v58 = vrot.slane %v10359_v40, 2 }
 0x121   : > { %v10317_v18 = vadd.f32 %v7106_v22, %v4057_v42  ;;  %v4060_v57 = vadd.f32 %v7063_v61, %v10273_v33  ;;  %4874 = vmatmul.mubr.bf16.gmra.mrb[108].mxu1 %v1200_v46  ;;  %4808 = vmatprep.mubr.bf16.mxu0 %v1206_v47  ;;  %v1333_v22 = vrot.slane %v10344_v35, 2  ;;  %v10399_v42 = vcombine.low %v408_v32, %v410_v59 }
 0x122   : > { %4881 = vmatprep.mubr.bf16.mxu1 %v1210_v6  ;;  %7603 = vmatpush3.bf16.msra.mxu0 %v8561_v51  ;;  %v8573_v51 = vld [vmem:[%s11589_s2 + $0x638] sm:$0xff]   ;;  %v8585_v6 = vld [vmem:[%s11589_s2 + $0x740] sm:$0xff]   ;;  %v1212_v32 = vsel %vm1174_vm3, %v1203_v62, %v1211_v44  ;;  %v1336_v3 = vrot.slane %v10388_v49, 2 }
 0x123   : > { %v10333_v19 = vadd.f32 %v7109_v9, %v4060_v57  ;;  %v7064_v48 = vpop.f32.mrb[4].mxu0  ;;  %7649 = vmatpush3.bf16.msra.mxu1 %v8562_v54  ;;  %7604 = vmatprep.subr.bf16.mxu0 %v8563_v20  ;;  %v8574_v54 = vld [vmem:[%s11589_s2 + $0x6b8] sm:$0xff]   ;;  %v1338_v20 = vrot.slane %v10356_v52, 2  ;;  %v1335_v2 = vrot.slane %v10399_v42, 2 }
 0x124   : > { %v7110_v31 = vpop.f32.mrb[4].mxu1  ;;  %v7065_v43 = vpop.f32.mrb[5].mxu0  ;;  %7650 = vmatprep.subr.bf16.mxu1 %v8564_v34 }
 0x125   : > { %v7066_v16 = vadd.f32 %v7065_v43, %v7064_v48  ;;  %v7111_v5 = vpop.f32.mrb[5].mxu1  ;;  %v7067_v56 = vpop.f32.mrb[6].mxu0  ;;  %v1340_v53 = vsel %vm1174_vm3, %v1338_v20, %v1339_v58  ;;  %v10431_v43 = vld [vmem:[%s9009_s30 + $0x6c] ss:$16 sps:$4 sm:$0xff]   ;;  %v8592_v20 = vld [vmem:[%s11589_s2 + $0x780] sm:$0xff]  }
 0x126   : > { %v7112_v39 = vadd.f32 %v7111_v5, %v7110_v31  ;;  %v7113_v50 = vpop.f32.mrb[6].mxu1  ;;  %v7068_v26 = vpop.f32.mrb[7].mxu0  ;;  %7605 = vmatpush3.bf16.msra.mxu0 %v8565_v12  ;;  %v8587_v12 = vld [vmem:[%s11589_s2 + $0x7c0] sm:$0xff]   ;;  %v1334_v31 = vsel %vm1174_vm3, %v1332_v24, %v1333_v22 }
 0x127   : > { %v4065_v45 = vadd.f32 %v7066_v16, %v10273_v33  ;;  %v7069_v30 = vadd.f32 %v7068_v26, %v7067_v56  ;;  %v7114_v23 = vpop.f32.mrb[7].mxu1  ;;  %7651 = vmatpush3.bf16.msra.mxu1 %v8566_v13  ;;  %7606 = vmatprep.subr.bf16.mxu0 %v8567_v1  ;;  %v1425_v16 = vshll.u32 %v10338_v10, 16  ;;  %v1430_v56 = vshrl.u32 %v10344_v35, 16  ;;  %v10461_v24 = vld [vmem:[%s9009_s30 + $0x80] ss:$16 sps:$4 sm:$0xff]  }
 0x128   : > { %v7115_v27 = vadd.f32 %v7114_v23, %v7113_v50  ;;  %4809 = vmatmul.mubr.bf16.gmra.mrb[112].mxu0 %v1204_v11  ;;  %7652 = vmatprep.subr.bf16.mxu1 %v8568_v15  ;;  %v1433_v11 = vshll.u32 %v10344_v35, 16  ;;  %v1343_v50 = vrot.slane %v10419_v25, 2  ;;  %v10440_v26 = vrot.slane %v1422_v28, 2 }
 0x129   : > { %v10391_v46 = vadd.f32 %v7112_v39, %v4065_v45  ;;  %v4068_v47 = vadd.f32 %v7069_v30, %v10273_v33  ;;  %4882 = vmatmul.mubr.bf16.gmra.mrb[112].mxu1 %v1208_v55  ;;  %4816 = vmatprep.mubr.bf16.mxu0 %v1214_v4  ;;  %v10443_v4 = vld [vmem:[%s9009_s30 + $0x60] ss:$16 sps:$4 sm:$0xff]   ;;  %v1347_v45 = vrot.slane %v10431_v43, 2  ;;  %v10458_v30 = vld [vmem:[%s9009_s30 + $0x8c] ss:$16 sps:$4 sm:$0xff]  }
 0x12a   : > { %4889 = vmatprep.mubr.bf16.mxu1 %v1218_v21  ;;  %7607 = vmatpush3.bf16.msra.mxu0 %v8569_v41  ;;  %v10446_v21 = vld [vmem:[%s9009_s30 + $0x68] ss:$16 sps:$4 sm:$0xff]  }
 0x12b   : > { %v10401_v61 = vadd.f32 %v7115_v27, %v4068_v47  ;;  %v7070_v17 = vpop.f32.mrb[8].mxu0  ;;  %7653 = vmatpush3.bf16.msra.mxu1 %v8570_v60  ;;  %7608 = vmatprep.subr.bf16.mxu0 %v8571_v8  ;;  %v8586_v8 = vld [vmem:[%s11589_s2 + $0x700] sm:$0xff]  }
 0x12c   : > { %v7116_v34 = vpop.f32.mrb[8].mxu1  ;;  %v7071_v9 = vpop.f32.mrb[9].mxu0  ;;  %7654 = vmatprep.subr.bf16.mxu1 %v8572_v37 }
 0x12d   : > { %v7072_v57 = vadd.f32 %v7071_v9, %v7070_v17  ;;  %v7117_v13 = vpop.f32.mrb[9].mxu1  ;;  %v7073_v1 = vpop.f32.mrb[10].mxu0  ;;  %v1337_v9 = vsel %vm1174_vm3, %v1335_v2, %v1336_v3 }
 0x12e   : > { %v7118_v15 = vadd.f32 %v7117_v13, %v7116_v34  ;;  %v7119_v59 = vpop.f32.mrb[10].mxu1  ;;  %v7074_v48 = vpop.f32.mrb[11].mxu0  ;;  %7609 = vmatpush3.bf16.msra.mxu0 %v8573_v51 }
 0x12f   : > { %v4073_v62 = vadd.f32 %v7072_v57, %v10273_v33  ;;  %v7075_v36 = vadd.f32 %v7074_v48, %v7073_v1  ;;  %v7120_v44 = vpop.f32.mrb[11].mxu1  ;;  %7655 = vmatpush3.bf16.msra.mxu1 %v8574_v54  ;;  %7686 = vmatprep.subr.bf16.mxu0 %v8585_v6  ;;  %v1331_v54 = vsel %vm1174_vm3, %v1329_v0, %v1330_v63  ;;  %v8596_v48 = vld [vmem:[%s11589_s2 + $0x708] sm:$0xff]  }
 0x130   : > { %v7121_v5 = vadd.f32 %v7120_v44, %v7119_v59  ;;  %4817 = vmatmul.mubr.bf16.gmra.mrb[116].mxu0 %v1212_v32  ;;  %7732 = vmatprep.subr.bf16.mxu1 %v8587_v12  ;;  %v8595_v12 = vld [vmem:[%s11589_s2 + $0x748] sm:$0xff]   ;;  %v1344_v0 = vsel %vm1174_vm3, %v1333_v22, %v1343_v50  ;;  %v1348_v1 = vsel %vm1174_vm3, %v1339_v58, %v1347_v45  ;;  %v1345_v59 = vrot.slane %v10446_v21, 2 }
 0x131   : > { %v10436_v55 = vadd.f32 %v7118_v15, %v4073_v62  ;;  %v4076_v39 = vadd.f32 %v7075_v36, %v10273_v33  ;;  %4890 = vmatmul.mubr.bf16.gmra.mrb[116].mxu1 %v1216_v7  ;;  %4930 = vmatprep.mubr.bf16.mxu0 %v1334_v31  ;;  %v10489_v32 = vld [vmem:[%s9009_s30 + $0x88] ss:$16 sps:$4 sm:$0xff]   ;;  %v1341_v15 = vrot.slane %v10443_v4, 2  ;;  %v1351_v31 = vrot.slane %v10449_v38, 2  ;;  %v8599_v36 = vld [vmem:[%s11589_s2 + $0x750] sm:$0xff]  }
 0x132   : > { %5003 = vmatprep.mubr.bf16.mxu1 %v1340_v53  ;;  %v8597_v22 = vld [vmem:[%s11589_s2 + $0x7c8] sm:$0xff]   ;;  %v1355_v44 = vrot.slane %v10458_v30, 2  ;;  %v1349_v53 = vrot.slane %v10461_v24, 2 }
 0x133   : > { %v10451_v41 = vadd.f32 %v7121_v5, %v4076_v39  ;;  %v7076_v60 = vpop.f32.mrb[12].mxu0  ;;  %v8598_v62 = vld [vmem:[%s11589_s2 + $0x788] sm:$0xff]   ;;  %v8607_v5 = vld [vmem:[%s11589_s2 + $0x7d0] sm:$0xff]  }
 0x134   : > { %v7122_v23 = vpop.f32.mrb[12].mxu1  ;;  %v7077_v37 = vpop.f32.mrb[13].mxu0  ;;  %v10515_v39 = vld [vmem:[%s9009_s30 + $0xa4] ss:$16 sps:$4 sm:$0xff]  }
 0x135   : > { %v7078_v27 = vadd.f32 %v7077_v37, %v7076_v60  ;;  %v7123_v51 = vpop.f32.mrb[13].mxu1  ;;  %v7079_v47 = vpop.f32.mrb[14].mxu0  ;;  %v10521_v37 = vld [vmem:[%s9009_s30 + $0xac] ss:$16 sps:$4 sm:$0xff]  }
 0x136   : > { %v7124_v17 = vadd.f32 %v7123_v51, %v7122_v23  ;;  %v7125_v6 = vpop.f32.mrb[14].mxu1  ;;  %v7080_v34 = vpop.f32.mrb[15].mxu0  ;;  %v11602_v23 = vrot.slane %v10489_v32, 2 }
 0x137   : > { %v4081_v28 = vadd.f32 %v7078_v27, %v10273_v33  ;;  %v7081_v57 = vadd.f32 %v7080_v34, %v7079_v47  ;;  %v7126_v13 = vpop.f32.mrb[15].mxu1  ;;  %v8604_v47 = vld [vmem:[%s11589_s2 + $0x710] sm:$0xff]  }
 0x138   : > { %v7127_v7 = vadd.f32 %v7126_v13, %v7125_v6  ;;  %4931 = vmatmul.mubr.bf16.vlgmr.msra.gmra.mrb[120].mxu0 %v1331_v54  ;;  %v10527_v54 = vld [vmem:[%s9009_s30 + $0xa0] ss:$16 sps:$4 sm:$0xff]  }
 0x139   : > { %v10500_v58 = vadd.f32 %v7124_v17, %v4081_v28  ;;  %v4084_v2 = vadd.f32 %v7081_v57, %v10273_v33  ;;  %5004 = vmatmul.mubr.bf16.vlgmr.msra.gmra.mrb[120].mxu1 %v1337_v9  ;;  %7687 = vmatpush3.bf16.msra.mxu0 %v8586_v8  ;;  %v1346_v9 = vsel %vm1174_vm3, %v1336_v3, %v1345_v59  ;;  %v8609_v28 = vld [vmem:[%s11589_s2 + $0x758] sm:$0xff]  }
 0x13a   : > { %4938 = vmatprep.mubr.bf16.mxu0 %v1344_v0  ;;  %5011 = vmatprep.mubr.bf16.mxu1 %v1348_v1  ;;  %v8611_v3 = vld [vmem:[%s11589_s2 + $0x7d8] sm:$0xff]   ;;  %v10555_v1 = vrot.slane %v1425_v16, 3 }
 0x13b   : > { %v10517_v60 = vadd.f32 %v7127_v7, %v4084_v2  ;;  %v7082_v8 = vpop.f32.mrb[16].mxu0  ;;  %7733 = vmatpush3.bf16.msra.mxu1 %v8592_v20  ;;  %7688 = vmatprep.subr.bf16.mxu0 %v8595_v12  ;;  %v1342_v20 = vsel %vm1174_vm3, %v1330_v63, %v1341_v15  ;;  %v8608_v12 = vld [vmem:[%s11589_s2 + $0x790] sm:$0xff]   ;;  %v1352_v63 = vsel %vm1174_vm3, %v1343_v50, %v1351_v31  ;;  %v1432_v7 = vrot.slane %v1430_v56, 2  ;;  %v8610_v16 = vld [vmem:[%s11589_s2 + $0x718] sm:$0xff]  }
 0x13c   : > { %v7128_v27 = vpop.f32.mrb[16].mxu1  ;;  %v7083_v51 = vpop.f32.mrb[17].mxu0  ;;  %7734 = vmatprep.subr.bf16.mxu1 %v8597_v22  ;;  %v1356_v50 = vsel %vm1174_vm3, %v1347_v45, %v1355_v44  ;;  %v8612_v45 = vld [vmem:[%s11589_s2 + $0x798] sm:$0xff]  }
 0x13d   : > { %v7084_v17 = vadd.f32 %v7083_v51, %v7082_v8  ;;  %v7129_v6 = vpop.f32.mrb[17].mxu1  ;;  %v7085_v34 = vpop.f32.mrb[18].mxu0  ;;  %7689 = vmatpush3.bf16.msra.mxu0 %v8596_v48  ;;  %v10567_v8 = vld [vmem:[%s9009_s30 + $0xa8] ss:$16 sps:$4 sm:$0xff]   ;;  %v1357_v51 = vrot.slane %v10527_v54, 2 }
 0x13e   : > { %v7130_v57 = vadd.f32 %v7129_v6, %v7128_v27  ;;  %v7131_v13 = vpop.f32.mrb[18].mxu1  ;;  %v7086_v0 = vpop.f32.mrb[19].mxu0  ;;  %7690 = vmatprep.subr.bf16.mxu0 %v8599_v36  ;;  %v11601_v36 = vrot.slane %v10515_v39, 2  ;;  %v11600_v27 = vrot.slane %v10521_v37, 2  ;;  %v428_v6 = vld [vmem:[%s9009_s30 + $0xc8] sm:$0x33] }
 0x13f   : > { %v4089_v48 = vadd.f32 %v7084_v17, %v10273_v33  ;;  %v7087_v22 = vadd.f32 %v7086_v0, %v7085_v34  ;;  %v7132_v2 = vpop.f32.mrb[19].mxu1  ;;  %7735 = vmatpush3.bf16.msra.mxu1 %v8598_v62  ;;  %v427_v17 = vld [vmem:[%s9009_s30 + $0xc0] sm:$0x33] }
 0x140   : > { %v7133_v10 = vadd.f32 %v7132_v2, %v7131_v13  ;;  %4939 = vmatmul.mubr.bf16.gmra.mrb[124].mxu0 %v1342_v20  ;;  %7736 = vmatprep.subr.bf16.mxu1 %v8607_v5  ;;  %v8619_v5 = vld [vmem:[%s11589_s2 + $0x760] sm:$0xff]   ;;  %v1360_v35 = vsel %vm1174_vm3, %v1351_v31, %v11601_v36 }
 0x141   : > { %v10572_v56 = vadd.f32 %v7130_v57, %v4089_v48  ;;  %v4092_v62 = vadd.f32 %v7087_v22, %v10273_v33  ;;  %5012 = vmatmul.mubr.bf16.gmra.mrb[124].mxu1 %v1346_v9  ;;  %4946 = vmatprep.mubr.bf16.mxu0 %v1352_v63  ;;  %v8620_v33 = vld [vmem:[%s11589_s2 + $0x7e0] sm:$0xff]   ;;  %v6665_v9 = vcombine.high %v427_v17, %v427_v17  ;;  %v1435_v57 = vrot.slane %v1433_v11, 3 }
 0x142   : > { %5019 = vmatprep.mubr.bf16.mxu1 %v1356_v50  ;;  %7691 = vmatpush3.bf16.msra.mxu0 %v8604_v47  ;;  %v1350_v47 = vsel %vm1174_vm3, %v1341_v15, %v1349_v53  ;;  %v1354_v63 = vsel %vm1174_vm3, %v1345_v59, %v11602_v23  ;;  %v1428_v11 = vor.u32 %v10555_v1, %v10440_v26  ;;  %v8622_v31 = vld [vmem:[%s11589_s2 + $0x7a0] sm:$0xff]   ;;  %v8623_v26 = vld [vmem:[%s11589_s2 + $0x768] sm:$0xff]  }
 0x143   : > { %v10588_v34 = vadd.f32 %v7133_v10, %v4092_v62  ;;  %v7150_v20 = vpop.f32.mrb[20].mxu0  ;;  %7737 = vmatpush3.bf16.msra.mxu1 %v8608_v12  ;;  %7692 = vmatprep.subr.bf16.mxu0 %v8609_v28  ;;  %v1364_v15 = vsel %vm1174_vm3, %v1355_v44, %v11600_v27  ;;  %v6667_v1 = vcombine.high %v428_v6, %v428_v6  ;;  %v8624_v44 = vld [vmem:[%s11589_s2 + $0x7e8] sm:$0xff]   ;;  %v1367_v23 = vrot.slane %v6665_v9, 2  ;;  %v8632_v9 = vld [vmem:[%s11589_s2 + $0x7f0] sm:$0xff]  }
 0x144   : > { %v7196_v13 = vpop.f32.mrb[20].mxu1  ;;  %v7151_v0 = vpop.f32.mrb[21].mxu0  ;;  %7738 = vmatprep.subr.bf16.mxu1 %v8611_v3  ;;  %v8621_v3 = vld [vmem:[%s11589_s2 + $0x720] sm:$0xff]   ;;  %v6664_v10 = vcombine.low %v427_v17, %v427_v17  ;;  %v6666_v62 = vcombine.low %v428_v6, %v428_v6  ;;  %v10629_v59 = vor.u32 %v1435_v57, %v1432_v7  ;;  %v8631_v7 = vld [vmem:[%s11589_s2 + $0x770] sm:$0xff]   ;;  %v1459_v57 = vshll.u32 %v10356_v52, 16 }
 0x145   : > { %v7152_v12 = vadd.f32 %v7151_v0, %v7150_v20  ;;  %v7197_v28 = vpop.f32.mrb[21].mxu1  ;;  %v7153_v48 = vpop.f32.mrb[22].mxu0  ;;  %v1456_v20 = vshrl.u32 %v10356_v52, 16  ;;  %v8633_v52 = vld [vmem:[%s11589_s2 + $0x730] sm:$0xff]  }
 0x146   : > { %v7198_v22 = vadd.f32 %v7197_v28, %v7196_v13  ;;  %v7199_v2 = vpop.f32.mrb[22].mxu1  ;;  %v7154_v50 = vpop.f32.mrb[23].mxu0  ;;  %7693 = vmatpush3.bf16.msra.mxu0 %v8610_v16  ;;  %v8625_v16 = vld [vmem:[%s11589_s2 + $0x728] sm:$0xff]   ;;  %v10664_v28 = vsel %vm1403_vm4, %v1428_v11, %v10629_v59  ;;  %v8634_v11 = vld [vmem:[%s11589_s2 + $0x7b0] sm:$0xff]  }
 0x147   : > { %v4203_v0 = vadd.f32 %v7152_v12, %v10317_v18  ;;  %v7155_v27 = vadd.f32 %v7154_v50, %v7153_v48  ;;  %v7200_v36 = vpop.f32.mrb[23].mxu1  ;;  %7739 = vmatpush3.bf16.msra.mxu1 %v8612_v45  ;;  %7694 = vmatprep.subr.bf16.mxu0 %v8619_v5  ;;  %v8626_v18 = vld [vmem:[%s11589_s2 + $0x7a8] sm:$0xff]   ;;  %v1371_v45 = vrot.slane %v6667_v1, 2  ;;  %v1369_v12 = vrot.slane %v6666_v62, 2 }
 0x148   : > { %v7201_v13 = vadd.f32 %v7200_v36, %v7199_v2  ;;  %4947 = vmatmul.mubr.bf16.gmra.mrb[128].mxu0 %v1350_v47  ;;  %7740 = vmatprep.subr.bf16.mxu1 %v8620_v33  ;;  %v1358_v36 = vsel %vm1174_vm3, %v1349_v53, %v1357_v51  ;;  %v1365_v33 = vrot.slane %v6664_v10, 2  ;;  %v11615_v53 = vrot.slane %v10515_v39, 2 }
 0x149   : > { %v10634_v17 = vadd.f32 %v7198_v22, %v4203_v0  ;;  %v4206_v6 = vadd.f32 %v7155_v27, %v10333_v19  ;;  %5020 = vmatmul.mubr.bf16.gmra.mrb[128].mxu1 %v1354_v63  ;;  %4954 = vmatprep.mubr.bf16.mxu0 %v1360_v35  ;;  %v11613_v19 = vrot.slane %v10567_v8, 2  ;;  %v11614_v27 = vrot.slane %v10489_v32, 2 }
 0x14a   : > { %5027 = vmatprep.mubr.bf16.mxu1 %v1364_v15  ;;  %7695 = vmatpush3.bf16.msra.mxu0 %v8621_v3  ;;  %v1368_v35 = vsel %vm1174_vm3, %v11615_v53, %v1367_v23  ;;  %v10669_v3 = vrot.slane %v1456_v20, 2  ;;  %v1467_v23 = vshll.u32 %v10359_v40, 16  ;;  %v1405_v50 = vshrl.u32 %v10336_v29, 16 }
 0x14b   : > { %v1362_v5 = vsel %vm1174_vm3, %v11614_v27, %v11613_v19  ;;  %v10657_v47 = vadd.f32 %v7201_v13, %v4206_v6  ;;  %v7156_v63 = vpop.f32.mrb[24].mxu0  ;;  %7741 = vmatpush3.bf16.msra.mxu1 %v8622_v31  ;;  %7696 = vmatprep.subr.bf16.mxu0 %v8623_v26  ;;  %v10671_v31 = vrot.slane %v1459_v57, 3  ;;  %v1464_v26 = vshrl.u32 %v10359_v40, 16 }
 0x14c   : > { %v7202_v48 = vpop.f32.mrb[24].mxu1  ;;  %v7157_v15 = vpop.f32.mrb[25].mxu0  ;;  %7742 = vmatprep.subr.bf16.mxu1 %v8624_v44  ;;  %v1408_v44 = vshll.u32 %v10336_v29, 16  ;;  %v1413_v10 = vshrl.u32 %v10341_v14, 16  ;;  %v11616_v13 = vrot.slane %v10521_v37, 2  ;;  %v1469_v19 = vrot.slane %v1467_v23, 3 }
 0x14d   : > { %v7158_v1 = vadd.f32 %v7157_v15, %v7156_v63  ;;  %v7203_v22 = vpop.f32.mrb[25].mxu1  ;;  %v7159_v2 = vpop.f32.mrb[26].mxu0  ;;  %v1466_v6 = vrot.slane %v1464_v26, 2  ;;  %v1366_v29 = vsel %vm1174_vm3, %v1357_v51, %v1365_v33  ;;  %v10694_v53 = vrot.slane %v1405_v50, 2  ;;  %v8637_v51 = vld [vmem:[%s11589_s2 + $0x738] sm:$0xff]  }
 0x14e   : > { %v7204_v62 = vadd.f32 %v7203_v22, %v7202_v48  ;;  %v7205_v20 = vpop.f32.mrb[26].mxu1  ;;  %v7160_v0 = vpop.f32.mrb[27].mxu0  ;;  %7697 = vmatpush3.bf16.msra.mxu0 %v8625_v16  ;;  %v1372_v40 = vsel %vm1174_vm3, %v11616_v13, %v1371_v45  ;;  %v8635_v16 = vld [vmem:[%s11589_s2 + $0x778] sm:$0xff]   ;;  %v1416_v33 = vshll.u32 %v10341_v14, 16  ;;  %v1415_v14 = vrot.slane %v1413_v10, 2 }
 0x14f   : > { %v4211_v27 = vadd.f32 %v7158_v1, %v10391_v46  ;;  %v7161_v57 = vadd.f32 %v7160_v0, %v7159_v2  ;;  %v7206_v63 = vpop.f32.mrb[27].mxu1  ;;  %7743 = vmatpush3.bf16.msra.mxu1 %v8626_v18  ;;  %7698 = vmatprep.subr.bf16.mxu0 %v8631_v7  ;;  %v8636_v45 = vld [vmem:[%s11589_s2 + $0x7f8] sm:$0xff]   ;;  %v11617_v46 = vrot.slane %v10567_v8, 2  ;;  %v10702_v7 = vrot.slane %v1408_v44, 3 }
 0x150   : > { %v7207_v48 = vadd.f32 %v7206_v63, %v7205_v20  ;;  %4955 = vmatmul.mubr.bf16.gmra.mrb[132].mxu0 %v1358_v36  ;;  %7744 = vmatprep.subr.bf16.mxu1 %v8632_v9  ;;  %v8638_v36 = vld [vmem:[%s11589_s2 + $0x7b8] sm:$0xff]   ;;  %v1462_v9 = vor.u32 %v10671_v31, %v10669_v3  ;;  %v10714_v23 = vor.u32 %v1469_v19, %v1466_v6  ;;  %v1442_v1 = vshll.u32 %v10399_v42, 16 }
 0x151   : > { %v1370_v18 = vsel %vm1174_vm3, %v11617_v46, %v1369_v12  ;;  %v10705_v15 = vadd.f32 %v7204_v62, %v4211_v27  ;;  %v4214_v26 = vadd.f32 %v7161_v57, %v10401_v61  ;;  %5028 = vmatmul.mubr.bf16.gmra.mrb[132].mxu1 %v1362_v5  ;;  %4962 = vmatprep.mubr.bf16.mxu0 %v1368_v35  ;;  %v1439_v12 = vshrl.u32 %v10399_v42, 16  ;;  %v8639_v5 = vld [vmem:[%s11589_s2 + $0x840] sm:$0xff]  }
 0x152   : > { %5035 = vmatprep.mubr.bf16.mxu1 %v1372_v40  ;;  %7699 = vmatpush3.bf16.msra.mxu0 %v8633_v52  ;;  %v1447_v61 = vshrl.u32 %v10388_v49, 16  ;;  %v1418_v3 = vrot.slane %v1416_v33, 3  ;;  %v1450_v31 = vshll.u32 %v10388_v49, 16  ;;  %v1482_v52 = vshrl.u32 %v10419_v25, 16 }
 0x153   : > { %v10721_v35 = vadd.f32 %v7207_v48, %v4214_v26  ;;  %v7162_v22 = vpop.f32.mrb[28].mxu0  ;;  %7745 = vmatpush3.bf16.msra.mxu1 %v8634_v11  ;;  %7700 = vmatprep.subr.bf16.mxu0 %v8635_v16  ;;  %v1411_v42 = vor.u32 %v10702_v7, %v10694_v53  ;;  %v10727_v44 = vrot.slane %v1439_v12, 2  ;;  %v10729_v10 = vrot.slane %v1442_v1, 3  ;;  %v8641_v11 = vld [vmem:[%s11589_s2 + $0x8c0] sm:$0xff]  }
 0x154   : > { %v7208_v2 = vpop.f32.mrb[28].mxu1  ;;  %v7163_v50 = vpop.f32.mrb[29].mxu0  ;;  %7746 = vmatprep.subr.bf16.mxu1 %v8636_v45  ;;  %v1485_v62 = vshll.u32 %v10419_v25, 16  ;;  %v1449_v13 = vrot.slane %v1447_v61, 2  ;;  %v1452_v40 = vrot.slane %v1450_v31, 3  ;;  %v1500_v6 = vshrl.u32 %v10431_v43, 16 }
 0x155   : > { %v7164_v20 = vadd.f32 %v7163_v50, %v7162_v22  ;;  %v7209_v49 = vpop.f32.mrb[29].mxu1  ;;  %v7165_v0 = vpop.f32.mrb[30].mxu0  ;;  %v1471_v63 = vsel %vm1403_vm4, %v1462_v9, %v10714_v23  ;;  %v1484_v16 = vrot.slane %v1482_v52, 2  ;;  %v10739_v46 = vor.u32 %v1418_v3, %v1415_v14 }
 0x156   : > { %v7210_v19 = vadd.f32 %v7209_v49, %v7208_v2  ;;  %v7211_v27 = vpop.f32.mrb[30].mxu1  ;;  %v7166_v57 = vpop.f32.mrb[31].mxu0  ;;  %7701 = vmatpush3.bf16.msra.mxu0 %v8637_v51  ;;  %v1487_v45 = vrot.slane %v1485_v62, 3  ;;  %v1502_v7 = vrot.slane %v1500_v6, 2  ;;  %v1445_v26 = vor.u32 %v10729_v10, %v10727_v44 }
 0x157   : > { %v4219_v53 = vadd.f32 %v7164_v20, %v10436_v55  ;;  %v7167_v48 = vadd.f32 %v7166_v57, %v7165_v0  ;;  %v7212_v25 = vpop.f32.mrb[31].mxu1  ;;  %7747 = vmatpush3.bf16.msra.mxu1 %v8638_v36  ;;  %7778 = vmatprep.subr.bf16.mxu0 %v8639_v5  ;;  %v1503_v51 = vshll.u32 %v10431_v43, 16  ;;  %v1473_v9 = vshrl.u32 %v10443_v4, 16  ;;  %v8642_v20 = vld [vmem:[%s11589_s2 + $0x880] sm:$0xff]  }
 0x158   : > { %v7213_v33 = vadd.f32 %v7212_v25, %v7211_v27  ;;  %4963 = vmatmul.mubr.bf16.gmra.mrb[136].mxu0 %v1366_v29  ;;  %7824 = vmatprep.subr.bf16.mxu1 %v8641_v11  ;;  %v10749_v36 = vor.u32 %v1452_v40, %v1449_v13  ;;  %v1476_v14 = vshll.u32 %v10443_v4, 16  ;;  %v10752_v29 = vor.u32 %v1487_v45, %v1484_v16  ;;  %v8643_v45 = vld [vmem:[%s11589_s2 + $0x848] sm:$0xff]  }
 0x159   : > { %v10745_v12 = vadd.f32 %v7210_v19, %v4219_v53  ;;  %v4222_v55 = vadd.f32 %v7167_v48, %v10451_v41  ;;  %5036 = vmatmul.mubr.bf16.gmra.mrb[136].mxu1 %v1370_v18  ;;  %5076 = vmatprep.mubr.bf16.mxu0 %v10664_v28  ;;  %v1505_v1 = vrot.slane %v1503_v51, 3  ;;  %v1475_v61 = vrot.slane %v1473_v9, 2  ;;  %v8640_v41 = vld [vmem:[%s11589_s2 + $0x800] sm:$0xff]  }
 0x15a   : > { %5149 = vmatprep.mubr.bf16.mxu1 %v1471_v63  ;;  %v1491_v43 = vshrl.u32 %v10446_v21, 16  ;;  %v1478_v18 = vrot.slane %v1476_v14, 3  ;;  %v1494_v28 = vshll.u32 %v10446_v21, 16  ;;  %v1518_v3 = vshrl.u32 %v10449_v38, 16 }
 0x15b   : > { %v10755_v5 = vadd.f32 %v7213_v33, %v4222_v55  ;;  %v7168_v22 = vpop.f32.mrb[32].mxu0  ;;  %v10762_v52 = vor.u32 %v1505_v1, %v1502_v7  ;;  %v1521_v50 = vshll.u32 %v10449_v38, 16  ;;  %v1420_v62 = vsel %vm1403_vm4, %v1411_v42, %v10739_v46 }
 0x15c   : > { %v7214_v4 = vpop.f32.mrb[32].mxu1  ;;  %v7169_v31 = vpop.f32.mrb[33].mxu0  ;;  %v1493_v2 = vrot.slane %v1491_v43, 2  ;;  %v1496_v21 = vrot.slane %v1494_v28, 3  ;;  %v1520_v49 = vrot.slane %v1518_v3, 2  ;;  %v1454_v6 = vsel %vm1403_vm4, %v1445_v26, %v10749_v36  ;;  %v8644_v26 = vld [vmem:[%s11589_s2 + $0x808] sm:$0xff]  }
 0x15d   : > { %v7170_v44 = vadd.f32 %v7169_v31, %v7168_v22  ;;  %v7215_v10 = vpop.f32.mrb[33].mxu1  ;;  %v7171_v11 = vpop.f32.mrb[34].mxu0  ;;  %v1523_v19 = vrot.slane %v1521_v50, 3  ;;  %v1536_v38 = vshrl.u32 %v10458_v30, 16  ;;  %v1489_v42 = vsel %vm1403_vm4, %v10629_v59, %v10752_v29  ;;  %v8646_v43 = vld [vmem:[%s11589_s2 + $0x888] sm:$0xff]   ;;  %v8648_v3 = vld [vmem:[%s11589_s2 + $0x810] sm:$0xff]  }
 0x15e   : > { %v7216_v0 = vadd.f32 %v7215_v10, %v7214_v4  ;;  %v7217_v13 = vpop.f32.mrb[34].mxu1  ;;  %v7172_v40 = vpop.f32.mrb[35].mxu0  ;;  %v1507_v16 = vsel %vm1403_vm4, %v10714_v23, %v10762_v52  ;;  %v10783_v48 = vor.u32 %v1478_v18, %v1475_v61  ;;  %v1539_v7 = vshll.u32 %v10458_v30, 16  ;;  %v8647_v30 = vld [vmem:[%s11589_s2 + $0x850] sm:$0xff]  }
 0x15f   : > { %v4227_v27 = vadd.f32 %v7170_v44, %v10500_v58  ;;  %v7173_v57 = vadd.f32 %v7172_v40, %v7171_v11  ;;  %v7218_v63 = vpop.f32.mrb[35].mxu1  ;;  %v8645_v58 = vld [vmem:[%s11589_s2 + $0x8c8] sm:$0xff]   ;;  %v1538_v25 = vrot.slane %v1536_v38, 2  ;;  %v10792_v23 = vor.u32 %v1496_v21, %v1493_v2 }
 0x160   : > { %v7219_v53 = vadd.f32 %v7218_v63, %v7217_v13  ;;  %5077 = vmatmul.mubr.bf16.vlgmr.msra.gmra.mrb[140].mxu0 %v1420_v62  ;;  %v1509_v51 = vshrl.u32 %v10461_v24, 16  ;;  %v10801_v9 = vor.u32 %v1523_v19, %v1520_v49  ;;  %v1541_v55 = vrot.slane %v1539_v7, 3  ;;  %v8650_v62 = vld [vmem:[%s11589_s2 + $0x890] sm:$0xff]  }
 0x161   : > { %v10789_v59 = vadd.f32 %v7216_v0, %v4227_v27  ;;  %v4230_v33 = vadd.f32 %v7173_v57, %v10517_v60  ;;  %5150 = vmatmul.mubr.bf16.vlgmr.msra.gmra.mrb[140].mxu1 %v1454_v6  ;;  %7779 = vmatpush3.bf16.msra.mxu0 %v8640_v41  ;;  %v1512_v60 = vshll.u32 %v10461_v24, 16  ;;  %v1527_v14 = vshrl.u32 %v10489_v32, 16  ;;  %v8649_v41 = vld [vmem:[%s11589_s2 + $0x8d0] sm:$0xff]  }
 0x162   : > { %5084 = vmatprep.mubr.bf16.mxu0 %v1489_v42  ;;  %5157 = vmatprep.mubr.bf16.mxu1 %v1507_v16  ;;  %v1530_v22 = vshll.u32 %v10489_v32, 16  ;;  %v10814_v24 = vor.u32 %v1541_v55, %v1538_v25  ;;  %v1511_v4 = vrot.slane %v1509_v51, 2  ;;  %v1480_v32 = vsel %vm1403_vm4, %v10739_v46, %v10783_v48 }
 0x163   : > { %v10805_v1 = vadd.f32 %v7219_v53, %v4230_v33  ;;  %v7174_v61 = vpop.f32.mrb[36].mxu0  ;;  %7825 = vmatpush3.bf16.msra.mxu1 %v8642_v20  ;;  %7780 = vmatprep.subr.bf16.mxu0 %v8643_v45  ;;  %v1514_v31 = vrot.slane %v1512_v60, 3  ;;  %v1529_v10 = vrot.slane %v1527_v14, 2  ;;  %v8651_v20 = vld [vmem:[%s11589_s2 + $0x858] sm:$0xff]   ;;  %v1498_v13 = vsel %vm1403_vm4, %v10749_v36, %v10792_v23 }
 0x164   : > { %v7220_v18 = vpop.f32.mrb[36].mxu1  ;;  %v7175_v28 = vpop.f32.mrb[37].mxu0  ;;  %7826 = vmatprep.subr.bf16.mxu1 %v8645_v58  ;;  %v1532_v11 = vrot.slane %v1530_v22, 3  ;;  %v1525_v46 = vsel %vm1403_vm4, %v10752_v29, %v10801_v9  ;;  %v1543_v38 = vsel %vm1403_vm4, %v10762_v52, %v10814_v24  ;;  %v1554_v27 = vshrl.u32 %v10515_v39, 16  ;;  %v8652_v36 = vld [vmem:[%s11589_s2 + $0x818] sm:$0xff]  }
 0x165   : > { %v7176_v2 = vadd.f32 %v7175_v28, %v7174_v61  ;;  %v7221_v50 = vpop.f32.mrb[37].mxu1  ;;  %v7177_v44 = vpop.f32.mrb[38].mxu0  ;;  %7781 = vmatpush3.bf16.msra.mxu0 %v8644_v26  ;;  %v10839_v63 = vor.u32 %v1514_v31, %v1511_v4  ;;  %v1557_v29 = vshll.u32 %v10515_v39, 16  ;;  %v1572_v42 = vshrl.u32 %v10521_v37, 16  ;;  %v8654_v53 = vld [vmem:[%s11589_s2 + $0x898] sm:$0xff]  }
 0x166   : > { %v7222_v21 = vadd.f32 %v7221_v50, %v7220_v18  ;;  %v7223_v49 = vpop.f32.mrb[38].mxu1  ;;  %v7178_v0 = vpop.f32.mrb[39].mxu0  ;;  %7782 = vmatprep.subr.bf16.mxu0 %v8647_v30  ;;  %v10852_v45 = vor.u32 %v1532_v11, %v1529_v10  ;;  %v1556_v58 = vrot.slane %v1554_v27, 2  ;;  %v1575_v39 = vshll.u32 %v10521_v37, 16  ;;  %v8656_v18 = vld [vmem:[%s11589_s2 + $0x8e0] sm:$0xff]  }
 0x167   : > { %v4235_v40 = vadd.f32 %v7176_v2, %v10572_v56  ;;  %v7179_v6 = vadd.f32 %v7178_v0, %v7177_v44  ;;  %v7224_v19 = vpop.f32.mrb[39].mxu1  ;;  %7827 = vmatpush3.bf16.msra.mxu1 %v8646_v43  ;;  %v8653_v56 = vld [vmem:[%s11589_s2 + $0x8d8] sm:$0xff]   ;;  %v1559_v25 = vrot.slane %v1557_v29, 3  ;;  %v1574_v7 = vrot.slane %v1572_v42, 2  ;;  %v8657_v2 = vld [vmem:[%s11589_s2 + $0x820] sm:$0xff]  }
 0x168   : > { %v7225_v57 = vadd.f32 %v7224_v19, %v7223_v49  ;;  %5085 = vmatmul.mubr.bf16.gmra.mrb[144].mxu0 %v1480_v32  ;;  %7828 = vmatprep.subr.bf16.mxu1 %v8649_v41  ;;  %v1545_v33 = vshrl.u32 %v10527_v54, 16  ;;  %v1548_v30 = vshll.u32 %v10527_v54, 16  ;;  %v1563_v55 = vshrl.u32 %v10567_v8, 16  ;;  %v10914_v27 = vld [vmem:[%s9009_s30 + $0x4c] ss:$16 sps:$4 sm:$0xff]  }
 0x169   : > { %v10849_v52 = vadd.f32 %v7222_v21, %v4235_v40  ;;  %v4238_v16 = vadd.f32 %v7179_v6, %v10588_v34  ;;  %5158 = vmatmul.mubr.bf16.gmra.mrb[144].mxu1 %v1498_v13  ;;  %5092 = vmatprep.mubr.bf16.mxu0 %v1525_v46  ;;  %v8655_v34 = vld [vmem:[%s11589_s2 + $0x860] sm:$0xff]   ;;  %v1566_v60 = vshll.u32 %v10567_v8, 16  ;;  %v1516_v37 = vsel %vm1403_vm4, %v10783_v48, %v10839_v63 }
 0x16a   : > { %5165 = vmatprep.mubr.bf16.mxu1 %v1543_v38  ;;  %7783 = vmatpush3.bf16.msra.mxu0 %v8648_v3  ;;  %v10870_v43 = vor.u32 %v1559_v25, %v1556_v58  ;;  %v1577_v22 = vrot.slane %v1575_v39, 3  ;;  %v1547_v41 = vrot.slane %v1545_v33, 2  ;;  %v1550_v4 = vrot.slane %v1548_v30, 3  ;;  %v8658_v48 = vld [vmem:[%s11589_s2 + $0x8a0] sm:$0xff]   ;;  %v430_v25 = vld [vmem:[%s9009_s30 + $0xc8] sm:$0x77] }
 0x16b   : > { %v10862_v26 = vadd.f32 %v7225_v57, %v4238_v16  ;;  %v7242_v51 = vpop.f32.mrb[40].mxu0  ;;  %7829 = vmatpush3.bf16.msra.mxu1 %v8650_v62  ;;  %7784 = vmatprep.subr.bf16.mxu0 %v8651_v20  ;;  %v1565_v8 = vrot.slane %v1563_v55, 2  ;;  %v1568_v31 = vrot.slane %v1566_v60, 3  ;;  %v1534_v10 = vsel %vm1403_vm4, %v10792_v23, %v10852_v45  ;;  %v8659_v23 = vld [vmem:[%s11589_s2 + $0x868] sm:$0xff]   ;;  %v10904_v40 = vld [vmem:[%s9009_s30 + $0x44] ss:$16 sps:$4 sm:$0xff]  }
 0x16c   : > { %v7288_v14 = vpop.f32.mrb[40].mxu1  ;;  %v7243_v61 = vpop.f32.mrb[41].mxu0  ;;  %7830 = vmatprep.subr.bf16.mxu1 %v8653_v56  ;;  %v1561_v11 = vsel %vm1403_vm4, %v10801_v9, %v10870_v43  ;;  %v10887_v62 = vor.u32 %v1577_v22, %v1574_v7  ;;  %v10890_v0 = vor.u32 %v1550_v4, %v1547_v41  ;;  %v1651_v6 = vrot.slane %v10904_v40, 3  ;;  %v429_v56 = vld [vmem:[%s9009_s30 + $0xc0] sm:$0x77]  ;;  %v8668_v41 = vld [vmem:[%s11589_s2 + $0x8f0] sm:$0xff]  }
 0x16d   : > { %v7244_v54 = vadd.f32 %v7243_v61, %v7242_v51  ;;  %v7289_v28 = vpop.f32.mrb[41].mxu1  ;;  %v7245_v3 = vpop.f32.mrb[42].mxu0  ;;  %v10898_v46 = vor.u32 %v1568_v31, %v1565_v8  ;;  %v1657_v57 = vrot.slane %v10914_v27, 3  ;;  %v10925_v29 = vld [vmem:[%s9009_s30 + $0x40] ss:$16 sps:$4 sm:$0xff]   ;;  %v10930_v58 = vcombine.high %v429_v56, %v429_v56 }
 0x16e   : > { %v7290_v50 = vadd.f32 %v7289_v28, %v7288_v14  ;;  %v7291_v44 = vpop.f32.mrb[42].mxu1  ;;  %v7246_v32 = vpop.f32.mrb[43].mxu0  ;;  %7785 = vmatpush3.bf16.msra.mxu0 %v8652_v36  ;;  %v1579_v9 = vsel %vm1403_vm4, %v10814_v24, %v10887_v62  ;;  %v8661_v24 = vld [vmem:[%s11589_s2 + $0x828] sm:$0xff]   ;;  %v1552_v36 = vsel %vm1403_vm4, %v10839_v63, %v10890_v0  ;;  %v1648_v42 = vrot.slane %v10925_v29, 3  ;;  %v8667_v63 = vld [vmem:[%s11589_s2 + $0x870] sm:$0xff]  }
 0x16f   : > { %v4349_v20 = vadd.f32 %v7244_v54, %v10634_v17  ;;  %v7247_v21 = vadd.f32 %v7246_v32, %v7245_v3  ;;  %v7292_v49 = vpop.f32.mrb[43].mxu1  ;;  %7831 = vmatpush3.bf16.msra.mxu1 %v8654_v53  ;;  %7786 = vmatprep.subr.bf16.mxu0 %v8655_v34  ;;  %v8660_v17 = vld [vmem:[%s11589_s2 + $0x8e8] sm:$0xff]   ;;  %v10933_v7 = vcombine.low %v429_v56, %v429_v56  ;;  %v1590_v61 = vshrl.u32 %v10930_v58, 16  ;;  %v8669_v8 = vld [vmem:[%s11589_s2 + $0x830] sm:$0xff]  }
 0x170   : > { %v7293_v13 = vadd.f32 %v7292_v49, %v7291_v44  ;;  %5093 = vmatmul.mubr.bf16.gmra.mrb[148].mxu0 %v1516_v37  ;;  %7832 = vmatprep.subr.bf16.mxu1 %v8656_v18  ;;  %v1570_v34 = vsel %vm1403_vm4, %v10852_v45, %v10898_v46  ;;  %v10941_v51 = vcombine.high %v430_v25, %v430_v25  ;;  %v1593_v37 = vshll.u32 %v10930_v58, 16  ;;  %v8670_v32 = vld [vmem:[%s11589_s2 + $0x8b0] sm:$0xff]  }
 0x171   : > { %v10907_v19 = vadd.f32 %v7290_v50, %v4349_v20  ;;  %v4352_v38 = vadd.f32 %v7247_v21, %v10657_v47  ;;  %5166 = vmatmul.mubr.bf16.gmra.mrb[148].mxu1 %v1534_v10  ;;  %5100 = vmatprep.mubr.bf16.mxu0 %v1561_v11  ;;  %v8662_v47 = vld [vmem:[%s11589_s2 + $0x8a8] sm:$0xff]   ;;  %v10943_v30 = vcombine.low %v430_v25, %v430_v25  ;;  %v1581_v22 = vshrl.u32 %v10933_v7, 16  ;;  %v8673_v25 = vld [vmem:[%s11589_s2 + $0x838] sm:$0xff]   ;;  %v8693_v40 = vld [vmem:[%s9009_s30 + $0x60] ss:$16 sps:$4 sm:$0xff]  }
 0x172   : > { %5173 = vmatprep.mubr.bf16.mxu1 %v1579_v9  ;;  %7787 = vmatpush3.bf16.msra.mxu0 %v8657_v2  ;;  %v1608_v28 = vshrl.u32 %v10941_v51, 16  ;;  %v1611_v3 = vshll.u32 %v10941_v51, 16  ;;  %v1584_v4 = vshll.u32 %v10933_v7, 16  ;;  %v1592_v50 = vrot.slane %v1590_v61, 2 }
 0x173   : > { %v10928_v16 = vadd.f32 %v7293_v13, %v4352_v38  ;;  %v7248_v53 = vpop.f32.mrb[44].mxu0  ;;  %7833 = vmatpush3.bf16.msra.mxu1 %v8658_v48  ;;  %7788 = vmatprep.subr.bf16.mxu0 %v8659_v23  ;;  %v1595_v44 = vrot.slane %v1593_v37, 3  ;;  %v1583_v21 = vrot.slane %v1581_v22, 2 }
 0x174   : > { %v7294_v39 = vpop.f32.mrb[44].mxu1  ;;  %v7249_v33 = vpop.f32.mrb[45].mxu0  ;;  %7834 = vmatprep.subr.bf16.mxu1 %v8660_v17  ;;  %v1610_v11 = vrot.slane %v1608_v28, 2  ;;  %v1613_v20 = vrot.slane %v1611_v3, 3  ;;  %v1586_v9 = vrot.slane %v1584_v4, 3  ;;  %v8672_v17 = vld [vmem:[%s11589_s2 + $0x8f8] sm:$0xff]  }
 0x175   : > { %v7250_v55 = vadd.f32 %v7249_v33, %v7248_v53  ;;  %v7295_v60 = vpop.f32.mrb[45].mxu1  ;;  %v7251_v14 = vpop.f32.mrb[46].mxu0  ;;  %v1596_v13 = vor.u32 %v1595_v44, %v1592_v50  ;;  %v8674_v28 = vld [vmem:[%s11589_s2 + $0x8b8] sm:$0xff]   ;;  %v431_v3 = vld [vmem:[%s9009_s30 + $0x20] sm:$0x88] }
 0x176   : > { %v7296_v45 = vadd.f32 %v7295_v60, %v7294_v39  ;;  %v7297_v18 = vpop.f32.mrb[46].mxu1  ;;  %v7252_v54 = vpop.f32.mrb[47].mxu0  ;;  %7789 = vmatpush3.bf16.msra.mxu0 %v8661_v24  ;;  %v1614_v38 = vor.u32 %v1613_v20, %v1610_v11  ;;  %v1599_v24 = vshrl.u32 %v10943_v30, 16  ;;  %v1587_v53 = vor.u32 %v1586_v9, %v1583_v21  ;;  %v432_v4 = vld [vmem:[%s9009_s30 + $0x28] sm:$0x88]  ;;  %v8689_v44 = vld [vmem:[%s9009_s30 + $0x38] sm:$0xff] }
 0x177   : > { %v4357_v31 = vadd.f32 %v7250_v55, %v10705_v15  ;;  %v7253_v2 = vadd.f32 %v7252_v54, %v7251_v14  ;;  %v7298_v48 = vpop.f32.mrb[47].mxu1  ;;  %7835 = vmatpush3.bf16.msra.mxu1 %v8662_v47  ;;  %7790 = vmatprep.subr.bf16.mxu0 %v8667_v63  ;;  %v8671_v15 = vld [vmem:[%s11589_s2 + $0x878] sm:$0xff]  }
 0x178   : > { %v7299_v10 = vadd.f32 %v7298_v48, %v7297_v18  ;;  %5101 = vmatmul.mubr.bf16.gmra.mrb[152].mxu0 %v1552_v36  ;;  %7836 = vmatprep.subr.bf16.mxu1 %v8668_v41  ;;  %v1602_v36 = vshll.u32 %v10943_v30, 16  ;;  %v1615_v33 = vsel %vm1403_vm4, %v10887_v62, %v1614_v38  ;;  %v1588_v61 = vsel %vm1403_vm4, %v10890_v0, %v1587_v53  ;;  %v8690_v21 = vld [vmem:[%s9009_s30 + $0x48] ss:$16 sps:$4 sm:$0xff]  }
 0x179   : > { %v10964_v49 = vadd.f32 %v7296_v45, %v4357_v31  ;;  %v4360_v23 = vadd.f32 %v7253_v2, %v10721_v35  ;;  %5174 = vmatmul.mubr.bf16.gmra.mrb[152].mxu1 %v1570_v34  ;;  %v1597_v35 = vsel %vm1403_vm4, %v10870_v43, %v1596_v13  ;;  %v1601_v34 = vrot.slane %v1599_v24, 2  ;;  %v8688_v31 = vld [vmem:[%s9009_s30 + $0x30] sm:$0xff]  ;;  %v8692_v24 = vld [vmem:[%s9009_s30 + $0x6c] ss:$16 sps:$4 sm:$0xff]  }
 0x17a   : > { %7791 = vmatpush3.bf16.msra.mxu0 %v8669_v8  ;;  %5108 = vmatprep.mubr.bf16.mxu0 %v1597_v35  ;;  %v1604_v55 = vrot.slane %v1602_v36, 3  ;;  %v6672_v2 = vcombine.low %v431_v3, %v8688_v31  ;;  %v1665_v36 = vrot.slane %v8692_v24, 3  ;;  %v8697_v24 = vld [vmem:[%s9009_s30 + $0x80] ss:$16 sps:$4 sm:$0xff]  }
 0x17b   : > { %v10972_v47 = vadd.f32 %v7299_v10, %v4360_v23  ;;  %v7254_v56 = vpop.f32.mrb[48].mxu0  ;;  %7837 = vmatpush3.bf16.msra.mxu1 %v8670_v32  ;;  %7792 = vmatprep.subr.bf16.mxu0 %v8671_v15  ;;  %v6674_v32 = vcombine.low %v432_v4, %v8689_v44  ;;  %v6675_v10 = vcombine.high %v432_v4, %v8689_v44  ;;  %v1654_v15 = vrot.slane %v8690_v21, 3  ;;  %v8691_v23 = vld [vmem:[%s9009_s30 + $0x64] ss:$16 sps:$4 sm:$0xff]  }
 0x17c   : > { %v7300_v63 = vpop.f32.mrb[48].mxu1  ;;  %v7255_v39 = vpop.f32.mrb[49].mxu0  ;;  %5181 = vmatprep.mubr.bf16.mxu1 %v1615_v33  ;;  %7838 = vmatprep.subr.bf16.mxu1 %v8672_v17  ;;  %v1605_v45 = vor.u32 %v1604_v55, %v1601_v34  ;;  %v1647_v11 = vrot.slane %v6672_v2, 3  ;;  %v1661_v13 = vrot.slane %v8691_v23, 3 }
 0x17d   : > { %v7256_v60 = vadd.f32 %v7255_v39, %v7254_v56  ;;  %v7301_v43 = vpop.f32.mrb[49].mxu1  ;;  %v7257_v14 = vpop.f32.mrb[50].mxu0  ;;  %v1653_v17 = vrot.slane %v6674_v32, 3  ;;  %v1656_v38 = vrot.slane %v6675_v10, 3 }
 0x17e   : > { %v7302_v37 = vadd.f32 %v7301_v43, %v7300_v63  ;;  %v7303_v22 = vpop.f32.mrb[50].mxu1  ;;  %v7258_v41 = vpop.f32.mrb[51].mxu0  ;;  %7793 = vmatpush3.bf16.msra.mxu0 %v8673_v25  ;;  %v1606_v8 = vsel %vm1403_vm4, %v10898_v46, %v1605_v45  ;;  %v1649_v33 = vsel %vm1646_vm5, %v1647_v11, %v1648_v42 }
 0x17f   : > { %v4365_v62 = vadd.f32 %v7256_v60, %v10745_v12  ;;  %v7259_v18 = vadd.f32 %v7258_v41, %v7257_v14  ;;  %v7304_v54 = vpop.f32.mrb[51].mxu1  ;;  %v6673_v12 = vcombine.high %v431_v3, %v8688_v31  ;;  %7839 = vmatpush3.bf16.msra.mxu1 %v8674_v28  ;;  %v1658_v39 = vsel %vm1646_vm5, %v1656_v38, %v1657_v57  ;;  %v8695_v28 = vld [vmem:[%s9009_s30 + $0x84] ss:$16 sps:$4 sm:$0xff]  }
 0x180   : > { %v7305_v0 = vadd.f32 %v7304_v54, %v7303_v22  ;;  %5109 = vmatmul.mubr.bf16.gmra.mrb[156].mxu0 %v1588_v61  ;;  %v1655_v43 = vsel %vm1646_vm5, %v1653_v17, %v1654_v15  ;;  %v1662_v14 = vsel %vm1646_vm5, %v1651_v6, %v1661_v13  ;;  %v1666_v41 = vsel %vm1646_vm5, %v1657_v57, %v1665_v36  ;;  %v8694_v54 = vld [vmem:[%s9009_s30 + $0x68] ss:$16 sps:$4 sm:$0xff]   ;;  %v8696_v57 = vld [vmem:[%s9009_s30 + $0x8c] ss:$16 sps:$4 sm:$0xff]  }
 0x181   : > { %v10992_v48 = vadd.f32 %v7302_v37, %v4365_v62  ;;  %v4368_v50 = vadd.f32 %v7259_v18, %v10755_v5  ;;  %5182 = vmatmul.mubr.bf16.gmra.mrb[156].mxu1 %v1606_v8  ;;  %v1650_v20 = vrot.slane %v6673_v12, 3  ;;  %v1669_v3 = vrot.slane %v8695_v28, 3  ;;  %v8701_v28 = vld [vmem:[%s9009_s30 + $0xa0] ss:$16 sps:$4 sm:$0xff]  }
 0x182   : > { %5295 = vmatprep.mubr.bf16.mxu1 %v1658_v39 }
 0x183   : > { %v10998_v46 = vadd.f32 %v7305_v0, %v4368_v50  ;;  %v7260_v9 = vpop.f32.mrb[52].mxu0  ;;  %v1652_v35 = vsel %vm1646_vm5, %v1650_v20, %v1651_v6  ;;  %v1659_v6 = vrot.slane %v8693_v40, 3  ;;  %v1673_v0 = vrot.slane %v8696_v57, 3 }
 0x184   : > { %v7306_v5 = vpop.f32.mrb[52].mxu1  ;;  %v7261_v56 = vpop.f32.mrb[53].mxu0  ;;  %5222 = vmatprep.mubr.bf16.mxu0 %v1652_v35  ;;  %v1670_v20 = vsel %vm1646_vm5, %v1661_v13, %v1669_v3  ;;  %v8698_v13 = vld [vmem:[%s9009_s30 + $0x88] ss:$16 sps:$4 sm:$0xff]  }
 0x185   : > { %v7262_v53 = vadd.f32 %v7261_v56, %v7260_v9  ;;  %v7307_v25 = vpop.f32.mrb[53].mxu1  ;;  %v7263_v63 = vpop.f32.mrb[54].mxu0  ;;  %v1674_v17 = vsel %vm1646_vm5, %v1665_v36, %v1673_v0  ;;  %v8699_v56 = vld [vmem:[%s9009_s30 + $0xa4] ss:$16 sps:$4 sm:$0xff]   ;;  %v8700_v36 = vld [vmem:[%s9009_s30 + $0xac] ss:$16 sps:$4 sm:$0xff]  }
 0x186   : > { %v7308_v34 = vadd.f32 %v7307_v25, %v7306_v5  ;;  %v7309_v55 = vpop.f32.mrb[54].mxu1  ;;  %v7264_v60 = vpop.f32.mrb[55].mxu0  ;;  %v1671_v5 = vrot.slane %v8698_v13, 3  ;;  %v1681_v25 = vrot.slane %v8700_v36, 3 }
 0x187   : > { %v4373_v61 = vadd.f32 %v7262_v53, %v10789_v59  ;;  %v7265_v37 = vadd.f32 %v7264_v60, %v7263_v63  ;;  %v7310_v22 = vpop.f32.mrb[55].mxu1  ;;  %v1663_v59 = vrot.slane %v8694_v54, 3 }
 0x188   : > { %v7311_v45 = vadd.f32 %v7310_v22, %v7309_v55  ;;  %5223 = vmatmul.mubr.bf16.vlgmr.msra.gmra.mrb[160].mxu0 %v1649_v33 }
 0x189   : > { %v11018_v62 = vadd.f32 %v7308_v34, %v4373_v61  ;;  %v4376_v18 = vadd.f32 %v7265_v37, %v10805_v1  ;;  %5296 = vmatmul.mubr.bf16.vlgmr.msra.gmra.mrb[160].mxu1 %v1655_v43  ;;  %5230 = vmatprep.mubr.bf16.mxu0 %v1662_v14  ;;  %v1660_v1 = vsel %vm1646_vm5, %v1648_v42, %v1659_v6 }
 0x18a   : > { %5303 = vmatprep.mubr.bf16.mxu1 %v1666_v41  ;;  %v1664_v11 = vsel %vm1646_vm5, %v1654_v15, %v1663_v59  ;;  %v1667_v15 = vrot.slane %v8697_v24, 3  ;;  %v1672_v61 = vsel %vm1646_vm5, %v1663_v59, %v1671_v5  ;;  %v8702_v59 = vld [vmem:[%s9009_s30 + $0xa8] ss:$16 sps:$4 sm:$0xff]   ;;  %v1687_v24 = vrot.slane %v10943_v30, 3  ;;  %s5336_s30 = sld [smem:[#allocation2]] }
 0x18b   : > { %v11024_v4 = vadd.f32 %v7311_v45, %v4376_v18  ;;  %v7266_v27 = vpop.f32.mrb[56].mxu0  ;;  %v1682_v18 = vsel %vm1646_vm5, %v1673_v0, %v1681_v25  ;;  %v1679_v57 = vrot.slane %v8702_v59, 3  ;;  %v1689_v0 = vrot.slane %v10941_v51, 3 }
 0x18c   : > { %v7312_v8 = vpop.f32.mrb[56].mxu1  ;;  %v7267_v31 = vpop.f32.mrb[57].mxu0 }
 0x18d   : > { %v7268_v2 = vadd.f32 %v7267_v31, %v7266_v27  ;;  %v7313_v12 = vpop.f32.mrb[57].mxu1  ;;  %v7269_v50 = vpop.f32.mrb[58].mxu0  ;;  %v1675_v27 = vrot.slane %v8701_v28, 3  ;;  %v1690_v51 = vsel %vm1646_vm5, %v1681_v25, %v1689_v0 }
 0x18e   : > { %v7314_v44 = vadd.f32 %v7313_v12, %v7312_v8  ;;  %v7315_v32 = vpop.f32.mrb[58].mxu1  ;;  %v7270_v10 = vpop.f32.mrb[59].mxu0 }
 0x18f   : > { %v4381_v21 = vadd.f32 %v7268_v2, %v10849_v52  ;;  %v7271_v23 = vadd.f32 %v7270_v10, %v7269_v50  ;;  %v7316_v9 = vpop.f32.mrb[59].mxu1  ;;  %v1677_v52 = vrot.slane %v8699_v56, 3 }
 0x190   : > { %v7317_v29 = vadd.f32 %v7316_v9, %v7315_v32  ;;  %5231 = vmatmul.mubr.bf16.gmra.mrb[164].mxu0 %v1660_v1 }
 0x191   : > { %v11034_v42 = vadd.f32 %v7314_v44, %v4381_v21  ;;  %v4384_v38 = vadd.f32 %v7271_v23, %v10862_v26  ;;  %5304 = vmatmul.mubr.bf16.gmra.mrb[164].mxu1 %v1664_v11  ;;  %5238 = vmatprep.mubr.bf16.mxu0 %v1670_v20  ;;  %v1668_v26 = vsel %vm1646_vm5, %v1659_v6, %v1667_v15 }
 0x192   : > { %5311 = vmatprep.mubr.bf16.mxu1 %v1674_v17  ;;  %v1678_v37 = vsel %vm1646_vm5, %v1669_v3, %v1677_v52  ;;  %v1685_v3 = vrot.slane %v10930_v58, 3  ;;  %v1680_v11 = vsel %vm1646_vm5, %v1671_v5, %v1679_v57 }
 0x193   : > { %v11040_v35 = vadd.f32 %v7317_v29, %v4384_v38  ;;  %v7334_v53 = vpop.f32.mrb[60].mxu0  ;;  %v1683_v38 = vrot.slane %v10933_v7, 3 }
 0x194   : > { %v7380_v63 = vpop.f32.mrb[60].mxu1  ;;  %v7335_v39 = vpop.f32.mrb[61].mxu0  ;;  %v1686_v20 = vsel %vm1646_vm5, %v1677_v52, %v1685_v3 }
 0x195   : > { %v7336_v33 = vadd.f32 %v7335_v39, %v7334_v53  ;;  %v7381_v34 = vpop.f32.mrb[61].mxu1  ;;  %v7337_v55 = vpop.f32.mrb[62].mxu0  ;;  %v1684_v36 = vsel %vm1646_vm5, %v1675_v27, %v1683_v38  ;;  %v1688_v39 = vsel %vm1646_vm5, %v1679_v57, %v1687_v24 }
 0x196   : > { %v7382_v60 = vadd.f32 %v7381_v34, %v7380_v63  ;;  %v7383_v43 = vpop.f32.mrb[62].mxu1  ;;  %v7338_v14 = vpop.f32.mrb[63].mxu0 }
 0x197   : > { %v4495_v22 = vadd.f32 %v7336_v33, %v10907_v19  ;;  %v7339_v41 = vadd.f32 %v7338_v14, %v7337_v55  ;;  %v7384_v45 = vpop.f32.mrb[63].mxu1 }
 0x198   : > { %v7385_v40 = vadd.f32 %v7384_v45, %v7383_v43  ;;  %5239 = vmatmul.mubr.bf16.gmra.mrb[168].mxu0 %v1668_v26 }
 0x199   : > { %v11048_v54 = vadd.f32 %v7382_v60, %v4495_v22  ;;  %v4498_v6 = vadd.f32 %v7339_v41, %v10928_v16  ;;  %5312 = vmatmul.mubr.bf16.gmra.mrb[168].mxu1 %v1672_v61  ;;  %5246 = vmatprep.mubr.bf16.mxu0 %v1678_v37  ;;  %v1676_v16 = vsel %vm1646_vm5, %v1667_v15, %v1675_v27 }
 0x19a   : > { %5319 = vmatprep.mubr.bf16.mxu1 %v1682_v18 }
 0x19b   : > { %v11054_v19 = vadd.f32 %v7385_v40, %v4498_v6  ;;  %v7340_v8 = vpop.f32.mrb[64].mxu0 }
 0x19c   : > { %v7386_v31 = vpop.f32.mrb[64].mxu1  ;;  %v7341_v2 = vpop.f32.mrb[65].mxu0 }
 0x19d   : > { %v7342_v12 = vadd.f32 %v7341_v2, %v7340_v8  ;;  %v7387_v50 = vpop.f32.mrb[65].mxu1  ;;  %v7343_v1 = vpop.f32.mrb[66].mxu0 }
 0x19e   : > { %v7388_v44 = vadd.f32 %v7387_v50, %v7386_v31  ;;  %v7389_v32 = vpop.f32.mrb[66].mxu1  ;;  %v7344_v10 = vpop.f32.mrb[67].mxu0 }
 0x19f   : > { %v4503_v58 = vadd.f32 %v7342_v12, %v10964_v49  ;;  %v7345_v21 = vadd.f32 %v7344_v10, %v7343_v1  ;;  %v7390_v23 = vpop.f32.mrb[67].mxu1 }
 0x1a0   : > { %v7391_v9 = vadd.f32 %v7390_v23, %v7389_v32  ;;  %5247 = vmatmul.mubr.bf16.gmra.mrb[172].mxu0 %v1676_v16 }
 0x1a1   : > { %v11062_v17 = vadd.f32 %v7388_v44, %v4503_v58  ;;  %v4506_v29 = vadd.f32 %v7345_v21, %v10972_v47  ;;  %5320 = vmatmul.mubr.bf16.gmra.mrb[172].mxu1 %v1680_v11  ;;  %5254 = vmatprep.mubr.bf16.mxu0 %v1686_v20 }
 0x1a2   : > { %5327 = vmatprep.mubr.bf16.mxu1 %v1690_v51 }
 0x1a3   : > { %v11067_v15 = vadd.f32 %v7391_v9, %v4506_v29  ;;  %v7346_v49 = vpop.f32.mrb[68].mxu0 }
 0x1a4   : > { %v7392_v13 = vpop.f32.mrb[68].mxu1  ;;  %v7347_v5 = vpop.f32.mrb[69].mxu0 }
 0x1a5   : > { %v7348_v56 = vadd.f32 %v7347_v5, %v7346_v49  ;;  %v7393_v52 = vpop.f32.mrb[69].mxu1  ;;  %v7349_v53 = vpop.f32.mrb[70].mxu0 }
 0x1a6   : > { %v7394_v25 = vadd.f32 %v7393_v52, %v7392_v13  ;;  %v7395_v63 = vpop.f32.mrb[70].mxu1  ;;  %v7350_v47 = vpop.f32.mrb[71].mxu0 }
 0x1a7   : > { %v4511_v7 = vadd.f32 %v7348_v56, %v10992_v48  ;;  %v7351_v33 = vadd.f32 %v7350_v47, %v7349_v53  ;;  %v7396_v34 = vpop.f32.mrb[71].mxu1 }
 0x1a8   : > { %v7397_v30 = vadd.f32 %v7396_v34, %v7395_v63  ;;  %5255 = vmatmul.mubr.bf16.gmra.mrb[176].mxu0 %v1684_v36 }
 0x1a9   : > { %v11072_v55 = vadd.f32 %v7394_v25, %v4511_v7  ;;  %v4514_v26 = vadd.f32 %v7351_v33, %v10998_v46  ;;  %5328 = vmatmul.mubr.bf16.gmra.mrb[176].mxu1 %v1688_v39 }
 0x1ab   : > { %v11075_v60 = vadd.f32 %v7397_v30, %v4514_v26  ;;  %v7352_v43 = vpop.f32.mrb[72].mxu0 }
 0x1ac   : > { %v7398_v14 = vpop.f32.mrb[72].mxu1  ;;  %v7353_v61 = vpop.f32.mrb[73].mxu0 }
 0x1ad   : > { %v7354_v37 = vadd.f32 %v7353_v61, %v7352_v43  ;;  %v7399_v22 = vpop.f32.mrb[73].mxu1  ;;  %v7355_v41 = vpop.f32.mrb[74].mxu0 }
 0x1ae   : > { %v7400_v45 = vadd.f32 %v7399_v22, %v7398_v14  ;;  %v7401_v18 = vpop.f32.mrb[74].mxu1  ;;  %v7356_v48 = vpop.f32.mrb[75].mxu0 }
 0x1af   : > { %v4519_v40 = vadd.f32 %v7354_v37, %v11018_v62  ;;  %v7357_v6 = vadd.f32 %v7356_v48, %v7355_v41  ;;  %v7402_v28 = vpop.f32.mrb[75].mxu1 }
 0x1b0   : > { %v7403_v27 = vadd.f32 %v7402_v28, %v7401_v18 }
 0x1b1   : > { %v11078_v59 = vadd.f32 %v7400_v45, %v4519_v40  ;;  %v4522_v46 = vadd.f32 %v7357_v6, %v11024_v4 }
 0x1b3   : > { %v11081_v57 = vadd.f32 %v7403_v27, %v4522_v46  ;;  %v7358_v3 = vpop.f32.mrb[76].mxu0 }
 0x1b4   : > { %v7404_v8 = vpop.f32.mrb[76].mxu1  ;;  %v7359_v0 = vpop.f32.mrb[77].mxu0 }
 0x1b5   : > { %v7360_v31 = vadd.f32 %v7359_v0, %v7358_v3  ;;  %v7405_v2 = vpop.f32.mrb[77].mxu1  ;;  %v7361_v12 = vpop.f32.mrb[78].mxu0 }
 0x1b6   : > { %v7406_v50 = vadd.f32 %v7405_v2, %v7404_v8  ;;  %v7407_v1 = vpop.f32.mrb[78].mxu1  ;;  %v7362_v16 = vpop.f32.mrb[79].mxu0 }
 0x1b7   : > { %v4527_v62 = vadd.f32 %v7360_v31, %v11034_v42  ;;  %v7363_v44 = vadd.f32 %v7362_v16, %v7361_v12  ;;  %v7408_v32 = vpop.f32.mrb[79].mxu1 }
 0x1b8   : > { %v7409_v10 = vadd.f32 %v7408_v32, %v7407_v1 }
 0x1b9   : > { %v11084_v11 = vadd.f32 %v7406_v50, %v4527_v62  ;;  %v4530_v4 = vadd.f32 %v7363_v44, %v11040_v35 }
 0x1bb   : > { %v11087_v20 = vadd.f32 %v7409_v10, %v4530_v4  ;;  %v7426_v58 = vpop.f32.mrb[80].mxu0 }
 0x1bc   : > { %v7472_v21 = vpop.f32.mrb[80].mxu1  ;;  %v7427_v23 = vpop.f32.mrb[81].mxu0 }
 0x1bd   : > { %v7428_v51 = vadd.f32 %v7427_v23, %v7426_v58  ;;  %v7473_v9 = vpop.f32.mrb[81].mxu1  ;;  %v7429_v29 = vpop.f32.mrb[82].mxu0 }
 0x1be   : > { %v7474_v38 = vadd.f32 %v7473_v9, %v7472_v21  ;;  %v7475_v24 = vpop.f32.mrb[82].mxu1  ;;  %v7430_v49 = vpop.f32.mrb[83].mxu0 }
 0x1bf   : > { %v4641_v42 = vadd.f32 %v7428_v51, %v11048_v54  ;;  %v7431_v13 = vadd.f32 %v7430_v49, %v7429_v29  ;;  %v7476_v5 = vpop.f32.mrb[83].mxu1 }
 0x1c0   : > { %v7477_v56 = vadd.f32 %v7476_v5, %v7475_v24 }
 0x1c1   : > { %v11090_v52 = vadd.f32 %v7474_v38, %v4641_v42  ;;  %v4644_v35 = vadd.f32 %v7431_v13, %v11054_v19 }
 0x1c3   : > { %v11093_v53 = vadd.f32 %v7477_v56, %v4644_v35  ;;  %v7432_v36 = vpop.f32.mrb[84].mxu0 }
 0x1c4   : > { %v7478_v25 = vpop.f32.mrb[84].mxu1  ;;  %v7433_v63 = vpop.f32.mrb[85].mxu0 }
 0x1c5   : > { %v7434_v47 = vadd.f32 %v7433_v63, %v7432_v36  ;;  %v7479_v39 = vpop.f32.mrb[85].mxu1  ;;  %v7435_v7 = vpop.f32.mrb[86].mxu0 }
 0x1c6   : > { %v7480_v33 = vadd.f32 %v7479_v39, %v7478_v25  ;;  %v7481_v34 = vpop.f32.mrb[86].mxu1  ;;  %v7436_v30 = vpop.f32.mrb[87].mxu0 }
 0x1c7   : > { %v4649_v54 = vadd.f32 %v7434_v47, %v11062_v17  ;;  %v7437_v26 = vadd.f32 %v7436_v30, %v7435_v7  ;;  %v7482_v43 = vpop.f32.mrb[87].mxu1 }
 0x1c8   : > { %v7483_v14 = vadd.f32 %v7482_v43, %v7481_v34 }
 0x1c9   : > { %v11096_v61 = vadd.f32 %v7480_v33, %v4649_v54  ;;  %v4652_v19 = vadd.f32 %v7437_v26, %v11067_v15 }
 0x1cb   : > { %v11099_v37 = vadd.f32 %v7483_v14, %v4652_v19  ;;  %v7438_v22 = vpop.f32.mrb[88].mxu0 }
 0x1cc   : > { %v7484_v41 = vpop.f32.mrb[88].mxu1  ;;  %v7439_v45 = vpop.f32.mrb[89].mxu0 }
 0x1cd   : > { %v7440_v18 = vadd.f32 %v7439_v45, %v7438_v22  ;;  %v7485_v48 = vpop.f32.mrb[89].mxu1  ;;  %v7441_v40 = vpop.f32.mrb[90].mxu0 }
 0x1ce   : > { %v7486_v6 = vadd.f32 %v7485_v48, %v7484_v41  ;;  %v7487_v28 = vpop.f32.mrb[90].mxu1  ;;  %v7442_v27 = vpop.f32.mrb[91].mxu0 }
 0x1cf   : > { %v4657_v17 = vadd.f32 %v7440_v18, %v11072_v55  ;;  %v7443_v46 = vadd.f32 %v7442_v27, %v7441_v40  ;;  %v7488_v3 = vpop.f32.mrb[91].mxu1  ;;  %v8787_v18 = vmov 0.0|0.0  }
 0x1d0   : > { %v7489_v8 = vadd.f32 %v7488_v3, %v7487_v28  ;;  %8150 = vmatprep.subr.bf16.mxu0 %v8787_v18  ;;  %8171 = vmatprep.subr.bf16.mxu1 %v8787_v18 }
 0x1d1   : > { %v11102_v0 = vadd.f32 %v7486_v6, %v4657_v17  ;;  %v4660_v15 = vadd.f32 %v7443_v46, %v11075_v60 }
 0x1d3   : > { %v11105_v31 = vadd.f32 %v7489_v8, %v4660_v15  ;;  %v7444_v2 = vpop.f32.mrb[92].mxu0 }
 0x1d4   : > { %v7490_v12 = vpop.f32.mrb[92].mxu1  ;;  %v7445_v50 = vpop.f32.mrb[93].mxu0 }
 0x1d5   : > { %v7446_v1 = vadd.f32 %v7445_v50, %v7444_v2  ;;  %v7491_v16 = vpop.f32.mrb[93].mxu1  ;;  %v7447_v62 = vpop.f32.mrb[94].mxu0 }
 0x1d6   : > { %v7492_v44 = vadd.f32 %v7491_v16, %v7490_v12  ;;  %v7493_v32 = vpop.f32.mrb[94].mxu1  ;;  %v7448_v10 = vpop.f32.mrb[95].mxu0 }
 0x1d7   : > { %v4665_v55 = vadd.f32 %v7446_v1, %v11078_v59  ;;  %v7449_v4 = vadd.f32 %v7448_v10, %v7447_v62  ;;  %v7494_v58 = vpop.f32.mrb[95].mxu1 }
 0x1d8   : > { %v7495_v21 = vadd.f32 %v7494_v58, %v7493_v32 }
 0x1d9   : > { %v11108_v23 = vadd.f32 %v7492_v44, %v4665_v55  ;;  %v4668_v60 = vadd.f32 %v7449_v4, %v11081_v57 }
 0x1db   : > { %v11111_v51 = vadd.f32 %v7495_v21, %v4668_v60  ;;  %v7450_v9 = vpop.f32.mrb[96].mxu0 }
 0x1dc   : > { %v7496_v29 = vpop.f32.mrb[96].mxu1  ;;  %v7451_v38 = vpop.f32.mrb[97].mxu0 }
 0x1dd   : > { %v7452_v24 = vadd.f32 %v7451_v38, %v7450_v9  ;;  %v7497_v49 = vpop.f32.mrb[97].mxu1  ;;  %v7453_v42 = vpop.f32.mrb[98].mxu0 }
 0x1de   : > { %v7498_v13 = vadd.f32 %v7497_v49, %v7496_v29  ;;  %v7499_v5 = vpop.f32.mrb[98].mxu1  ;;  %v7454_v56 = vpop.f32.mrb[99].mxu0 }
 0x1df   : > { %v4673_v59 = vadd.f32 %v7452_v24, %v11084_v11  ;;  %v7455_v35 = vadd.f32 %v7454_v56, %v7453_v42  ;;  %v7500_v36 = vpop.f32.mrb[99].mxu1 }
 0x1e0   : > { %v7501_v25 = vadd.f32 %v7500_v36, %v7499_v5 }
 0x1e1   : > { %v11114_v63 = vadd.f32 %v7498_v13, %v4673_v59  ;;  %v4676_v57 = vadd.f32 %v7455_v35, %v11087_v20 }
 0x1e3   : > { %v11117_v47 = vadd.f32 %v7501_v25, %v4676_v57  ;;  %v7518_v39 = vpop.f32.mrb[100].mxu0 }
 0x1e4   : > { %v7564_v7 = vpop.f32.mrb[100].mxu1  ;;  %v7519_v33 = vpop.f32.mrb[101].mxu0 }
 0x1e5   : > { %v7520_v34 = vadd.f32 %v7519_v33, %v7518_v39  ;;  %v7565_v30 = vpop.f32.mrb[101].mxu1  ;;  %v7521_v54 = vpop.f32.mrb[102].mxu0 }
 0x1e6   : > { %v7566_v26 = vadd.f32 %v7565_v30, %v7564_v7  ;;  %v7567_v43 = vpop.f32.mrb[102].mxu1  ;;  %v7522_v14 = vpop.f32.mrb[103].mxu0 }
 0x1e7   : > { %v4787_v11 = vadd.f32 %v7520_v34, %v11090_v52  ;;  %v7523_v19 = vadd.f32 %v7522_v14, %v7521_v54  ;;  %v7568_v22 = vpop.f32.mrb[103].mxu1 }
 0x1e8   : > { %v7569_v41 = vadd.f32 %v7568_v22, %v7567_v43 }
 0x1e9   : > { %v11120_v45 = vadd.f32 %v7566_v26, %v4787_v11  ;;  %v4790_v20 = vadd.f32 %v7523_v19, %v11093_v53 }
 0x1eb   : > { %v11125_v48 = vadd.f32 %v7569_v41, %v4790_v20  ;;  %v7524_v40 = vpop.f32.mrb[104].mxu0 }
 0x1ec   : > { %v7570_v6 = vpop.f32.mrb[104].mxu1  ;;  %v7525_v28 = vpop.f32.mrb[105].mxu0 }
 0x1ed   : > { %v7526_v27 = vadd.f32 %v7525_v28, %v7524_v40  ;;  %v7571_v17 = vpop.f32.mrb[105].mxu1  ;;  %v7527_v52 = vpop.f32.mrb[106].mxu0 }
 0x1ee   : > { %v7572_v46 = vadd.f32 %v7571_v17, %v7570_v6  ;;  %v7573_v3 = vpop.f32.mrb[106].mxu1  ;;  %v7528_v8 = vpop.f32.mrb[107].mxu0 }
 0x1ef   : > { %v4795_v15 = vadd.f32 %v7526_v27, %v11096_v61  ;;  %v7529_v2 = vadd.f32 %v7528_v8, %v7527_v52  ;;  %v7574_v53 = vpop.f32.mrb[107].mxu1 }
 0x1f0   : > { %v7575_v12 = vadd.f32 %v7574_v53, %v7573_v3 }
 0x1f1   : > { %v11128_v50 = vadd.f32 %v7572_v46, %v4795_v15  ;;  %v4798_v1 = vadd.f32 %v7529_v2, %v11099_v37  ;;  %v8789_v46 = vmov 0.0  }
 0x1f2   : > { %7978 = vmatprep.mubr.msk.f32.mxu0 %vm8788_vm6, %v8789_v46  ;;  %8024 = vmatprep.mubr.msk.f32.mxu1 %vm8788_vm6, %v8789_v46 }
 0x1f3   : > { %v11131_v16 = vadd.f32 %v7575_v12, %v4798_v1  ;;  %v7530_v62 = vpop.f32.mrb[108].mxu0 }
 0x1f4   : > { %v7576_v44 = vpop.f32.mrb[108].mxu1  ;;  %v7531_v32 = vpop.f32.mrb[109].mxu0 }
 0x1f5   : > { %v7532_v10 = vadd.f32 %v7531_v32, %v7530_v62  ;;  %v7577_v55 = vpop.f32.mrb[109].mxu1  ;;  %v7533_v4 = vpop.f32.mrb[110].mxu0 }
 0x1f6   : > { %v7578_v58 = vadd.f32 %v7577_v55, %v7576_v44  ;;  %v7579_v21 = vpop.f32.mrb[110].mxu1  ;;  %v7534_v60 = vpop.f32.mrb[111].mxu0 }
 0x1f7   : > { %v4803_v61 = vadd.f32 %v7532_v10, %v11102_v0  ;;  %v7535_v9 = vadd.f32 %v7534_v60, %v7533_v4  ;;  %v7580_v29 = vpop.f32.mrb[111].mxu1 }
 0x1f8   : > { %v7581_v38 = vadd.f32 %v7580_v29, %v7579_v21 }
 0x1f9   : > { %v11134_v24 = vadd.f32 %v7578_v58, %v4803_v61  ;;  %v4806_v37 = vadd.f32 %v7535_v9, %v11105_v31 }
 0x1fb   : > { %v11137_v49 = vadd.f32 %v7581_v38, %v4806_v37  ;;  %v7536_v42 = vpop.f32.mrb[112].mxu0 }
 0x1fc   : > { %v7582_v13 = vpop.f32.mrb[112].mxu1  ;;  %v7537_v5 = vpop.f32.mrb[113].mxu0 }
 0x1fd   : > { %v7538_v56 = vadd.f32 %v7537_v5, %v7536_v42  ;;  %v7583_v59 = vpop.f32.mrb[113].mxu1  ;;  %v7539_v35 = vpop.f32.mrb[114].mxu0 }
 0x1fe   : > { %v7584_v36 = vadd.f32 %v7583_v59, %v7582_v13  ;;  %v7585_v25 = vpop.f32.mrb[114].mxu1  ;;  %v7540_v57 = vpop.f32.mrb[115].mxu0 }
 0x1ff   : > { %v4811_v0 = vadd.f32 %v7538_v56, %v11108_v23  ;;  %v7541_v39 = vadd.f32 %v7540_v57, %v7539_v35  ;;  %v7586_v7 = vpop.f32.mrb[115].mxu1 }
 0x200   : > { %v7587_v33 = vadd.f32 %v7586_v7, %v7585_v25 }
 0x201   : > { %v11140_v34 = vadd.f32 %v7584_v36, %v4811_v0  ;;  %v4814_v31 = vadd.f32 %v7541_v39, %v11111_v51 }
 0x203   : > { %v11143_v30 = vadd.f32 %v7587_v33, %v4814_v31  ;;  %v7542_v54 = vpop.f32.mrb[116].mxu0 }
 0x204   : > { %v7588_v26 = vpop.f32.mrb[116].mxu1  ;;  %v7543_v43 = vpop.f32.mrb[117].mxu0 }
 0x205   : > { %v7544_v14 = vadd.f32 %v7543_v43, %v7542_v54  ;;  %v7589_v11 = vpop.f32.mrb[117].mxu1  ;;  %v7545_v19 = vpop.f32.mrb[118].mxu0 }
 0x206   : > { %v7590_v22 = vadd.f32 %v7589_v11, %v7588_v26  ;;  %v7591_v41 = vpop.f32.mrb[118].mxu1  ;;  %v7546_v20 = vpop.f32.mrb[119].mxu0 }
 0x207   : > { %v4819_v23 = vadd.f32 %v7544_v14, %v11114_v63  ;;  %v7547_v40 = vadd.f32 %v7546_v20, %v7545_v19  ;;  %v7592_v6 = vpop.f32.mrb[119].mxu1 }
 0x208   : > { %v7593_v28 = vadd.f32 %v7592_v6, %v7591_v41 }
 0x209   : > { %v11146_v27 = vadd.f32 %v7590_v22, %v4819_v23  ;;  %v4822_v51 = vadd.f32 %v7547_v40, %v11117_v47 }
 0x20b   : > { %v11149_v17 = vadd.f32 %v7593_v28, %v4822_v51  ;;  %v7610_v52 = vpop.f32.mrb[120].mxu0 }
 0x20c   : > { %v7656_v3 = vpop.f32.mrb[120].mxu1  ;;  %v7611_v63 = vpop.f32.mrb[121].mxu0 }
 0x20d   : > { %v7612_v8 = vadd.f32 %v7611_v63, %v7610_v52  ;;  %v7657_v15 = vpop.f32.mrb[121].mxu1  ;;  %v7613_v2 = vpop.f32.mrb[122].mxu0 }
 0x20e   : > { %v7658_v53 = vadd.f32 %v7657_v15, %v7656_v3  ;;  %v7659_v12 = vpop.f32.mrb[122].mxu1  ;;  %v7614_v1 = vpop.f32.mrb[123].mxu0 }
 0x20f   : > { %v4933_v47 = vadd.f32 %v7612_v8, %v11120_v45  ;;  %v7615_v62 = vadd.f32 %v7614_v1, %v7613_v2  ;;  %v7660_v44 = vpop.f32.mrb[123].mxu1 }
 0x210   : > { %v7661_v32 = vadd.f32 %v7660_v44, %v7659_v12 }
 0x211   : > { %v11156_v10 = vadd.f32 %v7658_v53, %v4933_v47  ;;  %v4936_v55 = vadd.f32 %v7615_v62, %v11125_v48 }
 0x213   : > { %v11159_v4 = vadd.f32 %v7661_v32, %v4936_v55  ;;  %v7616_v58 = vpop.f32.mrb[124].mxu0 }
 0x214   : > { %v7662_v21 = vpop.f32.mrb[124].mxu1  ;;  %v7617_v60 = vpop.f32.mrb[125].mxu0 }
 0x215   : > { %v7618_v61 = vadd.f32 %v7617_v60, %v7616_v58  ;;  %v7663_v9 = vpop.f32.mrb[125].mxu1  ;;  %v7619_v29 = vpop.f32.mrb[126].mxu0 }
 0x216   : > { %v7664_v38 = vadd.f32 %v7663_v9, %v7662_v21  ;;  %v7665_v37 = vpop.f32.mrb[126].mxu1  ;;  %v7620_v42 = vpop.f32.mrb[127].mxu0 }
 0x217   : > { %v4941_v45 = vadd.f32 %v7618_v61, %v11128_v50  ;;  %v7621_v13 = vadd.f32 %v7620_v42, %v7619_v29  ;;  %v7666_v5 = vpop.f32.mrb[127].mxu1 }
 0x218   : > { %v7667_v56 = vadd.f32 %v7666_v5, %v7665_v37 }
 0x219   : > { %v11162_v59 = vadd.f32 %v7664_v38, %v4941_v45  ;;  %v4944_v48 = vadd.f32 %v7621_v13, %v11131_v16 }
 0x21b   : > { %v11165_v35 = vadd.f32 %v7667_v56, %v4944_v48  ;;  %v7622_v36 = vpop.f32.mrb[128].mxu0 }
 0x21c   : > { %v7668_v25 = vpop.f32.mrb[128].mxu1  ;;  %v7623_v57 = vpop.f32.mrb[129].mxu0 }
 0x21d   : > { %v7624_v0 = vadd.f32 %v7623_v57, %v7622_v36  ;;  %v7669_v39 = vpop.f32.mrb[129].mxu1  ;;  %v7625_v7 = vpop.f32.mrb[130].mxu0 }
 0x21e   : > { %v7670_v33 = vadd.f32 %v7669_v39, %v7668_v25  ;;  %v7671_v31 = vpop.f32.mrb[130].mxu1  ;;  %v7626_v54 = vpop.f32.mrb[131].mxu0 }
 0x21f   : > { %v4949_v50 = vadd.f32 %v7624_v0, %v11134_v24  ;;  %v7627_v26 = vadd.f32 %v7626_v54, %v7625_v7  ;;  %v7672_v43 = vpop.f32.mrb[131].mxu1 }
 0x220   : > { %v7673_v14 = vadd.f32 %v7672_v43, %v7671_v31 }
 0x221   : > { %v11168_v11 = vadd.f32 %v7670_v33, %v4949_v50  ;;  %v4952_v16 = vadd.f32 %v7627_v26, %v11137_v49 }
 0x223   : > { %v11171_v19 = vadd.f32 %v7673_v14, %v4952_v16  ;;  %v7628_v22 = vpop.f32.mrb[132].mxu0 }
 0x224   : > { %v7674_v41 = vpop.f32.mrb[132].mxu1  ;;  %v7629_v20 = vpop.f32.mrb[133].mxu0 }
 0x225   : > { %v7630_v23 = vadd.f32 %v7629_v20, %v7628_v22  ;;  %v7675_v40 = vpop.f32.mrb[133].mxu1  ;;  %v7631_v6 = vpop.f32.mrb[134].mxu0 }
 0x226   : > { %v7676_v28 = vadd.f32 %v7675_v40, %v7674_v41  ;;  %v7677_v51 = vpop.f32.mrb[134].mxu1  ;;  %v7632_v52 = vpop.f32.mrb[135].mxu0 }
 0x227   : > { %v4957_v24 = vadd.f32 %v7630_v23, %v11140_v34  ;;  %v7633_v3 = vadd.f32 %v7632_v52, %v7631_v6  ;;  %v7678_v63 = vpop.f32.mrb[135].mxu1 }
 0x228   : > { %v7679_v8 = vadd.f32 %v7678_v63, %v7677_v51 }
 0x229   : > { %v11174_v15 = vadd.f32 %v7676_v28, %v4957_v24  ;;  %v4960_v49 = vadd.f32 %v7633_v3, %v11143_v30 }
 0x22b   : > { %v11177_v2 = vadd.f32 %v7679_v8, %v4960_v49  ;;  %v7634_v53 = vpop.f32.mrb[136].mxu0 }
 0x22c   : > { %v7680_v12 = vpop.f32.mrb[136].mxu1  ;;  %v7635_v1 = vpop.f32.mrb[137].mxu0 }
 0x22d   : > { %v7636_v47 = vadd.f32 %v7635_v1, %v7634_v53  ;;  %v7681_v62 = vpop.f32.mrb[137].mxu1  ;;  %v7637_v44 = vpop.f32.mrb[138].mxu0 }
 0x22e   : > { %v7682_v32 = vadd.f32 %v7681_v62, %v7680_v12  ;;  %v7683_v55 = vpop.f32.mrb[138].mxu1  ;;  %v7638_v58 = vpop.f32.mrb[139].mxu0 }
 0x22f   : > { %v4965_v34 = vadd.f32 %v7636_v47, %v11146_v27  ;;  %v7639_v21 = vadd.f32 %v7638_v58, %v7637_v44  ;;  %v7684_v60 = vpop.f32.mrb[139].mxu1 }
 0x230   : > { %v7685_v61 = vadd.f32 %v7684_v60, %v7683_v55 }
 0x231   : > { %v11180_v9 = vadd.f32 %v7682_v32, %v4965_v34  ;;  %v4968_v30 = vadd.f32 %v7639_v21, %v11149_v17 }
 0x233   : > { %v11183_v29 = vadd.f32 %v7685_v61, %v4968_v30  ;;  %v7702_v38 = vpop.f32.mrb[140].mxu0 }
 0x234   : > { %v7748_v37 = vpop.f32.mrb[140].mxu1  ;;  %v7703_v42 = vpop.f32.mrb[141].mxu0 }
 0x235   : > { %v7704_v45 = vadd.f32 %v7703_v42, %v7702_v38  ;;  %v7749_v13 = vpop.f32.mrb[141].mxu1  ;;  %v7705_v5 = vpop.f32.mrb[142].mxu0 }
 0x236   : > { %v7750_v56 = vadd.f32 %v7749_v13, %v7748_v37  ;;  %v7751_v48 = vpop.f32.mrb[142].mxu1  ;;  %v7706_v36 = vpop.f32.mrb[143].mxu0 }
 0x237   : > { %v5079_v27 = vadd.f32 %v7704_v45, %v11156_v10  ;;  %v7707_v25 = vadd.f32 %v7706_v36, %v7705_v5  ;;  %v7752_v57 = vpop.f32.mrb[143].mxu1 }
 0x238   : > { %v7753_v0 = vadd.f32 %v7752_v57, %v7751_v48 }
 0x239   : > { %v11186_v39 = vadd.f32 %v7750_v56, %v5079_v27  ;;  %v5082_v17 = vadd.f32 %v7707_v25, %v11159_v4 }
 0x23b   : > { %v11189_v7 = vadd.f32 %v7753_v0, %v5082_v17  ;;  %v7708_v33 = vpop.f32.mrb[144].mxu0 }
 0x23c   : > { %v7754_v31 = vpop.f32.mrb[144].mxu1  ;;  %v7709_v54 = vpop.f32.mrb[145].mxu0 }
 0x23d   : > { %v7710_v50 = vadd.f32 %v7709_v54, %v7708_v33  ;;  %v7755_v26 = vpop.f32.mrb[145].mxu1  ;;  %v7711_v43 = vpop.f32.mrb[146].mxu0 }
 0x23e   : > { %v7756_v14 = vadd.f32 %v7755_v26, %v7754_v31  ;;  %v7757_v16 = vpop.f32.mrb[146].mxu1  ;;  %v7712_v22 = vpop.f32.mrb[147].mxu0 }
 0x23f   : > { %v5087_v10 = vadd.f32 %v7710_v50, %v11162_v59  ;;  %v7713_v41 = vadd.f32 %v7712_v22, %v7711_v43  ;;  %v7758_v20 = vpop.f32.mrb[147].mxu1 }
 0x240   : > { %v7759_v23 = vadd.f32 %v7758_v20, %v7757_v16 }
 0x241   : > { %v11192_v40 = vadd.f32 %v7756_v14, %v5087_v10  ;;  %v5090_v4 = vadd.f32 %v7713_v41, %v11165_v35 }
 0x243   : > { %v11195_v6 = vadd.f32 %v7759_v23, %v5090_v4  ;;  %v7714_v28 = vpop.f32.mrb[148].mxu0 }
 0x244   : > { %v7760_v51 = vpop.f32.mrb[148].mxu1  ;;  %v7715_v52 = vpop.f32.mrb[149].mxu0 }
 0x245   : > { %v7716_v24 = vadd.f32 %v7715_v52, %v7714_v28  ;;  %v7761_v3 = vpop.f32.mrb[149].mxu1  ;;  %v7717_v63 = vpop.f32.mrb[150].mxu0 }
 0x246   : > { %v7762_v8 = vadd.f32 %v7761_v3, %v7760_v51  ;;  %v7763_v49 = vpop.f32.mrb[150].mxu1  ;;  %v7718_v53 = vpop.f32.mrb[151].mxu0 }
 0x247   : > { %v5095_v59 = vadd.f32 %v7716_v24, %v11168_v11  ;;  %v7719_v12 = vadd.f32 %v7718_v53, %v7717_v63  ;;  %v7764_v1 = vpop.f32.mrb[151].mxu1  ;;  %v11216_v24 = vstv %s5336_s30  ;;  %s8235_s30 = smul.u32 1280, %s8869_s17 }
 0x248   : > { %v7765_v47 = vadd.f32 %v7764_v1, %v7763_v49 }
 0x249   : > { %v11198_v62 = vadd.f32 %v7762_v8, %v5095_v59  ;;  %v5098_v35 = vadd.f32 %v7719_v12, %v11171_v19  ;;  %s11538_s17 = scalar_lea.hbm %s11597_s10, %s8235_s30 }
 0x24b   : > { %v11201_v44 = vadd.f32 %v7765_v47, %v5098_v35  ;;  %v7720_v32 = vpop.f32.mrb[152].mxu0 }
 0x24c   : > { %v7766_v55 = vpop.f32.mrb[152].mxu1  ;;  %v7721_v58 = vpop.f32.mrb[153].mxu0 }
 0x24d   : > { %v7722_v34 = vadd.f32 %v7721_v58, %v7720_v32  ;;  %v7767_v21 = vpop.f32.mrb[153].mxu1  ;;  %v7723_v60 = vpop.f32.mrb[154].mxu0 }
 0x24e   : > { %v7768_v61 = vadd.f32 %v7767_v21, %v7766_v55  ;;  %v7769_v30 = vpop.f32.mrb[154].mxu1  ;;  %v7724_v38 = vpop.f32.mrb[155].mxu0 }
 0x24f   : > { %v5103_v11 = vadd.f32 %v7722_v34, %v11174_v15  ;;  %v7725_v37 = vadd.f32 %v7724_v38, %v7723_v60  ;;  %v7770_v42 = vpop.f32.mrb[155].mxu1 }
 0x250   : > { %v7771_v45 = vadd.f32 %v7770_v42, %v7769_v30 }
 0x251   : > { %v11204_v13 = vadd.f32 %v7768_v61, %v5103_v11  ;;  %v5106_v19 = vadd.f32 %v7725_v37, %v11177_v2 }
 0x253   : > { %v11207_v5 = vadd.f32 %v7771_v45, %v5106_v19  ;;  %v7726_v56 = vpop.f32.mrb[156].mxu0 }
 0x254   : > { %v7772_v48 = vpop.f32.mrb[156].mxu1  ;;  %v7727_v36 = vpop.f32.mrb[157].mxu0 }
 0x255   : > { %v7728_v27 = vadd.f32 %v7727_v36, %v7726_v56  ;;  %v7773_v25 = vpop.f32.mrb[157].mxu1  ;;  %v7729_v57 = vpop.f32.mrb[158].mxu0 }
 0x256   : > { %v7774_v0 = vadd.f32 %v7773_v25, %v7772_v48  ;;  %v7775_v17 = vpop.f32.mrb[158].mxu1  ;;  %v7730_v33 = vpop.f32.mrb[159].mxu0 }
 0x257   : > { %v5111_v15 = vadd.f32 %v7728_v27, %v11180_v9  ;;  %v7731_v31 = vadd.f32 %v7730_v33, %v7729_v57  ;;  %v7776_v54 = vpop.f32.mrb[159].mxu1 }
 0x258   : > { %v7777_v50 = vadd.f32 %v7776_v54, %v7775_v17 }
 0x259   : > { %v11210_v26 = vadd.f32 %v7774_v0, %v5111_v15  ;;  %v5114_v2 = vadd.f32 %v7731_v31, %v11183_v29 }
 0x25b   : > { %v11213_v43 = vadd.f32 %v7777_v50, %v5114_v2  ;;  %v7794_v14 = vpop.f32.mrb[160].mxu0 }
 0x25c   : > { %v7840_v16 = vpop.f32.mrb[160].mxu1  ;;  %v7795_v22 = vpop.f32.mrb[161].mxu0 }
 0x25d   : > { %v7796_v10 = vadd.f32 %v7795_v22, %v7794_v14  ;;  %v7841_v41 = vpop.f32.mrb[161].mxu1  ;;  %v7797_v20 = vpop.f32.mrb[162].mxu0 }
 0x25e   : > { %v7842_v23 = vadd.f32 %v7841_v41, %v7840_v16  ;;  %v7843_v4 = vpop.f32.mrb[162].mxu1  ;;  %v7798_v28 = vpop.f32.mrb[163].mxu0 }
 0x25f   : > { %v5225_v9 = vadd.f32 %v7796_v10, %v11186_v39  ;;  %v7799_v51 = vadd.f32 %v7798_v28, %v7797_v20  ;;  %v7844_v52 = vpop.f32.mrb[163].mxu1 }
 0x260   : > { %v7845_v3 = vadd.f32 %v7844_v52, %v7843_v4 }
 0x261   : > { %v5298_v63 = vadd.f32 %v7842_v23, %v5225_v9  ;;  %v5228_v29 = vadd.f32 %v7799_v51, %v11189_v7 }
 0x263   : > { %v5348_v8 = vmul.f32 %v11216_v24, %v5298_v63  ;;  %v5301_v49 = vadd.f32 %v7845_v3, %v5228_v29  ;;  %v7800_v53 = vpop.f32.mrb[164].mxu0  ;;  %vm5337_vm7 = vcmp.gt.f32.partialorder %v5298_v63, 0.0 }
 0x264   : > { %v7846_v59 = vpop.f32.mrb[164].mxu1  ;;  %v7801_v12 = vpop.f32.mrb[165].mxu0 }
 0x265   : > { %vm5338_vm8 = vcmp.gt.f32.partialorder %v5301_v49, 0.0  ;;  %v5349_v1 = vmul.f32 %v11216_v24, %v5301_v49  ;;  %v7802_v47 = vadd.f32 %v7801_v12, %v7800_v53  ;;  %v7847_v39 = vpop.f32.mrb[165].mxu1  ;;  %v7803_v35 = vpop.f32.mrb[166].mxu0  ;;  %v5358_v34 = vsel %vm5337_vm7, %v5298_v63, %v5348_v8 }
 0x266   : > { %v7848_v32 = vadd.f32 %v7847_v39, %v7846_v59  ;;  %v7849_v55 = vpop.f32.mrb[166].mxu1  ;;  %v7804_v58 = vpop.f32.mrb[167].mxu0 }
 0x267   : > { %v5359_v21 = vsel %vm5338_vm8, %v5301_v49, %v5349_v1  ;;  %v5233_v7 = vadd.f32 %v7802_v47, %v11192_v40  ;;  %v7805_v60 = vadd.f32 %v7804_v58, %v7803_v35  ;;  %v7850_v61 = vpop.f32.mrb[167].mxu1 }
 0x268   : > { %v7851_v30 = vadd.f32 %v7850_v61, %v7849_v55  ;;  %v8151_v38 = vpack.c.bf16 %v5359_v21, %v5358_v34 }
 0x269   : > { %v5306_v11 = vadd.f32 %v7848_v32, %v5233_v7  ;;  %v5236_v37 = vadd.f32 %v7805_v60, %v11195_v6 }
 0x26a   : > { %8152 = vmatpush3.bf16.msra.mxu0 %v8151_v38 }
 0x26b   : > { %v5350_v42 = vmul.f32 %v11216_v24, %v5306_v11  ;;  %v5309_v45 = vadd.f32 %v7851_v30, %v5236_v37  ;;  %v7806_v19 = vpop.f32.mrb[168].mxu0  ;;  %8153 = vmatprep.subr.bf16.mxu0 %v8787_v18  ;;  %vm5339_vm9 = vcmp.gt.f32.partialorder %v5306_v11, 0.0 }
 0x26c   : > { %v7852_v56 = vpop.f32.mrb[168].mxu1  ;;  %v7807_v48 = vpop.f32.mrb[169].mxu0 }
 0x26d   : > { %vm5340_vm10 = vcmp.gt.f32.partialorder %v5309_v45, 0.0  ;;  %v5351_v40 = vmul.f32 %v11216_v24, %v5309_v45  ;;  %v7808_v36 = vadd.f32 %v7807_v48, %v7806_v19  ;;  %v7853_v27 = vpop.f32.mrb[169].mxu1  ;;  %v7809_v25 = vpop.f32.mrb[170].mxu0  ;;  %v5360_v6 = vsel %vm5339_vm9, %v5306_v11, %v5350_v42 }
 0x26e   : > { %v7854_v57 = vadd.f32 %v7853_v27, %v7852_v56  ;;  %v7855_v0 = vpop.f32.mrb[170].mxu1  ;;  %v7810_v17 = vpop.f32.mrb[171].mxu0 }
 0x26f   : > { %v5361_v33 = vsel %vm5340_vm10, %v5309_v45, %v5351_v40  ;;  %v5241_v15 = vadd.f32 %v7808_v36, %v11198_v62  ;;  %v7811_v31 = vadd.f32 %v7810_v17, %v7809_v25  ;;  %v7856_v54 = vpop.f32.mrb[171].mxu1 }
 0x270   : > { %v7857_v50 = vadd.f32 %v7856_v54, %v7855_v0  ;;  %v8154_v2 = vpack.c.bf16 %v5361_v33, %v5360_v6  ;;  %v5368_v0 = vld [vmem:[%s11591_s4] sm:$0xff]  ;;  %v5518_v6 = vld [vmem:[%s11593_s6 + $0x18] sm:$0xff]  ;;  %v5369_v33 = vld [vmem:[%s11591_s4 + $0x8] sm:$0xff] }
 0x271   : > { %v5314_v14 = vadd.f32 %v7854_v57, %v5241_v15  ;;  %v5244_v16 = vadd.f32 %v7811_v31, %v11201_v44  ;;  %v5370_v31 = vld [vmem:[%s11591_s4 + $0x10] sm:$0xff]  ;;  %v5371_v54 = vld [vmem:[%s11591_s4 + $0x18] sm:$0xff] }
 0x272   : > { %8155 = vmatpush3.bf16.msra.mxu0 %v8154_v2  ;;  %v5373_v2 = vld [vmem:[%s11591_s4 + $0x28] sm:$0xff] }
 0x273   : > { %v5352_v22 = vmul.f32 %v11216_v24, %v5314_v14  ;;  %v5317_v10 = vadd.f32 %v7857_v50, %v5244_v16  ;;  %v7812_v41 = vpop.f32.mrb[172].mxu0  ;;  %8156 = vmatprep.subr.bf16.mxu0 %v8787_v18  ;;  %vm5341_vm11 = vcmp.gt.f32.partialorder %v5314_v14, 0.0  ;;  %v5372_v50 = vld [vmem:[%s11591_s4 + $0x20] sm:$0xff]  ;;  %v5375_v16 = vld [vmem:[%s11591_s4 + $0x38] sm:$0xff] }
 0x274   : > { %v7858_v20 = vpop.f32.mrb[172].mxu1  ;;  %v7813_v23 = vpop.f32.mrb[173].mxu0 }
 0x275   : > { %vm5342_vm12 = vcmp.gt.f32.partialorder %v5317_v10, 0.0  ;;  %v5353_v62 = vmul.f32 %v11216_v24, %v5317_v10  ;;  %v7814_v4 = vadd.f32 %v7813_v23, %v7812_v41  ;;  %v7859_v28 = vpop.f32.mrb[173].mxu1  ;;  %v7815_v9 = vpop.f32.mrb[174].mxu0  ;;  %v5362_v44 = vsel %vm5341_vm11, %v5314_v14, %v5352_v22  ;;  %v5374_v14 = vld [vmem:[%s11591_s4 + $0x30] sm:$0xff]  ;;  %v5376_v22 = vld [vmem:[%s11591_s4 + $0x40] sm:$0xff]  ;;  %v5606_v41 = vld [vmem:[%s11595_s8 + $0x8] sm:$0xff] }
 0x276   : > { %v7860_v51 = vadd.f32 %v7859_v28, %v7858_v20  ;;  %v7861_v52 = vpop.f32.mrb[174].mxu1  ;;  %v7816_v3 = vpop.f32.mrb[175].mxu0  ;;  %v5607_v23 = vld [vmem:[%s11595_s8 + $0x10] sm:$0xff] }
 0x277   : > { %v5363_v63 = vsel %vm5342_vm12, %v5317_v10, %v5353_v62  ;;  %v5249_v29 = vadd.f32 %v7814_v4, %v11204_v13  ;;  %v7817_v8 = vadd.f32 %v7816_v3, %v7815_v9  ;;  %v7862_v49 = vpop.f32.mrb[175].mxu1  ;;  %v5605_v10 = vld [vmem:[%s11595_s8] sm:$0xff]  ;;  %v5608_v62 = vld [vmem:[%s11595_s8 + $0x18] sm:$0xff] }
 0x278   : > { %v7863_v53 = vadd.f32 %v7862_v49, %v7861_v52  ;;  %v8157_v59 = vpack.c.bf16 %v5363_v63, %v5362_v44  ;;  %v8172_v20 = vpack.c.bf16 %v5606_v41, %v5605_v10  ;;  %v8175_v4 = vpack.c.bf16 %v5608_v62, %v5607_v23  ;;  %v7009_v10 = vld [vmem:[%s11593_s6 + $0x78] sm:$0xff]  ;;  %v7001_v23 = vld [vmem:[%s11595_s8 + $0x48] sm:$0xff] }
 0x279   : > { %v5322_v12 = vadd.f32 %v7860_v51, %v5249_v29  ;;  %v5252_v1 = vadd.f32 %v7817_v8, %v11207_v5 }
 0x27a   : > { %8158 = vmatpush3.bf16.msra.mxu0 %v8157_v59  ;;  %8173 = vmatpush3.bf16.msra.mxu1 %v8172_v20  ;;  %v7000_v20 = vld [vmem:[%s11595_s8 + $0x40] sm:$0xff] }
 0x27b   : > { %v5354_v47 = vmul.f32 %v11216_v24, %v5322_v12  ;;  %v5325_v39 = vadd.f32 %v7863_v53, %v5252_v1  ;;  %v7818_v35 = vpop.f32.mrb[176].mxu0  ;;  %8159 = vmatprep.subr.bf16.mxu0 %v8787_v18  ;;  %vm5343_vm13 = vcmp.gt.f32.partialorder %v5322_v12, 0.0  ;;  %8174 = vmatprep.subr.bf16.mxu1 %v8787_v18  ;;  %v8197_v62 = vpack.c.bf16 %v7001_v23, %v7000_v20 }
 0x27c   : > { %v7864_v32 = vpop.f32.mrb[176].mxu1  ;;  %v7819_v55 = vpop.f32.mrb[177].mxu0 }
 0x27d   : > { %vm5344_vm14 = vcmp.gt.f32.partialorder %v5325_v39, 0.0  ;;  %v5355_v13 = vmul.f32 %v11216_v24, %v5325_v39  ;;  %v7820_v58 = vadd.f32 %v7819_v55, %v7818_v35  ;;  %v7865_v34 = vpop.f32.mrb[177].mxu1  ;;  %v7821_v21 = vpop.f32.mrb[178].mxu0  ;;  %v5364_v5 = vsel %vm5343_vm13, %v5322_v12, %v5354_v47  ;;  %v6974_v55 = vld [vmem:[%s11594_s7] ss:$0 sm:$0xff] }
 0x27e   : > { %v7866_v7 = vadd.f32 %v7865_v34, %v7864_v32  ;;  %v7867_v60 = vpop.f32.mrb[178].mxu1  ;;  %v7822_v61 = vpop.f32.mrb[179].mxu0  ;;  %8176 = vmatpush3.bf16.msra.mxu1 %v8175_v4  ;;  %v6978_v34 = vld [vmem:[%s11593_s6 + $0x20] sm:$0xff]  ;;  %v7002_v4 = vld [vmem:[%s11595_s8 + $0x50] sm:$0xff]  ;;  %vm6301_vm13 = vcmask 588800  }
 0x27f   : > { %v5365_v30 = vsel %vm5344_vm14, %v5325_v39, %v5355_v13  ;;  %v5257_v38 = vadd.f32 %v7820_v58, %v11210_v26  ;;  %v7823_v11 = vadd.f32 %v7822_v61, %v7821_v21  ;;  %v7868_v37 = vpop.f32.mrb[179].mxu1  ;;  %v5515_v26 = vld [vmem:[%s11593_s6] sm:$0xff]  ;;  %8177 = vmatprep.subr.bf16.mxu1 %v8787_v18  ;;  %v5602_v58 = vstv %s6976_s28  ;;  %v6979_v21 = vld [vmem:[%s11593_s6 + $0x28] sm:$0xff] }
 0x280   : > { %v7869_v42 = vadd.f32 %v7868_v37, %v7867_v60  ;;  %v8160_v45 = vpack.c.bf16 %v5365_v30, %v5364_v5  ;;  %v8178_v5 = vpack.c.bf16 %v6979_v21, %v6978_v34  ;;  %v6980_v30 = vld [vmem:[%s11593_s6 + $0x30] sm:$0xff]  ;;  %v6163_v21 = vstv %s7017_s29  ;;  %s8790_s29 = smov [#allocation5]  }
 0x281   : > { %v5330_v19 = vadd.f32 %v7866_v7, %v5257_v38  ;;  %v5260_v56 = vadd.f32 %v7823_v11, %v11213_v43  ;;  %v5516_v43 = vld [vmem:[%s11593_s6 + $0x8] sm:$0xff]  ;;  %v6981_v38 = vld [vmem:[%s11593_s6 + $0x38] sm:$0xff]  ;;  %s8722_s26 = sshll.u32 %s8790_s29, 4  ;;  %s8723_s26 = int_to_ptr.vmem [resolvable:$false] %s8722_s26 }
 0x282   : > { %8161 = vmatpush3.bf16.msra.mxu0 %v8160_v45  ;;  %v8166_v17 = vpack.c.bf16 %v5516_v43, %v5515_v26  ;;  %v8181_v37 = vpack.c.bf16 %v6981_v38, %v6980_v30  ;;  %v6987_v45 = vld [vmem:[%s11595_s8 + $0x28] sm:$0xff]  ;;  %s8724_s25 = scalar_lea.vmem %s8723_s26, 2560  ;;  %p8725_p13 = scmp.lt.s32.totalorder %s11540_s11, %s8723_s26 }
 0x283   : > { %v5356_v48 = vmul.f32 %v11216_v24, %v5330_v19  ;;  %v5333_v40 = vadd.f32 %v7869_v42, %v5260_v56  ;;  %8162 = vmatprep.subr.bf16.mxu0 %v8787_v18  ;;  %vm5345_vm15 = vcmp.gt.f32.partialorder %v5330_v19, 0.0  ;;  %v6986_v42 = vld [vmem:[%s11595_s8 + $0x20] sm:$0xff]  ;;  %v6988_v56 = vld [vmem:[%s11595_s8 + $0x30] sm:$0xff] }
 0x285   : > { %vm5346_vm0 = vcmp.gt.f32.partialorder %v5333_v40, 0.0  ;;  %v5357_v36 = vmul.f32 %v11216_v24, %v5333_v40  ;;  %v5366_v27 = vsel %vm5345_vm15, %v5330_v19, %v5356_v48  ;;  %v5517_v24 = vld [vmem:[%s11593_s6 + $0x10] sm:$0xff]  ;;  %v8184_v19 = vpack.c.bf16 %v6987_v45, %v6986_v42  ;;  %v6989_v48 = vld [vmem:[%s11595_s8 + $0x38] sm:$0xff] }
 0x286   : > { %v8169_v15 = vpack.c.bf16 %v5518_v6, %v5517_v24 }
 0x287   : > { %v5367_v25 = vsel %vm5346_vm0, %v5333_v40, %v5357_v36  ;;  %v8187_v40 = vpack.c.bf16 %v6989_v48, %v6988_v56  ;;  %v6991_v36 = vld [vmem:[%s11593_s6 + $0x40] sm:$0xff] }
 0x288   : > { %v8163_v57 = vpack.c.bf16 %v5367_v25, %v5366_v27  ;;  %v6992_v27 = vld [vmem:[%s11593_s6 + $0x48] sm:$0xff] }
 0x289   : > { %v8189_v25 = vpack.c.bf16 %v6992_v27, %v6991_v36 }
 0x28a   : > { %8164 = vmatpush3.bf16.msra.mxu0 %v8163_v57  ;;  %v6983_v57 = vld [vmem:[%s11594_s7 + $0x1] ss:$0 sm:$0xff] }
 0x28b   : > { %8165 = vmatprep.subr.bf16.mxu0 %v8787_v18 }
 0x28d   : > { %7979 = vmatmul.mubr.msk.f32.vlgmr.msra.gmra.mrb[180].mxu0 %vm5377_vm1, %v5368_v0 }
 0x28e   : > { %7981 = vmatprep.mubr.msk.f32.mxu0 %vm8788_vm6, %v8789_v46  ;;  %8167 = vmatpush3.bf16.msra.mxu0 %v8166_v17  ;;  %v5770_v17 = vstv %s6985_s12 }
 0x28f   : > { %8168 = vmatprep.subr.bf16.mxu0 %v8787_v18 }
 0x291   : > { %7982 = vmatmul.mubr.msk.f32.gmra.mrb[182].mxu0 %vm5377_vm1, %v5369_v33  ;;  %v6993_v33 = vld [vmem:[%s11593_s6 + $0x50] sm:$0xff] }
 0x292   : > { %7984 = vmatprep.mubr.msk.f32.mxu0 %vm8788_vm6, %v8789_v46  ;;  %8170 = vmatpush3.bf16.msra.mxu0 %v8169_v15  ;;  %v6994_v15 = vld [vmem:[%s11593_s6 + $0x58] sm:$0xff] }
 0x293   : > { %8198 = vmatprep.subr.bf16.mxu0 %v8197_v62 }
 0x295   : > { %7985 = vmatmul.mubr.msk.f32.gmra.mrb[184].mxu0 %vm5377_vm1, %v5370_v31 }
 0x296   : > { %7987 = vmatprep.mubr.msk.f32.mxu0 %vm8788_vm6, %v8789_v46 }
 0x299   : > { %7988 = vmatmul.mubr.msk.f32.gmra.mrb[186].mxu0 %vm5377_vm1, %v5371_v54  ;;  %v8193_v54 = vpack.c.bf16 %v6994_v15, %v6993_v33  ;;  %v6284_v33 = vld [vmem:[%s11592_s5] sm:$0xff] }
 0x29a   : > { %7990 = vmatprep.mubr.msk.f32.mxu0 %vm8788_vm6, %v8789_v46 }
 0x29d   : > { %7991 = vmatmul.mubr.msk.f32.gmra.mrb[188].mxu0 %vm5377_vm1, %v5372_v50 }
 0x29e   : > { %7993 = vmatprep.mubr.msk.f32.mxu0 %vm8788_vm6, %v8789_v46 }
 0x2a1   : > { %7994 = vmatmul.mubr.msk.f32.gmra.mrb[190].mxu0 %vm5377_vm1, %v5373_v2  ;;  %v7006_v2 = vld [vmem:[%s11593_s6 + $0x60] sm:$0xff] }
 0x2a2   : > { %7996 = vmatprep.mubr.msk.f32.mxu0 %vm8788_vm6, %v8789_v46 }
 0x2a5   : > { %7997 = vmatmul.mubr.msk.f32.gmra.mrb[192].mxu0 %vm5377_vm1, %v5374_v14  ;;  %v7007_v14 = vld [vmem:[%s11593_s6 + $0x68] sm:$0xff] }
 0x2a6   : > { %7999 = vmatprep.mubr.msk.f32.mxu0 %vm8788_vm6, %v8789_v46 }
 0x2a9   : > { %8000 = vmatmul.mubr.msk.f32.gmra.mrb[194].mxu0 %vm5377_vm1, %v5375_v16  ;;  %v8206_v16 = vpack.c.bf16 %v7007_v14, %v7006_v2 }
 0x2aa   : > { %8002 = vmatprep.mubr.msk.f32.mxu0 %vm8788_vm6, %v8789_v46 }
 0x2ad   : > { %8003 = vmatmul.mubr.msk.f32.gmra.mrb[196].mxu0 %vm5377_vm1, %v5376_v22  ;;  %v7008_v22 = vld [vmem:[%s11593_s6 + $0x70] sm:$0xff] }
 0x2ae   : > { %8013 = vmatprep.mubr.msk.f32.mxu0 %vm8788_vm6, %v8789_v46  ;;  %v8209_v41 = vpack.c.bf16 %v7009_v10, %v7008_v22 }
 0x360   : > { %v5471_v28 = vpop.f32.mrb[180].mxu0 }
 0x361   : > { %8014 = vmatmul.mubr.msk.f32.vlgmr.msra.gmra.mrb[198].mxu0 %vm5526_vm2, %v5471_v28  ;;  %v7980_v9 = vpop.f32.mrb[181].mxu0  ;;  %v7003_v28 = vld [vmem:[%s11595_s8 + $0x58] sm:$0xff] }
 0x362   : > { %8200 = vmatpush3.bf16.msra.mxu0 %v8197_v62  ;;  %v8201_v9 = vpack.c.bf16 %v7003_v28, %v7002_v4  ;;  %v6285_v28 = vld [vmem:[%s11592_s5 + $0x8] sm:$0xff] }
 0x364   : > { %v5476_v51 = vpop.f32.mrb[182].mxu0  ;;  %8202 = vmatprep.subr.bf16.mxu0 %v8201_v9 }
 0x365   : > { %v7983_v52 = vpop.f32.mrb[183].mxu0 }
 0x366   : > { %8204 = vmatpush3.bf16.msra.mxu0 %v8201_v9  ;;  %v6286_v9 = vld [vmem:[%s11592_s5 + $0x10] sm:$0xff] }
 0x367   : > { %8211 = vmatprep.subr.bf16.mxu0 %v8787_v18 }
 0x368   : > { %v11324_v3 = vpop.f32.mrb[184].mxu0 }
 0x369   : > { %v7986_v44 = vpop.f32.mrb[185].mxu0 }
 0x36a   : > { %v6996_v44 = vld [vmem:[%s11594_s7 + $0x2] ss:$0 sm:$0xff] }
 0x36c   : > { %v11326_v63 = vpop.f32.mrb[186].mxu0 }
 0x36d   : > { %v7989_v29 = vpop.f32.mrb[187].mxu0 }
 0x36e   : > { %v5948_v29 = vstv %s6999_s18  ;;  %s11546_s18 = scalar_lea.sflag [#allocation3], %s364_s21 }
 0x370   : > { %v11328_v8 = vpop.f32.mrb[188].mxu0 }
 0x371   : > { %v7992_v49 = vpop.f32.mrb[189].mxu0 }
 0x374   : > { %v11330_v53 = vpop.f32.mrb[190].mxu0 }
 0x375   : > { %v7995_v59 = vpop.f32.mrb[191].mxu0 }
 0x376   : > { %v7018_v59 = vld [vmem:[%s11595_s8 + $0x60] sm:$0xff] }
 0x378   : > { %v11332_v12 = vpop.f32.mrb[192].mxu0 }
 0x379   : > { %v7998_v1 = vpop.f32.mrb[193].mxu0 }
 0x37c   : > { %v11334_v47 = vpop.f32.mrb[194].mxu0 }
 0x37d   : > { %v8001_v39 = vpop.f32.mrb[195].mxu0 }
 0x380   : > { %v11336_v35 = vpop.f32.mrb[196].mxu0 }
 0x381   : > { %v8004_v32 = vpop.f32.mrb[197].mxu0 }
 0x382   : > { %v7011_v32 = vld [vmem:[%s11594_s7 + $0x3] ss:$0 sm:$0xff] }
 0x434   : > { %v5596_v13 = vpop.f32.mrb[198].mxu0 }
 0x435   : > { %v5597_v7 = vadd.f32 %v6974_v55, %v5596_v13  ;;  %v8015_v60 = vpop.f32.mrb[199].mxu0  ;;  %v7020_v55 = vld [vmem:[%s11595_s8 + $0x70] sm:$0xff]  ;;  %v7021_v13 = vld [vmem:[%s11595_s8 + $0x78] sm:$0xff] }
 0x437   : > { %vm5601_vm3 = vcmp.gt.f32.partialorder %v5597_v7, 0.0  ;;  %v5603_v61 = vmul.f32 %v5602_v58, %v5597_v7 }
 0x439   : > { %v5604_v11 = vsel %vm5601_vm3, %v5597_v7, %v5603_v61  ;;  %v8215_v61 = vpack.c.bf16 %v7021_v13, %v7020_v55 }
 0x43a   : > { %8025 = vmatmul.mubr.msk.f32.vlgmr.msra.gmra.mrb[180].mxu1 %vm5526_vm2, %v5604_v11 }
 0x43b   : > { %8179 = vmatpush3.bf16.msra.mxu1 %v8178_v5  ;;  %8035 = vmatprep.mubr.msk.f32.mxu1 %vm8788_vm6, %v8789_v46 }
 0x43c   : > { %8180 = vmatprep.subr.bf16.mxu1 %v8787_v18 }
 0x43f   : > { %8182 = vmatpush3.bf16.msra.mxu1 %v8181_v37 }
 0x440   : > { %8183 = vmatprep.subr.bf16.mxu1 %v8787_v18 }
 0x442   : > { %8036 = vmatmul.mubr.msk.f32.vlgmr.msra.gmra.mrb[182].mxu1 %vm5526_vm2, %v5476_v51 }
 0x443   : > { %8046 = vmatprep.mubr.msk.f32.mxu1 %vm8788_vm6, %v8789_v46  ;;  %8185 = vmatpush3.bf16.msra.mxu1 %v8184_v19 }
 0x444   : > { %8186 = vmatprep.subr.bf16.mxu1 %v8787_v18 }
 0x447   : > { %8188 = vmatpush3.bf16.msra.mxu1 %v8187_v40 }
 0x448   : > { %8190 = vmatprep.subr.bf16.mxu1 %v8189_v25 }
 0x50d   : > { %v5678_v26 = vpop.f32.mrb[180].mxu1 }
 0x50e   : > { %v8026_v43 = vpop.f32.mrb[181].mxu1 }
 0x515   : > { %v5764_v0 = vpop.f32.mrb[182].mxu1 }
 0x516   : > { %v5765_v24 = vadd.f32 %v6983_v57, %v5764_v0  ;;  %v8037_v6 = vpop.f32.mrb[183].mxu1 }
 0x518   : > { %vm5769_vm4 = vcmp.gt.f32.partialorder %v5765_v24, 0.0  ;;  %v5771_v31 = vmul.f32 %v5770_v17, %v5765_v24 }
 0x51a   : > { %v5772_v50 = vsel %vm5769_vm4, %v5765_v24, %v5771_v31 }
 0x51b   : > { %8047 = vmatmul.mubr.msk.f32.vlgmr.msra.gmra.mrb[184].mxu1 %vm5526_vm2, %v5772_v50 }
 0x51c   : > { %8192 = vmatpush3.bf16.msra.mxu1 %v8189_v25  ;;  %8057 = vmatprep.mubr.msk.f32.mxu1 %vm5526_vm2, %v11324_v3 }
 0x51d   : > { %8194 = vmatprep.subr.bf16.mxu1 %v8193_v54 }
 0x520   : > { %8196 = vmatpush3.bf16.msra.mxu1 %v8193_v54 }
 0x521   : > { %8205 = vmatprep.subr.bf16.mxu1 %v8787_v18 }
 0x523   : > { %8058 = vmatmul.mubr.msk.f32.vlgmr.msra.gmra.mrb[186].mxu1 %vm5526_vm2, %v11326_v63 }
 0x524   : > { %8207 = vmatpush3.bf16.msra.mxu1 %v8206_v16  ;;  %8079 = vmatprep.mubr.msk.f32.mxu1 %vm8788_vm6, %v8789_v46 }
 0x525   : > { %8208 = vmatprep.subr.bf16.mxu1 %v8787_v18 }
 0x528   : > { %8210 = vmatpush3.bf16.msra.mxu1 %v8209_v41 }
 0x52b   : > { %8080 = vmatmul.mubr.msk.f32.vlgmr.msra.gmra.mrb[188].mxu1 %vm5526_vm2, %v11328_v8 }
 0x52c   : > { %8082 = vmatprep.mubr.msk.f32.mxu1 %vm8788_vm6, %v8789_v46 }
 0x52f   : > { %8083 = vmatmul.mubr.msk.f32.gmra.mrb[190].mxu1 %vm5526_vm2, %v11330_v53 }
 0x530   : > { %8085 = vmatprep.mubr.msk.f32.mxu1 %vm8788_vm6, %v8789_v46 }
 0x533   : > { %8086 = vmatmul.mubr.msk.f32.gmra.mrb[192].mxu1 %vm5526_vm2, %v11332_v12  ;;  %v7019_v12 = vld [vmem:[%s11595_s8 + $0x68] sm:$0xff] }
 0x534   : > { %8088 = vmatprep.mubr.msk.f32.mxu1 %vm8788_vm6, %v8789_v46  ;;  %v8212_v39 = vpack.c.bf16 %v7019_v12, %v7018_v59  ;;  %v6458_v59 = vstv %s7038_s20  ;;  %s8718_s20 = scalar_lea.vmem %s11540_s11, 1280 }
 0x535   : > { %p8719_p10 = scmp.ne.s32.totalorder %s11540_s11, %s8718_s20  ;;  %p8726_p0 = scmp.lt.s32.totalorder %s8724_s25, %s8718_s20 }
 0x537   : > { %8089 = vmatmul.mubr.msk.f32.gmra.mrb[194].mxu1 %vm5526_vm2, %v11334_v47  ;;  %p8720_p11 = pnand %p8719_p10, %p8886_p5  ;;  %p8727_p1 = por %p8726_p0, %p8725_p13 }
 0x538   : > { %8091 = vmatprep.mubr.msk.f32.mxu1 %vm8788_vm6, %v8789_v46 }
 0x539   : > { %p8721_p12 = pneg %p8720_p11 }
 0x53b   : > { %8092 = vmatmul.mubr.msk.f32.gmra.mrb[196].mxu1 %vm5526_vm2, %v11336_v35  ;;  %p8728_p2 = pnand %p8727_p1, %p8721_p12 }
 0x53c   : > { %8135 = vmatprep.mubr.msk.f32.mxu1 %vm6301_vm13, %v6284_v33 }
 0x5ee   : > { %v5847_v51 = vpop.f32.mrb[184].mxu1 }
 0x5ef   : > { %v8217_v52 = vpack.c.bf16 %v5847_v51, %v5678_v26  ;;  %v8048_v3 = vpop.f32.mrb[185].mxu1  ;;  %v6287_v51 = vld [vmem:[%s11592_s5 + $0x18] sm:$0xff] }
 0x5f0   : > { %v6289_v3 = vld [vmem:[%s11592_s5 + $0x28] sm:$0xff] }
 0x5f1   : > { %8218 = vmatprep.subr.bf16.mxu1 %v8217_v52 }
 0x5f2   : > { %8220 = vmatpush3.bf16.msra.mxu1 %v8217_v52  ;;  %v6288_v52 = vld [vmem:[%s11592_s5 + $0x20] sm:$0xff] }
 0x5f6   : > { %v8059_v63 = vpop.f32.mrb[186].mxu1 }
 0x5f7   : > { %v5942_v8 = vadd.f32 %v8059_v63, %v6996_v44  ;;  %v5936_v49 = vpop.f32.mrb[187].mxu1  ;;  %v6291_v63 = vld [vmem:[%s11592_s5 + $0x38] sm:$0xff] }
 0x5f8   : > { %v5937_v53 = vadd.f32 %v6996_v44, %v5936_v49  ;;  %v6290_v44 = vld [vmem:[%s11592_s5 + $0x30] sm:$0xff]  ;;  %v7027_v49 = vld [vmem:[%s11596_s9] ss:$0 sm:$0xff] }
 0x5f9   : > { %v5950_v1 = vmul.f32 %v5948_v29, %v5942_v8  ;;  %vm5947_vm5 = vcmp.gt.f32.partialorder %v5942_v8, 0.0 }
 0x5fa   : > { %vm5946_vm7 = vcmp.gt.f32.partialorder %v5937_v53, 0.0  ;;  %v5949_v47 = vmul.f32 %v5948_v29, %v5937_v53  ;;  %v6292_v29 = vld [vmem:[%s11592_s5 + $0x40] sm:$0xff] }
 0x5fb   : > { %v5952_v58 = vsel %vm5947_vm5, %v5942_v8, %v5950_v1  ;;  %v6293_v8 = vld [vmem:[%s11592_s5 + $0x48] sm:$0xff] }
 0x5fc   : > { %v5951_v35 = vsel %vm5946_vm7, %v5937_v53, %v5949_v47 }
 0x5fd   : > { %8068 = vmatprep.mubr.msk.f32.mxu0 %vm5526_vm2, %v5951_v35 }
 0x5fe   : > { %8069 = vmatmul.mubr.msk.f32.vlgmr.msra.gmra.mrb[200].mxu0 %vm5526_vm2, %v5952_v58  ;;  %v6133_v34 = vpop.f32.mrb[188].mxu1 }
 0x5ff   : > { %v6134_v7 = vadd.f32 %v7011_v32, %v6133_v34  ;;  %8213 = vmatpush3.bf16.msra.mxu0 %v8212_v39  ;;  %v8081_v60 = vpop.f32.mrb[189].mxu1  ;;  %8102 = vmatprep.mubr.msk.f32.mxu0 %vm8788_vm6, %v8789_v46 }
 0x600   : > { %8214 = vmatprep.subr.bf16.mxu0 %v8787_v18 }
 0x601   : > { %vm6158_vm8 = vcmp.gt.f32.partialorder %v6134_v7, 0.0  ;;  %v6164_v5 = vmul.f32 %v6163_v21, %v6134_v7 }
 0x602   : > { %v6138_v30 = vpop.f32.mrb[190].mxu1 }
 0x603   : > { %v6169_v38 = vsel %vm6158_vm8, %v6134_v7, %v6164_v5  ;;  %v6139_v11 = vadd.f32 %v7011_v32, %v6138_v30  ;;  %8216 = vmatpush3.bf16.msra.mxu0 %v8215_v61  ;;  %v8084_v37 = vpop.f32.mrb[191].mxu1 }
 0x605   : > { %vm6159_vm9 = vcmp.gt.f32.partialorder %v6139_v11, 0.0  ;;  %v6165_v42 = vmul.f32 %v6163_v21, %v6139_v11 }
 0x606   : > { %8103 = vmatmul.mubr.msk.f32.vlgmr.msra.gmra.mrb[202].mxu0 %vm5526_vm2, %v6169_v38  ;;  %v6143_v45 = vpop.f32.mrb[192].mxu1 }
 0x607   : > { %v6144_v19 = vadd.f32 %v7011_v32, %v6143_v45  ;;  %v8087_v56 = vpop.f32.mrb[193].mxu1  ;;  %8105 = vmatprep.mubr.msk.f32.mxu0 %vm8788_vm6, %v8789_v46  ;;  %v6170_v48 = vsel %vm6159_vm9, %v6139_v11, %v6165_v42 }
 0x609   : > { %vm6160_vm10 = vcmp.gt.f32.partialorder %v6144_v19, 0.0  ;;  %v6166_v18 = vmul.f32 %v6163_v21, %v6144_v19 }
 0x60a   : > { %8106 = vmatmul.mubr.msk.f32.gmra.mrb[204].mxu0 %vm5526_vm2, %v6170_v48  ;;  %v6148_v40 = vpop.f32.mrb[194].mxu1 }
 0x60b   : > { %v6149_v36 = vadd.f32 %v7011_v32, %v6148_v40  ;;  %v8090_v27 = vpop.f32.mrb[195].mxu1  ;;  %8108 = vmatprep.mubr.msk.f32.mxu0 %vm8788_vm6, %v8789_v46  ;;  %v6171_v25 = vsel %vm6160_vm10, %v6144_v19, %v6166_v18 }
 0x60d   : > { %vm6161_vm11 = vcmp.gt.f32.partialorder %v6149_v36, 0.0  ;;  %v6167_v26 = vmul.f32 %v6163_v21, %v6149_v36 }
 0x60e   : > { %8109 = vmatmul.mubr.msk.f32.gmra.mrb[206].mxu0 %vm5526_vm2, %v6171_v25  ;;  %v6153_v43 = vpop.f32.mrb[196].mxu1 }
 0x60f   : > { %v6154_v57 = vadd.f32 %v7011_v32, %v6153_v43  ;;  %v8093_v0 = vpop.f32.mrb[197].mxu1  ;;  %8111 = vmatprep.mubr.msk.f32.mxu0 %vm8788_vm6, %v8789_v46  ;;  %v6172_v17 = vsel %vm6161_vm11, %v6149_v36, %v6167_v26 }
 0x611   : > { %vm6162_vm12 = vcmp.gt.f32.partialorder %v6154_v57, 0.0  ;;  %v6168_v24 = vmul.f32 %v6163_v21, %v6154_v57 }
 0x612   : > { %8112 = vmatmul.mubr.msk.f32.gmra.mrb[208].mxu0 %vm5526_vm2, %v6172_v17 }
 0x613   : > { %8114 = vmatprep.mubr.msk.f32.mxu0 %vm8788_vm6, %v8789_v46  ;;  %v6173_v6 = vsel %vm6162_vm12, %v6154_v57, %v6168_v24 }
 0x616   : > { %8115 = vmatmul.mubr.msk.f32.gmra.mrb[210].mxu0 %vm5526_vm2, %v6173_v6 }
 0x6d1   : > { %v8070_v15 = vpop.f32.mrb[200].mxu0 }
 0x6d2   : > { %v6030_v31 = vpop.f32.mrb[201].mxu0 }
 0x6d3   : > { %v8221_v54 = vpack.c.bf16 %v8070_v15, %v6030_v31 }
 0x6d5   : > { %8222 = vmatprep.subr.bf16.mxu1 %v8221_v54 }
 0x6d6   : > { %8224 = vmatpush3.bf16.msra.mxu1 %v8221_v54 }
 0x6d9   : > { %v6260_v50 = vpop.f32.mrb[202].mxu0 }
 0x6da   : > { %v8104_v2 = vpop.f32.mrb[203].mxu0 }
 0x6dd   : > { %v6265_v14 = vpop.f32.mrb[204].mxu0 }
 0x6de   : > { %v8225_v16 = vpack.c.bf16 %v6265_v14, %v6260_v50  ;;  %v8107_v46 = vpop.f32.mrb[205].mxu0 }
 0x6e0   : > { %8226 = vmatprep.subr.bf16.mxu1 %v8225_v16 }
 0x6e1   : > { %v6270_v22 = vpop.f32.mrb[206].mxu0  ;;  %8228 = vmatpush3.bf16.msra.mxu1 %v8225_v16 }
 0x6e2   : > { %v8110_v10 = vpop.f32.mrb[207].mxu0 }
 0x6e5   : > { %v6275_v41 = vpop.f32.mrb[208].mxu0 }
 0x6e6   : > { %v8229_v20 = vpack.c.bf16 %v6275_v41, %v6270_v22  ;;  %v8113_v23 = vpop.f32.mrb[209].mxu0 }
 0x6e8   : > { %8230 = vmatprep.subr.bf16.mxu1 %v8229_v20 }
 0x6e9   : > { %v6280_v62 = vpop.f32.mrb[210].mxu0  ;;  %8232 = vmatpush3.bf16.msra.mxu1 %v8229_v20 }
 0x6ea   : > { %v8116_v4 = vpop.f32.mrb[211].mxu0  ;;  %8133 = vmatprep.subr.mxu1 %v6280_v62 }
 0x6ed   : > { %8134 = vmatpush3.msra.mxu1 %v6280_v62 }
 0x6ee   : > { %8136 = vmatmul.mubr.msk.f32.vlgmr.msra.gmra.mrb[198].mxu1 %vm6301_vm13, %v6285_v28 }
 0x6ef   : > { %8138 = vmatprep.mubr.msk.f32.mxu1 %vm6301_vm13, %v6286_v9 }
 0x6f2   : > { %8139 = vmatmul.mubr.msk.f32.gmra.mrb[200].mxu1 %vm6301_vm13, %v6287_v51 }
 0x6f3   : > { %8141 = vmatprep.mubr.msk.f32.mxu1 %vm6301_vm13, %v6288_v52 }
 0x6f6   : > { %8142 = vmatmul.mubr.msk.f32.gmra.mrb[202].mxu1 %vm6301_vm13, %v6289_v3 }
 0x6f7   : > { %8144 = vmatprep.mubr.msk.f32.mxu1 %vm6301_vm13, %v6290_v44 }
 0x6fa   : > { %8145 = vmatmul.mubr.msk.f32.gmra.mrb[204].mxu1 %vm6301_vm13, %v6291_v63 }
 0x6fb   : > { %8147 = vmatprep.mubr.msk.f32.mxu1 %vm6301_vm13, %v6292_v29 }
 0x6fe   : > { %8148 = vmatmul.mubr.msk.f32.gmra.mrb[206].mxu1 %vm6301_vm13, %v6293_v8 }
 0x7c1   : > { %v8137_v53 = vpop.f32.mrb[198].mxu1 }
 0x7c2   : > { %v6404_v12 = vadd.f32 %v8137_v53, %v7027_v49  ;;  %v6398_v1 = vpop.f32.mrb[199].mxu1 }
 0x7c3   : > { %v6399_v47 = vadd.f32 %v7027_v49, %v6398_v1 }
 0x7c4   : > { %vm6449_vm6 = vcmp.gt.f32.partialorder %v6404_v12, 0.0  ;;  %v6460_v39 = vmul.f32 %v6458_v59, %v6404_v12 }
 0x7c5   : > { %vm6448_vm14 = vcmp.gt.f32.partialorder %v6399_v47, 0.0  ;;  %v6459_v35 = vmul.f32 %v6458_v59, %v6399_v47  ;;  %v8140_v32 = vpop.f32.mrb[200].mxu1 }
 0x7c6   : > { %v6470_v55 = vsel %vm6449_vm6, %v6404_v12, %v6460_v39  ;;  %v6414_v13 = vadd.f32 %v8140_v32, %v7027_v49  ;;  %v6408_v58 = vpop.f32.mrb[201].mxu1 }
 0x7c7   : > { %6480 = vst [vmem:[%s11523_s27 + $0x8] sm:$0xff] %v6470_v55  ;;  %v6469_v34 = vsel %vm6448_vm14, %v6399_v47, %v6459_v35  ;;  %v6409_v21 = vadd.f32 %v7027_v49, %v6408_v58 }
 0x7c8   : > { %6479 = vst [vmem:[%s11523_s27] sm:$0xff] %v6469_v34  ;;  %vm6451_vm15 = vcmp.gt.f32.partialorder %v6414_v13, 0.0  ;;  %v6462_v7 = vmul.f32 %v6458_v59, %v6414_v13 }
 0x7c9   : > { %vm6450_vm0 = vcmp.gt.f32.partialorder %v6409_v21, 0.0  ;;  %v6461_v60 = vmul.f32 %v6458_v59, %v6409_v21  ;;  %v8143_v61 = vpop.f32.mrb[202].mxu1 }
 0x7ca   : > { %v6472_v5 = vsel %vm6451_vm15, %v6414_v13, %v6462_v7  ;;  %v6424_v30 = vadd.f32 %v8143_v61, %v7027_v49  ;;  %v6418_v38 = vpop.f32.mrb[203].mxu1 }
 0x7cb   : > { %6482 = vst [vmem:[%s11523_s27 + $0x18] sm:$0xff] %v6472_v5  ;;  %v6471_v11 = vsel %vm6450_vm0, %v6409_v21, %v6461_v60  ;;  %v6419_v37 = vadd.f32 %v7027_v49, %v6418_v38 }
 0x7cc   : > { %6481 = vst [vmem:[%s11523_s27 + $0x10] sm:$0xff] %v6471_v11  ;;  %vm6453_vm1 = vcmp.gt.f32.partialorder %v6424_v30, 0.0  ;;  %v6464_v42 = vmul.f32 %v6458_v59, %v6424_v30 }
 0x7cd   : > { %vm6452_vm2 = vcmp.gt.f32.partialorder %v6419_v37, 0.0  ;;  %v6463_v45 = vmul.f32 %v6458_v59, %v6419_v37  ;;  %v8146_v19 = vpop.f32.mrb[204].mxu1 }
 0x7ce   : > { %v6474_v56 = vsel %vm6453_vm1, %v6424_v30, %v6464_v42  ;;  %v6434_v48 = vadd.f32 %v8146_v19, %v7027_v49  ;;  %v6428_v18 = vpop.f32.mrb[205].mxu1 }
 0x7cf   : > { %6484 = vst [vmem:[%s11523_s27 + $0x28] sm:$0xff] %v6474_v56  ;;  %v6473_v40 = vsel %vm6452_vm2, %v6419_v37, %v6463_v45  ;;  %v6429_v36 = vadd.f32 %v7027_v49, %v6428_v18 }
 0x7d0   : > { %6483 = vst [vmem:[%s11523_s27 + $0x20] sm:$0xff] %v6473_v40  ;;  %vm6455_vm3 = vcmp.gt.f32.partialorder %v6434_v48, 0.0  ;;  %v6466_v27 = vmul.f32 %v6458_v59, %v6434_v48 }
 0x7d1   : > { %vm6454_vm4 = vcmp.gt.f32.partialorder %v6429_v36, 0.0  ;;  %v6465_v25 = vmul.f32 %v6458_v59, %v6429_v36  ;;  %v8149_v26 = vpop.f32.mrb[206].mxu1 }
 0x7d2   : > { %v6476_v43 = vsel %vm6455_vm3, %v6434_v48, %v6466_v27  ;;  %v6444_v57 = vadd.f32 %v8149_v26, %v7027_v49  ;;  %v6438_v0 = vpop.f32.mrb[207].mxu1 }
 0x7d3   : > { %6486 = vst [vmem:[%s11523_s27 + $0x38] sm:$0xff] %v6476_v43  ;;  %v6475_v17 = vsel %vm6454_vm4, %v6429_v36, %v6465_v25  ;;  %v6439_v24 = vadd.f32 %v7027_v49, %v6438_v0 }
 0x7d4   : > { %6485 = vst [vmem:[%s11523_s27 + $0x30] sm:$0xff] %v6475_v17  ;;  %vm6457_vm5 = vcmp.gt.f32.partialorder %v6444_v57, 0.0  ;;  %v6468_v6 = vmul.f32 %v6458_v59, %v6444_v57 }
 0x7d5   : > { %vm6456_vm7 = vcmp.gt.f32.partialorder %v6439_v24, 0.0  ;;  %v6467_v33 = vmul.f32 %v6458_v59, %v6439_v24 }
 0x7d6   : > { %v6478_v15 = vsel %vm6457_vm5, %v6444_v57, %v6468_v6 }
 0x7d7   : > { %6488 = vst [vmem:[%s11523_s27 + $0x48] sm:$0xff] %v6478_v15  ;;  %v6477_v31 = vsel %vm6456_vm7, %v6439_v24, %v6467_v33 }
 0x7d8   : > { %6487 = vst [vmem:[%s11523_s27 + $0x40] sm:$0xff] %v6477_v31 }
 0x7d9   : > { %8731 = shalt.err (!%p8728_p2)
}
 0x7da   : > { %s8732_s21 = scalar_lea.hbm %s11538_s17, 1280  ;;  %s8736_s28 = scalar_lea.hbm %s11597_s10, 2560 }
 0x7db   : > { %p8733_p3 = scmp.ne.s32.totalorder %s11538_s17, %s8732_s21  ;;  %p8737_p8 = scmp.lt.u32.totalorder %s11538_s17, %s11597_s10 }
 0x7dc   : > { %p8738_p9 = scmp.lt.u32.totalorder %s8736_s28, %s8732_s21  ;;  %p8740_p11 = scmp.lt.u32.totalorder %s8732_s21, %s11538_s17 }
 0x7dd   : > { %p8734_p4 = pnand %p8733_p3, %p8886_p5 }
 0x7de   : > { %p8739_p10 = por %p8738_p9, %p8737_p8 }
 0x7df   : > { %p8735_p7 = pneg %p8734_p4 }
 0x7e0   : > { %p8741_p12 = por %p8740_p11, %p8739_p10 }
 0x7e2   : > { %p8742_p13 = pnand %p8741_p12, %p8735_p7 }
 0x7e4   : > { %8745 = shalt.err (!%p8742_p13)
}
 0x7e5   : > { %s8791_s20 = smov 128   ;;  %s8792_s26 = smov 8  }
 0x7e6   : > { %8240 = dma.vmem_to_hbm [thread:$0]  (%p8886_p5), %s11540_s11, 1280, %s11538_s17, %s11546_s18, %s8791_s20, %s8791_s20, %s8792_s26  }
 0x7e7 PF: > { %p8252_p0 = scmp.ge.s32.totalorder %s8784_s16, 2  ;;  %s6518_s25 = sand.u32 1, %s8772_s13  }
 0x7e8   : > { %s6519_s21 = scalar_lea.sflag [#allocation3], %s6518_s25 }
 0x7e9   : > { %p8247_p1 = pnand %p8252_p0, %p8890_p6 }
 0x7eb   : > { %8767 = dma.done.wait (!%p8247_p1), %s6519_s21, 1280  }
 0x7ec   : > { %8769 = vsyncadd (!%p8247_p1), %s6519_s21, 4294966016  ;;  %p21_p2 = scmp.ge.s32.totalorder %s8873_s19, 4   ;;  %s11618_s13 = smov %s8776_s14 }
 0x7ed   : > { %s11619_s14 = smov %s8780_s15  ;;  %s11620_s15 = smov %s8884_s22 }
 0x7ee   : > { %s11621_s16 = smov %s8873_s19  ;;  %23 = sbr.rel (!%p21_p2) target bundleno = 4 (0x4), region = 109 }
 0x7f5   :  { %6524 = vsyncpa [#allocation3], 1 }
 0x7f6   :  { %6526 = vsyncpa [#allocation3 + $0x1], 1 }
 0x7f7   :  { %6527 = vsyncpa [#allocation4], 1 }
 0x7f8   :  { %6529 = vsyncpa [#allocation4 + $0x1], 1 }

</bundles_post_ra>
